<compile_context>
chip_gen: v6e
topology: v6e:2x2x1
jax: 0.10.0
libtpu: 0.0.40
codegen_flags: <defaults>
</compile_context>

<pallas_src>
import functools

import jax
import jax.numpy as jnp
from jax import lax
from jax.experimental import pallas as pl
from jax.experimental.pallas import tpu as pltpu

LANE = 128


def _round_up(x, m):
    return ((x + m - 1) // m) * m


# --------------------------------------------------------------------------
# Kernel: one grid step == (batch block, time block of Tt steps).
# Weights resident (constant index maps); hidden state carried across time
# blocks in a VMEM scratch, across inner timesteps as a fori_loop value.
# --------------------------------------------------------------------------
def rnn_rollout_kernel(obs_ref, h0_ref,
                       w1_ref, b1_ref, w2_ref, b2_ref,
                       w_ih_ref, b_ih_ref, w_hh_ref, b_hh_ref,
                       w_out_ref, b_out_ref,
                       q_ref, h_out_ref,
                       h_carry, *, hp, tt):
    tb = pl.program_id(1)
    nt = pl.num_programs(1)

    @pl.when(tb == 0)
    def _init():
        h_carry[...] = h0_ref[...]

    # Hoist weight / bias loads out of the unrolled time loop.
    w1 = w1_ref[...]          # bf16 (obs_dim, Hp)
    b1 = b1_ref[...]          # f32  (1, Hp)
    w2 = w2_ref[...]          # bf16 (Hp, Hp)
    b2 = b2_ref[...]
    w_ih = w_ih_ref[...]      # bf16 (Hp, 3Hp)   gate slots: [r | z | n]
    b_ih = b_ih_ref[...]      # f32  (1, 3Hp)
    w_hh = w_hh_ref[...]      # bf16 (Hp, 3Hp)
    b_hh = b_hh_ref[...]
    w_out = w_out_ref[...]    # bf16 (Hp, Ap)
    b_out = b_out_ref[...]    # f32  (1, Ap)

    def step(i, h):
        # ----- encoder: Linear -> ReLU -> Linear -> ReLU (n_layers = 2) -----
        x = obs_ref[i].astype(jnp.bfloat16)                           # (Bb, obs_dim)
        x = jnp.maximum(
            jnp.dot(x, w1, preferred_element_type=jnp.float32) + b1, 0.0)
        x = jnp.maximum(
            jnp.dot(x.astype(jnp.bfloat16), w2,
                    preferred_element_type=jnp.float32) + b2, 0.0)

        # ----- GRUCell: two full-gate MXU dots, f32 gate math -----
        gi = jnp.dot(x.astype(jnp.bfloat16), w_ih,
                     preferred_element_type=jnp.float32) + b_ih       # (Bb, 3Hp)
        gh = jnp.dot(h.astype(jnp.bfloat16), w_hh,
                     preferred_element_type=jnp.float32) + b_hh       # (Bb, 3Hp)

        r = jax.nn.sigmoid(gi[:, :hp] + gh[:, :hp])
        z = jax.nn.sigmoid(gi[:, hp:2 * hp] + gh[:, hp:2 * hp])
        n = jnp.tanh(gi[:, 2 * hp:] + r * gh[:, 2 * hp:])
        h_new = (1.0 - z) * n + z * h

        # ----- output head: Linear (non-dueling) -----
        q_ref[i] = (jnp.dot(h_new.astype(jnp.bfloat16), w_out,
                            preferred_element_type=jnp.float32) + b_out)
        # TODO(synk): DuelingLayer branch (args.dueling=True) not implemented —
        # its definition is external to the provided module.
        return h_new

    h = lax.fori_loop(0, tt, step, h_carry[...], unroll=True)
    h_carry[...] = h

    @pl.when(tb == nt - 1)
    def _final():
        h_out_ref[...] = h


# --------------------------------------------------------------------------
# Wrappers
# --------------------------------------------------------------------------
def rnn_agent_rollout(obs_seq, h0, padded, hidden, n_actions, hp, ap,
                      tt=None, batch_blocks=None):
    """Runs T GRU timesteps. Returns (q_seq, h_final), unpadded."""
    T, B, obs_dim = obs_seq.shape

    # Time blocking: small T -> one grid point with whole sequence in VMEM.
    if tt is None:
        tt = T if T <= 16 else 8
    tt = min(tt, T)
    assert T % tt == 0, "T must be divisible by the time block"
    nt = T // tt

    # Batch blocking: split across 2 blocks (v7x megacore) when big enough.
    if batch_blocks is None:
        batch_blocks = 2 if (B >= 16 and B % 16 == 0) else 1
    assert B % batch_blocks == 0
    nb = batch_blocks
    bb = B // nb

    h0p = jnp.pad(h0.astype(jnp.float32), ((0, 0), (0, hp - h0.shape[-1])))

    args = (
        obs_seq.astype(jnp.float32), h0p,
        padded["w1"], padded["b1"], padded["w2"], padded["b2"],
        padded["w_ih"], padded["b_ih"], padded["w_hh"], padded["b_hh"],
        padded["w_out"], padded["b_out"],
    )

    def const_spec(shape):
        nd = len(shape)
        return pl.BlockSpec(shape, lambda b, t, nd=nd: (0,) * nd)

    in_specs = [
        pl.BlockSpec((tt, bb, obs_dim), lambda b, t: (t, b, 0)),
        pl.BlockSpec((bb, hp), lambda b, t: (b, 0)),
    ] + [const_spec(a.shape) for a in args[2:]]

    out_shapes = (
        jax.ShapeDtypeStruct((T, B, ap), jnp.float32),
        jax.ShapeDtypeStruct((B, hp), jnp.float32),
    )
    out_specs = (
        pl.BlockSpec((tt, bb, ap), lambda b, t: (t, b, 0)),
        pl.BlockSpec((bb, hp), lambda b, t: (b, 0)),
    )

    q_pad, h_pad = pl.pallas_call(
        functools.partial(rnn_rollout_kernel, hp=hp, tt=tt),
        out_shape=out_shapes,
        grid=(nb, nt),
        in_specs=in_specs,
        out_specs=out_specs,
        scratch_shapes=[pltpu.VMEM((bb, hp), jnp.float32)],
        compiler_params=pltpu.CompilerParams(
            # batch blocks independent (megacore-shardable); time is a
            # sequential carry.
            dimension_semantics=("parallel", "arbitrary")),
    )(*args)

    return q_pad[:, :, :n_actions], h_pad[:, :hidden]


def rnn_agent_forward(obs, h, padded, hidden, n_actions, hp, ap):
    """Single-step forward matching the PyTorch module signature: (obs, h) -> (q, h)."""
    q_seq, h_new = rnn_agent_rollout(obs[None], h, padded, hidden, n_actions, hp, ap)
    return q_seq[0], h_new


# --------------------------------------------------------------------------
# Parameters (unpadded, PyTorch-equivalent layout, weights stored as (in, out))
# --------------------------------------------------------------------------
def init_params(key, obs_dim, hidden, n_actions):
    ks = jax.random.split(key, 12)

    def u(k, shape, fan_in):
        bound = 1.0 / jnp.sqrt(fan_in)
        return jax.random.uniform(k, shape, jnp.float32, -bound, bound)

    return {
        "w1": u(ks[0], (obs_dim, hidden), obs_dim),
        "b1": u(ks[1], (1, hidden), obs_dim),
        "w2": u(ks[2], (hidden, hidden), hidden),
        "b2": u(ks[3], (1, hidden), hidden),
        "w_ih": u(ks[4], (hidden, 3 * hidden), hidden),
        "b_ih": u(ks[5], (1, 3 * hidden), hidden),
        "w_hh": u(ks[6], (hidden, 3 * hidden), hidden),
        "b_hh": u(ks[7], (1, 3 * hidden), hidden),
        "w_out": u(ks[8], (hidden, n_actions), hidden),
        "b_out": u(ks[9], (1, n_actions), hidden),
    }


def prepare_padded_params(p, hidden, n_actions):
    """Zero-pad to lane-dense shapes; weights bf16 (MXU), biases f32 (VPU adds).

    Each GRU gate (r, z, n) gets its own 128-lane-aligned slot in a single
    (Hp, 3Hp) weight so the kernel needs just two dots per step. Padded rows /
    columns are exactly zero, so padded lanes of x and h stay identically zero
    through ReLU and the GRU update (sigmoid(0)=0.5, tanh(0)=0, h0_pad=0).
    """
    H = hidden
    Hp = _round_up(H, LANE)
    Ap = _round_up(n_actions, LANE)

    def pad2(a, rows, cols):
        return jnp.pad(a, ((0, rows - a.shape[0]), (0, cols - a.shape[1])))

    def slot3(a, rows):
        # pack (r, z, n) gate blocks into their own Hp-wide lane slots
        out = jnp.zeros((rows, 3 * Hp), jnp.float32)
        r0 = a.shape[0]
        out = out.at[:r0, 0:H].set(a[:, :H])
        out = out.at[:r0, Hp:Hp + H].set(a[:, H:2 * H])
        out = out.at[:r0, 2 * Hp:2 * Hp + H].set(a[:, 2 * H:])
        return out

    wdt = jnp.bfloat16
    padded = {
        "w1": pad2(p["w1"], p["w1"].shape[0], Hp).astype(wdt),
        "b1": pad2(p["b1"], 1, Hp),
        "w2": pad2(p["w2"], Hp, Hp).astype(wdt),
        "b2": pad2(p["b2"], 1, Hp),
        "w_ih": slot3(p["w_ih"], Hp).astype(wdt),
        "b_ih": slot3(p["b_ih"], 1),
        "w_hh": slot3(p["w_hh"], Hp).astype(wdt),
        "b_hh": slot3(p["b_hh"], 1),
        "w_out": pad2(p["w_out"], Hp, Ap).astype(wdt),
        "b_out": pad2(p["b_out"], 1, Ap),
    }
    return padded, Hp, Ap


# --------------------------------------------------------------------------
# Pure-JAX f32 reference mirroring PyTorch semantics (for verification)
# --------------------------------------------------------------------------
def reference_forward(obs, h, p):
    x = jnp.maximum(obs @ p["w1"] + p["b1"], 0.0)
    x = jnp.maximum(x @ p["w2"] + p["b2"], 0.0)
    H = h.shape[-1]
    gi = x @ p["w_ih"] + p["b_ih"]
    gh = h @ p["w_hh"] + p["b_hh"]
    r = jax.nn.sigmoid(gi[:, :H] + gh[:, :H])
    z = jax.nn.sigmoid(gi[:, H:2 * H] + gh[:, H:2 * H])
    n = jnp.tanh(gi[:, 2 * H:] + r * gh[:, 2 * H:])
    h_new = (1.0 - z) * n + z * h
    q = h_new @ p["w_out"] + p["b_out"]
    return q, h_new


if __name__ == "__main__":
    # Small shapes consistent with the module: n_layers=2, dueling=False.
    T, B, OBS_DIM, HIDDEN, N_ACTIONS = 8, 8, 16, 32, 8

    key = jax.random.PRNGKey(0)
    k_obs, k_p = jax.random.split(key, 2)

    obs_seq = jax.random.normal(k_obs, (T, B, OBS_DIM), jnp.float32)
    # init_hidden() gives zeros(1, hidden); broadcast to batch like the algo does.
    h0 = jnp.zeros((B, HIDDEN), jnp.float32)

    params = init_params(k_p, OBS_DIM, HIDDEN, N_ACTIONS)
    padded, Hp, Ap = prepare_padded_params(params, HIDDEN, N_ACTIONS)

    # --- whole-rollout kernel (T timesteps, one pallas_call, single grid pt) ---
    rollout_fn = jax.jit(functools.partial(
        rnn_agent_rollout, padded=padded, hidden=HIDDEN, n_actions=N_ACTIONS,
        hp=Hp, ap=Ap))
    q_seq, h_fin = rollout_fn(obs_seq, h0)
    jax.block_until_ready((q_seq, h_fin))

    # --- reference: unroll timestep-by-timestep in pure f32 JAX ---
    h_ref = h0
    q_ref_list = []
    for t in range(T):
        q_t, h_ref = reference_forward(obs_seq[t], h_ref, params)
        q_ref_list.append(q_t)
    q_ref = jnp.stack(q_ref_list)

    assert q_seq.shape == (T, B, N_ACTIONS) and h_fin.shape == (B, HIDDEN)
    # bf16 matmul operands vs. f32 reference -> loosened tolerance.
    assert jnp.allclose(q_seq, q_ref, atol=5e-2, rtol=5e-2), \
        float(jnp.max(jnp.abs(q_seq - q_ref)))
    assert jnp.allclose(h_fin, h_ref, atol=5e-2, rtol=5e-2), \
        float(jnp.max(jnp.abs(h_fin - h_ref)))

    # --- single-step path matching the module's forward(obs, h) signature ---
    step_fn = jax.jit(functools.partial(
        rnn_agent_forward, padded=padded, hidden=HIDDEN, n_actions=N_ACTIONS,
        hp=Hp, ap=Ap))
    q1, h1 = step_fn(obs_seq[0], h0)
    jax.block_until_ready((q1, h1))
    q1_ref, h1_ref = reference_forward(obs_seq[0], h0, params)
    assert jnp.allclose(q1, q1_ref, atol=5e-2, rtol=5e-2)
    assert jnp.allclose(h1, h1_ref, atol=5e-2, rtol=5e-2)

    print("KERNEL_OK")
</pallas_src>

<mosaic_0001>
module attributes {stable_mosaic.version = 11 : i64} {
  func.func @rnn_rollout_kernel(%arg0: i32, %arg1: i32, %arg2: memref<8x8x16xf32, #tpu.memory_space<vmem>>, %arg3: memref<8x128xf32, #tpu.memory_space<vmem>>, %arg4: memref<16x128xbf16, #tpu.memory_space<vmem>>, %arg5: memref<1x128xf32, #tpu.memory_space<vmem>>, %arg6: memref<128x128xbf16, #tpu.memory_space<vmem>>, %arg7: memref<1x128xf32, #tpu.memory_space<vmem>>, %arg8: memref<128x384xbf16, #tpu.memory_space<vmem>>, %arg9: memref<1x384xf32, #tpu.memory_space<vmem>>, %arg10: memref<128x384xbf16, #tpu.memory_space<vmem>>, %arg11: memref<1x384xf32, #tpu.memory_space<vmem>>, %arg12: memref<128x128xbf16, #tpu.memory_space<vmem>>, %arg13: memref<1x128xf32, #tpu.memory_space<vmem>>, %arg14: memref<8x8x128xf32, #tpu.memory_space<vmem>>, %arg15: memref<8x128xf32, #tpu.memory_space<vmem>>, %arg16: memref<8x128xf32, #tpu.memory_space<vmem>>) attributes {dimension_semantics = [#tpu.dimension_semantics<parallel>, #tpu.dimension_semantics<arbitrary>], iteration_bounds = array<i64: 1, 1>, scalar_prefetch = 0 : i64, scratch_operands = 1 : i64, tpu.core_type = #tpu.core_type<tc>, window_params = [{transform_indices = @transform_0, window_bounds = array<i64: 8, 8, 16>}, {transform_indices = @transform_1, window_bounds = array<i64: 8, 128>}, {pipeline_mode = #tpu.pipeline_mode<synchronous>, transform_indices = @transform_2, window_bounds = array<i64: 16, 128>}, {pipeline_mode = #tpu.pipeline_mode<synchronous>, transform_indices = @transform_3, window_bounds = array<i64: 1, 128>}, {pipeline_mode = #tpu.pipeline_mode<synchronous>, transform_indices = @transform_4, window_bounds = array<i64: 128, 128>}, {pipeline_mode = #tpu.pipeline_mode<synchronous>, transform_indices = @transform_5, window_bounds = array<i64: 1, 128>}, {pipeline_mode = #tpu.pipeline_mode<synchronous>, transform_indices = @transform_6, window_bounds = array<i64: 128, 384>}, {pipeline_mode = #tpu.pipeline_mode<synchronous>, transform_indices = @transform_7, window_bounds = array<i64: 1, 384>}, {pipeline_mode = #tpu.pipeline_mode<synchronous>, transform_indices = @transform_8, window_bounds = array<i64: 128, 384>}, {pipeline_mode = #tpu.pipeline_mode<synchronous>, transform_indices = @transform_9, window_bounds = array<i64: 1, 384>}, {pipeline_mode = #tpu.pipeline_mode<synchronous>, transform_indices = @transform_10, window_bounds = array<i64: 128, 128>}, {pipeline_mode = #tpu.pipeline_mode<synchronous>, transform_indices = @transform_11, window_bounds = array<i64: 1, 128>}, {transform_indices = @transform_12, window_bounds = array<i64: 8, 8, 128>}, {transform_indices = @transform_13, window_bounds = array<i64: 8, 128>}]} {
    %c0_i32 = arith.constant 0 : i32
    %0 = arith.cmpi eq, %arg1, %c0_i32 : i32
    %1 = arith.extui %0 : i1 to i32
    %c0_i32_0 = arith.constant 0 : i32
    %2 = arith.cmpi ne, %1, %c0_i32_0 : i32
    scf.if %2 {
      %c0_138 = arith.constant 0 : index
      %c0_139 = arith.constant 0 : index
      %474 = vector.load %arg3[%c0_138, %c0_139] : memref<8x128xf32, #tpu.memory_space<vmem>>, vector<8x128xf32>
      %c0_140 = arith.constant 0 : index
      %c0_141 = arith.constant 0 : index
      %475 = vector.load %arg16[%c0_140, %c0_141] : memref<8x128xf32, #tpu.memory_space<vmem>>, vector<8x128xf32>
      tpu.vector_store %arg16[%c0_140, %c0_141], %474 {strides = array<i32>} : memref<8x128xf32, #tpu.memory_space<vmem>>, vector<8x128xf32>,
    } else {
    }
    %c0 = arith.constant 0 : index
    %c0_1 = arith.constant 0 : index
    %3 = vector.load %arg4[%c0, %c0_1] : memref<16x128xbf16, #tpu.memory_space<vmem>>, vector<16x128xbf16>
    %c0_2 = arith.constant 0 : index
    %c0_3 = arith.constant 0 : index
    %4 = vector.load %arg5[%c0_2, %c0_3] : memref<1x128xf32, #tpu.memory_space<vmem>>, vector<1x128xf32>
    %c0_4 = arith.constant 0 : index
    %c0_5 = arith.constant 0 : index
    %5 = vector.load %arg6[%c0_4, %c0_5] : memref<128x128xbf16, #tpu.memory_space<vmem>>, vector<128x128xbf16>
    %c0_6 = arith.constant 0 : index
    %c0_7 = arith.constant 0 : index
    %6 = vector.load %arg7[%c0_6, %c0_7] : memref<1x128xf32, #tpu.memory_space<vmem>>, vector<1x128xf32>
    %c0_8 = arith.constant 0 : index
    %c0_9 = arith.constant 0 : index
    %7 = vector.load %arg8[%c0_8, %c0_9] : memref<128x384xbf16, #tpu.memory_space<vmem>>, vector<128x384xbf16>
    %c0_10 = arith.constant 0 : index
    %c0_11 = arith.constant 0 : index
    %8 = vector.load %arg9[%c0_10, %c0_11] : memref<1x384xf32, #tpu.memory_space<vmem>>, vector<1x384xf32>
    %c0_12 = arith.constant 0 : index
    %c0_13 = arith.constant 0 : index
    %9 = vector.load %arg10[%c0_12, %c0_13] : memref<128x384xbf16, #tpu.memory_space<vmem>>, vector<128x384xbf16>
    %c0_14 = arith.constant 0 : index
    %c0_15 = arith.constant 0 : index
    %10 = vector.load %arg11[%c0_14, %c0_15] : memref<1x384xf32, #tpu.memory_space<vmem>>, vector<1x384xf32>
    %c0_16 = arith.constant 0 : index
    %c0_17 = arith.constant 0 : index
    %11 = vector.load %arg12[%c0_16, %c0_17] : memref<128x128xbf16, #tpu.memory_space<vmem>>, vector<128x128xbf16>
    %c0_18 = arith.constant 0 : index
    %c0_19 = arith.constant 0 : index
    %12 = vector.load %arg13[%c0_18, %c0_19] : memref<1x128xf32, #tpu.memory_space<vmem>>, vector<1x128xf32>
    %c0_20 = arith.constant 0 : index
    %c0_21 = arith.constant 0 : index
    %13 = vector.load %arg16[%c0_20, %c0_21] : memref<8x128xf32, #tpu.memory_space<vmem>>, vector<8x128xf32>
    %c0_i32_22 = arith.constant 0 : i32
    %14 = arith.index_cast %c0_i32_22 : i32 to index
    %c0_23 = arith.constant 0 : index
    %c0_24 = arith.constant 0 : index
    %15 = vector.load %arg2[%14, %c0_23, %c0_24] : memref<8x8x16xf32, #tpu.memory_space<vmem>>, vector<1x8x16xf32>
    %16 = vector.shape_cast %15 : vector<1x8x16xf32> to vector<8x16xf32>
    %17 = arith.truncf %16 : vector<8x16xf32> to vector<8x16xbf16>
    %cst = arith.constant dense<0.000000e+00> : vector<8x128xf32>
    %18 = tpu.matmul %17, %3, %cst {dimension_numbers = #tpu.dot_dimension_numbers<[1], [0], [0], [1], [0, 0, 1, 1], [], []>} : vector<8x16xbf16>, vector<16x128xbf16>, vector<8x128xf32> -> vector<8x128xf32>
    %19 = vector.broadcast %4 : vector<1x128xf32> to vector<8x128xf32>
    %20 = arith.addf %18, %19 : vector<8x128xf32>
    %cst_25 = arith.constant 0.000000e+00 : f32
    %21 = vector.broadcast %cst_25 : f32 to vector<8x128xf32>
    %22 = arith.maximumf %20, %21 : vector<8x128xf32>
    %23 = arith.truncf %22 : vector<8x128xf32> to vector<8x128xbf16>
    %cst_26 = arith.constant dense<0.000000e+00> : vector<8x128xf32>
    %24 = tpu.matmul %23, %5, %cst_26 {dimension_numbers = #tpu.dot_dimension_numbers<[1], [0], [0], [1], [0, 0, 1, 1], [], []>} : vector<8x128xbf16>, vector<128x128xbf16>, vector<8x128xf32> -> vector<8x128xf32>
    %25 = vector.broadcast %6 : vector<1x128xf32> to vector<8x128xf32>
    %26 = arith.addf %24, %25 : vector<8x128xf32>
    %cst_27 = arith.constant 0.000000e+00 : f32
    %27 = vector.broadcast %cst_27 : f32 to vector<8x128xf32>
    %28 = arith.maximumf %26, %27 : vector<8x128xf32>
    %29 = arith.truncf %28 : vector<8x128xf32> to vector<8x128xbf16>
    %cst_28 = arith.constant dense<0.000000e+00> : vector<8x384xf32>
    %30 = tpu.matmul %29, %7, %cst_28 {dimension_numbers = #tpu.dot_dimension_numbers<[1], [0], [0], [1], [0, 0, 1, 1], [], []>} : vector<8x128xbf16>, vector<128x384xbf16>, vector<8x384xf32> -> vector<8x384xf32>
    %31 = vector.broadcast %8 : vector<1x384xf32> to vector<8x384xf32>
    %32 = arith.addf %30, %31 : vector<8x384xf32>
    %33 = arith.truncf %13 : vector<8x128xf32> to vector<8x128xbf16>
    %cst_29 = arith.constant dense<0.000000e+00> : vector<8x384xf32>
    %34 = tpu.matmul %33, %9, %cst_29 {dimension_numbers = #tpu.dot_dimension_numbers<[1], [0], [0], [1], [0, 0, 1, 1], [], []>} : vector<8x128xbf16>, vector<128x384xbf16>, vector<8x384xf32> -> vector<8x384xf32>
    %35 = vector.broadcast %10 : vector<1x384xf32> to vector<8x384xf32>
    %36 = arith.addf %34, %35 : vector<8x384xf32>
    %37 = vector.extract_strided_slice %32 {offsets = [0, 0], sizes = [8, 128], strides = [1, 1]} : vector<8x384xf32> to vector<8x128xf32>
    %38 = vector.extract_strided_slice %36 {offsets = [0, 0], sizes = [8, 128], strides = [1, 1]} : vector<8x384xf32> to vector<8x128xf32>
    %39 = arith.addf %37, %38 : vector<8x128xf32>
    %40 = arith.negf %39 : vector<8x128xf32>
    %41 = math.exp %40 : vector<8x128xf32>
    %cst_30 = arith.constant 1.000000e+00 : f32
    %42 = vector.broadcast %cst_30 : f32 to vector<8x128xf32>
    %43 = arith.addf %42, %41 : vector<8x128xf32>
    %44 = arith.divf %42, %43 : vector<8x128xf32>
    %45 = vector.extract_strided_slice %32 {offsets = [0, 128], sizes = [8, 128], strides = [1, 1]} : vector<8x384xf32> to vector<8x128xf32>
    %46 = vector.extract_strided_slice %36 {offsets = [0, 128], sizes = [8, 128], strides = [1, 1]} : vector<8x384xf32> to vector<8x128xf32>
    %47 = arith.addf %45, %46 : vector<8x128xf32>
    %48 = arith.negf %47 : vector<8x128xf32>
    %49 = math.exp %48 : vector<8x128xf32>
    %cst_31 = arith.constant 1.000000e+00 : f32
    %50 = vector.broadcast %cst_31 : f32 to vector<8x128xf32>
    %51 = arith.addf %50, %49 : vector<8x128xf32>
    %52 = arith.divf %50, %51 : vector<8x128xf32>
    %53 = vector.extract_strided_slice %32 {offsets = [0, 256], sizes = [8, 128], strides = [1, 1]} : vector<8x384xf32> to vector<8x128xf32>
    %54 = vector.extract_strided_slice %36 {offsets = [0, 256], sizes = [8, 128], strides = [1, 1]} : vector<8x384xf32> to vector<8x128xf32>
    %55 = arith.mulf %44, %54 : vector<8x128xf32>
    %56 = arith.addf %53, %55 : vector<8x128xf32>
    %57 = math.tanh %56 : vector<8x128xf32>
    %cst_32 = arith.constant 1.000000e+00 : f32
    %58 = vector.broadcast %cst_32 : f32 to vector<8x128xf32>
    %59 = arith.subf %58, %52 : vector<8x128xf32>
    %60 = arith.mulf %59, %57 : vector<8x128xf32>
    %61 = arith.mulf %52, %13 : vector<8x128xf32>
    %62 = arith.addf %60, %61 : vector<8x128xf32>
    %63 = arith.truncf %62 : vector<8x128xf32> to vector<8x128xbf16>
    %cst_33 = arith.constant dense<0.000000e+00> : vector<8x128xf32>
    %64 = tpu.matmul %63, %11, %cst_33 {dimension_numbers = #tpu.dot_dimension_numbers<[1], [0], [0], [1], [0, 0, 1, 1], [], []>} : vector<8x128xbf16>, vector<128x128xbf16>, vector<8x128xf32> -> vector<8x128xf32>
    %65 = vector.broadcast %12 : vector<1x128xf32> to vector<8x128xf32>
    %66 = arith.addf %64, %65 : vector<8x128xf32>
    %67 = arith.index_cast %c0_i32_22 : i32 to index
    %c0_34 = arith.constant 0 : index
    %c0_35 = arith.constant 0 : index
    %68 = vector.load %arg14[%67, %c0_34, %c0_35] : memref<8x8x128xf32, #tpu.memory_space<vmem>>, vector<1x8x128xf32>
    %69 = vector.shape_cast %68 : vector<1x8x128xf32> to vector<8x128xf32>
    %70 = vector.shape_cast %66 : vector<8x128xf32> to vector<1x8x128xf32>
    tpu.vector_store %arg14[%67, %c0_34, %c0_35], %70 {strides = array<i32>} : memref<8x8x128xf32, #tpu.memory_space<vmem>>, vector<1x8x128xf32>,
    %c1_i32 = arith.constant 1 : i32
    %71 = arith.index_cast %c1_i32 : i32 to index
    %c0_36 = arith.constant 0 : index
    %c0_37 = arith.constant 0 : index
    %72 = vector.load %arg2[%71, %c0_36, %c0_37] : memref<8x8x16xf32, #tpu.memory_space<vmem>>, vector<1x8x16xf32>
    %73 = vector.shape_cast %72 : vector<1x8x16xf32> to vector<8x16xf32>
    %74 = arith.truncf %73 : vector<8x16xf32> to vector<8x16xbf16>
    %cst_38 = arith.constant dense<0.000000e+00> : vector<8x128xf32>
    %75 = tpu.matmul %74, %3, %cst_38 {dimension_numbers = #tpu.dot_dimension_numbers<[1], [0], [0], [1], [0, 0, 1, 1], [], []>} : vector<8x16xbf16>, vector<16x128xbf16>, vector<8x128xf32> -> vector<8x128xf32>
    %76 = vector.broadcast %4 : vector<1x128xf32> to vector<8x128xf32>
    %77 = arith.addf %75, %76 : vector<8x128xf32>
    %cst_39 = arith.constant 0.000000e+00 : f32
    %78 = vector.broadcast %cst_39 : f32 to vector<8x128xf32>
    %79 = arith.maximumf %77, %78 : vector<8x128xf32>
    %80 = arith.truncf %79 : vector<8x128xf32> to vector<8x128xbf16>
    %cst_40 = arith.constant dense<0.000000e+00> : vector<8x128xf32>
    %81 = tpu.matmul %80, %5, %cst_40 {dimension_numbers = #tpu.dot_dimension_numbers<[1], [0], [0], [1], [0, 0, 1, 1], [], []>} : vector<8x128xbf16>, vector<128x128xbf16>, vector<8x128xf32> -> vector<8x128xf32>
    %82 = vector.broadcast %6 : vector<1x128xf32> to vector<8x128xf32>
    %83 = arith.addf %81, %82 : vector<8x128xf32>
    %cst_41 = arith.constant 0.000000e+00 : f32
    %84 = vector.broadcast %cst_41 : f32 to vector<8x128xf32>
    %85 = arith.maximumf %83, %84 : vector<8x128xf32>
    %86 = arith.truncf %85 : vector<8x128xf32> to vector<8x128xbf16>
    %cst_42 = arith.constant dense<0.000000e+00> : vector<8x384xf32>
    %87 = tpu.matmul %86, %7, %cst_42 {dimension_numbers = #tpu.dot_dimension_numbers<[1], [0], [0], [1], [0, 0, 1, 1], [], []>} : vector<8x128xbf16>, vector<128x384xbf16>, vector<8x384xf32> -> vector<8x384xf32>
    %88 = vector.broadcast %8 : vector<1x384xf32> to vector<8x384xf32>
    %89 = arith.addf %87, %88 : vector<8x384xf32>
    %90 = arith.truncf %62 : vector<8x128xf32> to vector<8x128xbf16>
    %cst_43 = arith.constant dense<0.000000e+00> : vector<8x384xf32>
    %91 = tpu.matmul %90, %9, %cst_43 {dimension_numbers = #tpu.dot_dimension_numbers<[1], [0], [0], [1], [0, 0, 1, 1], [], []>} : vector<8x128xbf16>, vector<128x384xbf16>, vector<8x384xf32> -> vector<8x384xf32>
    %92 = vector.broadcast %10 : vector<1x384xf32> to vector<8x384xf32>
    %93 = arith.addf %91, %92 : vector<8x384xf32>
    %94 = vector.extract_strided_slice %89 {offsets = [0, 0], sizes = [8, 128], strides = [1, 1]} : vector<8x384xf32> to vector<8x128xf32>
    %95 = vector.extract_strided_slice %93 {offsets = [0, 0], sizes = [8, 128], strides = [1, 1]} : vector<8x384xf32> to vector<8x128xf32>
    %96 = arith.addf %94, %95 : vector<8x128xf32>
    %97 = arith.negf %96 : vector<8x128xf32>
    %98 = math.exp %97 : vector<8x128xf32>
    %cst_44 = arith.constant 1.000000e+00 : f32
    %99 = vector.broadcast %cst_44 : f32 to vector<8x128xf32>
    %100 = arith.addf %99, %98 : vector<8x128xf32>
    %101 = arith.divf %99, %100 : vector<8x128xf32>
    %102 = vector.extract_strided_slice %89 {offsets = [0, 128], sizes = [8, 128], strides = [1, 1]} : vector<8x384xf32> to vector<8x128xf32>
    %103 = vector.extract_strided_slice %93 {offsets = [0, 128], sizes = [8, 128], strides = [1, 1]} : vector<8x384xf32> to vector<8x128xf32>
    %104 = arith.addf %102, %103 : vector<8x128xf32>
    %105 = arith.negf %104 : vector<8x128xf32>
    %106 = math.exp %105 : vector<8x128xf32>
    %cst_45 = arith.constant 1.000000e+00 : f32
    %107 = vector.broadcast %cst_45 : f32 to vector<8x128xf32>
    %108 = arith.addf %107, %106 : vector<8x128xf32>
    %109 = arith.divf %107, %108 : vector<8x128xf32>
    %110 = vector.extract_strided_slice %89 {offsets = [0, 256], sizes = [8, 128], strides = [1, 1]} : vector<8x384xf32> to vector<8x128xf32>
    %111 = vector.extract_strided_slice %93 {offsets = [0, 256], sizes = [8, 128], strides = [1, 1]} : vector<8x384xf32> to vector<8x128xf32>
    %112 = arith.mulf %101, %111 : vector<8x128xf32>
    %113 = arith.addf %110, %112 : vector<8x128xf32>
    %114 = math.tanh %113 : vector<8x128xf32>
    %cst_46 = arith.constant 1.000000e+00 : f32
    %115 = vector.broadcast %cst_46 : f32 to vector<8x128xf32>
    %116 = arith.subf %115, %109 : vector<8x128xf32>
    %117 = arith.mulf %116, %114 : vector<8x128xf32>
    %118 = arith.mulf %109, %62 : vector<8x128xf32>
    %119 = arith.addf %117, %118 : vector<8x128xf32>
    %120 = arith.truncf %119 : vector<8x128xf32> to vector<8x128xbf16>
    %cst_47 = arith.constant dense<0.000000e+00> : vector<8x128xf32>
    %121 = tpu.matmul %120, %11, %cst_47 {dimension_numbers = #tpu.dot_dimension_numbers<[1], [0], [0], [1], [0, 0, 1, 1], [], []>} : vector<8x128xbf16>, vector<128x128xbf16>, vector<8x128xf32> -> vector<8x128xf32>
    %122 = vector.broadcast %12 : vector<1x128xf32> to vector<8x128xf32>
    %123 = arith.addf %121, %122 : vector<8x128xf32>
    %124 = arith.index_cast %c1_i32 : i32 to index
    %c0_48 = arith.constant 0 : index
    %c0_49 = arith.constant 0 : index
    %125 = vector.load %arg14[%124, %c0_48, %c0_49] : memref<8x8x128xf32, #tpu.memory_space<vmem>>, vector<1x8x128xf32>
    %126 = vector.shape_cast %125 : vector<1x8x128xf32> to vector<8x128xf32>
    %127 = vector.shape_cast %123 : vector<8x128xf32> to vector<1x8x128xf32>
    tpu.vector_store %arg14[%124, %c0_48, %c0_49], %127 {strides = array<i32>} : memref<8x8x128xf32, #tpu.memory_space<vmem>>, vector<1x8x128xf32>,
    %c2_i32 = arith.constant 2 : i32
    %128 = arith.index_cast %c2_i32 : i32 to index
    %c0_50 = arith.constant 0 : index
    %c0_51 = arith.constant 0 : index
    %129 = vector.load %arg2[%128, %c0_50, %c0_51] : memref<8x8x16xf32, #tpu.memory_space<vmem>>, vector<1x8x16xf32>
    %130 = vector.shape_cast %129 : vector<1x8x16xf32> to vector<8x16xf32>
    %131 = arith.truncf %130 : vector<8x16xf32> to vector<8x16xbf16>
    %cst_52 = arith.constant dense<0.000000e+00> : vector<8x128xf32>
    %132 = tpu.matmul %131, %3, %cst_52 {dimension_numbers = #tpu.dot_dimension_numbers<[1], [0], [0], [1], [0, 0, 1, 1], [], []>} : vector<8x16xbf16>, vector<16x128xbf16>, vector<8x128xf32> -> vector<8x128xf32>
    %133 = vector.broadcast %4 : vector<1x128xf32> to vector<8x128xf32>
    %134 = arith.addf %132, %133 : vector<8x128xf32>
    %cst_53 = arith.constant 0.000000e+00 : f32
    %135 = vector.broadcast %cst_53 : f32 to vector<8x128xf32>
    %136 = arith.maximumf %134, %135 : vector<8x128xf32>
    %137 = arith.truncf %136 : vector<8x128xf32> to vector<8x128xbf16>
    %cst_54 = arith.constant dense<0.000000e+00> : vector<8x128xf32>
    %138 = tpu.matmul %137, %5, %cst_54 {dimension_numbers = #tpu.dot_dimension_numbers<[1], [0], [0], [1], [0, 0, 1, 1], [], []>} : vector<8x128xbf16>, vector<128x128xbf16>, vector<8x128xf32> -> vector<8x128xf32>
    %139 = vector.broadcast %6 : vector<1x128xf32> to vector<8x128xf32>
    %140 = arith.addf %138, %139 : vector<8x128xf32>
    %cst_55 = arith.constant 0.000000e+00 : f32
    %141 = vector.broadcast %cst_55 : f32 to vector<8x128xf32>
    %142 = arith.maximumf %140, %141 : vector<8x128xf32>
    %143 = arith.truncf %142 : vector<8x128xf32> to vector<8x128xbf16>
    %cst_56 = arith.constant dense<0.000000e+00> : vector<8x384xf32>
    %144 = tpu.matmul %143, %7, %cst_56 {dimension_numbers = #tpu.dot_dimension_numbers<[1], [0], [0], [1], [0, 0, 1, 1], [], []>} : vector<8x128xbf16>, vector<128x384xbf16>, vector<8x384xf32> -> vector<8x384xf32>
    %145 = vector.broadcast %8 : vector<1x384xf32> to vector<8x384xf32>
    %146 = arith.addf %144, %145 : vector<8x384xf32>
    %147 = arith.truncf %119 : vector<8x128xf32> to vector<8x128xbf16>
    %cst_57 = arith.constant dense<0.000000e+00> : vector<8x384xf32>
    %148 = tpu.matmul %147, %9, %cst_57 {dimension_numbers = #tpu.dot_dimension_numbers<[1], [0], [0], [1], [0, 0, 1, 1], [], []>} : vector<8x128xbf16>, vector<128x384xbf16>, vector<8x384xf32> -> vector<8x384xf32>
    %149 = vector.broadcast %10 : vector<1x384xf32> to vector<8x384xf32>
    %150 = arith.addf %148, %149 : vector<8x384xf32>
    %151 = vector.extract_strided_slice %146 {offsets = [0, 0], sizes = [8, 128], strides = [1, 1]} : vector<8x384xf32> to vector<8x128xf32>
    %152 = vector.extract_strided_slice %150 {offsets = [0, 0], sizes = [8, 128], strides = [1, 1]} : vector<8x384xf32> to vector<8x128xf32>
    %153 = arith.addf %151, %152 : vector<8x128xf32>
    %154 = arith.negf %153 : vector<8x128xf32>
    %155 = math.exp %154 : vector<8x128xf32>
    %cst_58 = arith.constant 1.000000e+00 : f32
    %156 = vector.broadcast %cst_58 : f32 to vector<8x128xf32>
    %157 = arith.addf %156, %155 : vector<8x128xf32>
    %158 = arith.divf %156, %157 : vector<8x128xf32>
    %159 = vector.extract_strided_slice %146 {offsets = [0, 128], sizes = [8, 128], strides = [1, 1]} : vector<8x384xf32> to vector<8x128xf32>
    %160 = vector.extract_strided_slice %150 {offsets = [0, 128], sizes = [8, 128], strides = [1, 1]} : vector<8x384xf32> to vector<8x128xf32>
    %161 = arith.addf %159, %160 : vector<8x128xf32>
    %162 = arith.negf %161 : vector<8x128xf32>
    %163 = math.exp %162 : vector<8x128xf32>
    %cst_59 = arith.constant 1.000000e+00 : f32
    %164 = vector.broadcast %cst_59 : f32 to vector<8x128xf32>
    %165 = arith.addf %164, %163 : vector<8x128xf32>
    %166 = arith.divf %164, %165 : vector<8x128xf32>
    %167 = vector.extract_strided_slice %146 {offsets = [0, 256], sizes = [8, 128], strides = [1, 1]} : vector<8x384xf32> to vector<8x128xf32>
    %168 = vector.extract_strided_slice %150 {offsets = [0, 256], sizes = [8, 128], strides = [1, 1]} : vector<8x384xf32> to vector<8x128xf32>
    %169 = arith.mulf %158, %168 : vector<8x128xf32>
    %170 = arith.addf %167, %169 : vector<8x128xf32>
    %171 = math.tanh %170 : vector<8x128xf32>
    %cst_60 = arith.constant 1.000000e+00 : f32
    %172 = vector.broadcast %cst_60 : f32 to vector<8x128xf32>
    %173 = arith.subf %172, %166 : vector<8x128xf32>
    %174 = arith.mulf %173, %171 : vector<8x128xf32>
    %175 = arith.mulf %166, %119 : vector<8x128xf32>
    %176 = arith.addf %174, %175 : vector<8x128xf32>
    %177 = arith.truncf %176 : vector<8x128xf32> to vector<8x128xbf16>
    %cst_61 = arith.constant dense<0.000000e+00> : vector<8x128xf32>
    %178 = tpu.matmul %177, %11, %cst_61 {dimension_numbers = #tpu.dot_dimension_numbers<[1], [0], [0], [1], [0, 0, 1, 1], [], []>} : vector<8x128xbf16>, vector<128x128xbf16>, vector<8x128xf32> -> vector<8x128xf32>
    %179 = vector.broadcast %12 : vector<1x128xf32> to vector<8x128xf32>
    %180 = arith.addf %178, %179 : vector<8x128xf32>
    %181 = arith.index_cast %c2_i32 : i32 to index
    %c0_62 = arith.constant 0 : index
    %c0_63 = arith.constant 0 : index
    %182 = vector.load %arg14[%181, %c0_62, %c0_63] : memref<8x8x128xf32, #tpu.memory_space<vmem>>, vector<1x8x128xf32>
    %183 = vector.shape_cast %182 : vector<1x8x128xf32> to vector<8x128xf32>
    %184 = vector.shape_cast %180 : vector<8x128xf32> to vector<1x8x128xf32>
    tpu.vector_store %arg14[%181, %c0_62, %c0_63], %184 {strides = array<i32>} : memref<8x8x128xf32, #tpu.memory_space<vmem>>, vector<1x8x128xf32>,
    %c3_i32 = arith.constant 3 : i32
    %185 = arith.index_cast %c3_i32 : i32 to index
    %c0_64 = arith.constant 0 : index
    %c0_65 = arith.constant 0 : index
    %186 = vector.load %arg2[%185, %c0_64, %c0_65] : memref<8x8x16xf32, #tpu.memory_space<vmem>>, vector<1x8x16xf32>
    %187 = vector.shape_cast %186 : vector<1x8x16xf32> to vector<8x16xf32>
    %188 = arith.truncf %187 : vector<8x16xf32> to vector<8x16xbf16>
    %cst_66 = arith.constant dense<0.000000e+00> : vector<8x128xf32>
    %189 = tpu.matmul %188, %3, %cst_66 {dimension_numbers = #tpu.dot_dimension_numbers<[1], [0], [0], [1], [0, 0, 1, 1], [], []>} : vector<8x16xbf16>, vector<16x128xbf16>, vector<8x128xf32> -> vector<8x128xf32>
    %190 = vector.broadcast %4 : vector<1x128xf32> to vector<8x128xf32>
    %191 = arith.addf %189, %190 : vector<8x128xf32>
    %cst_67 = arith.constant 0.000000e+00 : f32
    %192 = vector.broadcast %cst_67 : f32 to vector<8x128xf32>
    %193 = arith.maximumf %191, %192 : vector<8x128xf32>
    %194 = arith.truncf %193 : vector<8x128xf32> to vector<8x128xbf16>
    %cst_68 = arith.constant dense<0.000000e+00> : vector<8x128xf32>
    %195 = tpu.matmul %194, %5, %cst_68 {dimension_numbers = #tpu.dot_dimension_numbers<[1], [0], [0], [1], [0, 0, 1, 1], [], []>} : vector<8x128xbf16>, vector<128x128xbf16>, vector<8x128xf32> -> vector<8x128xf32>
    %196 = vector.broadcast %6 : vector<1x128xf32> to vector<8x128xf32>
    %197 = arith.addf %195, %196 : vector<8x128xf32>
    %cst_69 = arith.constant 0.000000e+00 : f32
    %198 = vector.broadcast %cst_69 : f32 to vector<8x128xf32>
    %199 = arith.maximumf %197, %198 : vector<8x128xf32>
    %200 = arith.truncf %199 : vector<8x128xf32> to vector<8x128xbf16>
    %cst_70 = arith.constant dense<0.000000e+00> : vector<8x384xf32>
    %201 = tpu.matmul %200, %7, %cst_70 {dimension_numbers = #tpu.dot_dimension_numbers<[1], [0], [0], [1], [0, 0, 1, 1], [], []>} : vector<8x128xbf16>, vector<128x384xbf16>, vector<8x384xf32> -> vector<8x384xf32>
    %202 = vector.broadcast %8 : vector<1x384xf32> to vector<8x384xf32>
    %203 = arith.addf %201, %202 : vector<8x384xf32>
    %204 = arith.truncf %176 : vector<8x128xf32> to vector<8x128xbf16>
    %cst_71 = arith.constant dense<0.000000e+00> : vector<8x384xf32>
    %205 = tpu.matmul %204, %9, %cst_71 {dimension_numbers = #tpu.dot_dimension_numbers<[1], [0], [0], [1], [0, 0, 1, 1], [], []>} : vector<8x128xbf16>, vector<128x384xbf16>, vector<8x384xf32> -> vector<8x384xf32>
    %206 = vector.broadcast %10 : vector<1x384xf32> to vector<8x384xf32>
    %207 = arith.addf %205, %206 : vector<8x384xf32>
    %208 = vector.extract_strided_slice %203 {offsets = [0, 0], sizes = [8, 128], strides = [1, 1]} : vector<8x384xf32> to vector<8x128xf32>
    %209 = vector.extract_strided_slice %207 {offsets = [0, 0], sizes = [8, 128], strides = [1, 1]} : vector<8x384xf32> to vector<8x128xf32>
    %210 = arith.addf %208, %209 : vector<8x128xf32>
    %211 = arith.negf %210 : vector<8x128xf32>
    %212 = math.exp %211 : vector<8x128xf32>
    %cst_72 = arith.constant 1.000000e+00 : f32
    %213 = vector.broadcast %cst_72 : f32 to vector<8x128xf32>
    %214 = arith.addf %213, %212 : vector<8x128xf32>
    %215 = arith.divf %213, %214 : vector<8x128xf32>
    %216 = vector.extract_strided_slice %203 {offsets = [0, 128], sizes = [8, 128], strides = [1, 1]} : vector<8x384xf32> to vector<8x128xf32>
    %217 = vector.extract_strided_slice %207 {offsets = [0, 128], sizes = [8, 128], strides = [1, 1]} : vector<8x384xf32> to vector<8x128xf32>
    %218 = arith.addf %216, %217 : vector<8x128xf32>
    %219 = arith.negf %218 : vector<8x128xf32>
    %220 = math.exp %219 : vector<8x128xf32>
    %cst_73 = arith.constant 1.000000e+00 : f32
    %221 = vector.broadcast %cst_73 : f32 to vector<8x128xf32>
    %222 = arith.addf %221, %220 : vector<8x128xf32>
    %223 = arith.divf %221, %222 : vector<8x128xf32>
    %224 = vector.extract_strided_slice %203 {offsets = [0, 256], sizes = [8, 128], strides = [1, 1]} : vector<8x384xf32> to vector<8x128xf32>
    %225 = vector.extract_strided_slice %207 {offsets = [0, 256], sizes = [8, 128], strides = [1, 1]} : vector<8x384xf32> to vector<8x128xf32>
    %226 = arith.mulf %215, %225 : vector<8x128xf32>
    %227 = arith.addf %224, %226 : vector<8x128xf32>
    %228 = math.tanh %227 : vector<8x128xf32>
    %cst_74 = arith.constant 1.000000e+00 : f32
    %229 = vector.broadcast %cst_74 : f32 to vector<8x128xf32>
    %230 = arith.subf %229, %223 : vector<8x128xf32>
    %231 = arith.mulf %230, %228 : vector<8x128xf32>
    %232 = arith.mulf %223, %176 : vector<8x128xf32>
    %233 = arith.addf %231, %232 : vector<8x128xf32>
    %234 = arith.truncf %233 : vector<8x128xf32> to vector<8x128xbf16>
    %cst_75 = arith.constant dense<0.000000e+00> : vector<8x128xf32>
    %235 = tpu.matmul %234, %11, %cst_75 {dimension_numbers = #tpu.dot_dimension_numbers<[1], [0], [0], [1], [0, 0, 1, 1], [], []>} : vector<8x128xbf16>, vector<128x128xbf16>, vector<8x128xf32> -> vector<8x128xf32>
    %236 = vector.broadcast %12 : vector<1x128xf32> to vector<8x128xf32>
    %237 = arith.addf %235, %236 : vector<8x128xf32>
    %238 = arith.index_cast %c3_i32 : i32 to index
    %c0_76 = arith.constant 0 : index
    %c0_77 = arith.constant 0 : index
    %239 = vector.load %arg14[%238, %c0_76, %c0_77] : memref<8x8x128xf32, #tpu.memory_space<vmem>>, vector<1x8x128xf32>
    %240 = vector.shape_cast %239 : vector<1x8x128xf32> to vector<8x128xf32>
    %241 = vector.shape_cast %237 : vector<8x128xf32> to vector<1x8x128xf32>
    tpu.vector_store %arg14[%238, %c0_76, %c0_77], %241 {strides = array<i32>} : memref<8x8x128xf32, #tpu.memory_space<vmem>>, vector<1x8x128xf32>,
    %c4_i32 = arith.constant 4 : i32
    %242 = arith.index_cast %c4_i32 : i32 to index
    %c0_78 = arith.constant 0 : index
    %c0_79 = arith.constant 0 : index
    %243 = vector.load %arg2[%242, %c0_78, %c0_79] : memref<8x8x16xf32, #tpu.memory_space<vmem>>, vector<1x8x16xf32>
    %244 = vector.shape_cast %243 : vector<1x8x16xf32> to vector<8x16xf32>
    %245 = arith.truncf %244 : vector<8x16xf32> to vector<8x16xbf16>
    %cst_80 = arith.constant dense<0.000000e+00> : vector<8x128xf32>
    %246 = tpu.matmul %245, %3, %cst_80 {dimension_numbers = #tpu.dot_dimension_numbers<[1], [0], [0], [1], [0, 0, 1, 1], [], []>} : vector<8x16xbf16>, vector<16x128xbf16>, vector<8x128xf32> -> vector<8x128xf32>
    %247 = vector.broadcast %4 : vector<1x128xf32> to vector<8x128xf32>
    %248 = arith.addf %246, %247 : vector<8x128xf32>
    %cst_81 = arith.constant 0.000000e+00 : f32
    %249 = vector.broadcast %cst_81 : f32 to vector<8x128xf32>
    %250 = arith.maximumf %248, %249 : vector<8x128xf32>
    %251 = arith.truncf %250 : vector<8x128xf32> to vector<8x128xbf16>
    %cst_82 = arith.constant dense<0.000000e+00> : vector<8x128xf32>
    %252 = tpu.matmul %251, %5, %cst_82 {dimension_numbers = #tpu.dot_dimension_numbers<[1], [0], [0], [1], [0, 0, 1, 1], [], []>} : vector<8x128xbf16>, vector<128x128xbf16>, vector<8x128xf32> -> vector<8x128xf32>
    %253 = vector.broadcast %6 : vector<1x128xf32> to vector<8x128xf32>
    %254 = arith.addf %252, %253 : vector<8x128xf32>
    %cst_83 = arith.constant 0.000000e+00 : f32
    %255 = vector.broadcast %cst_83 : f32 to vector<8x128xf32>
    %256 = arith.maximumf %254, %255 : vector<8x128xf32>
    %257 = arith.truncf %256 : vector<8x128xf32> to vector<8x128xbf16>
    %cst_84 = arith.constant dense<0.000000e+00> : vector<8x384xf32>
    %258 = tpu.matmul %257, %7, %cst_84 {dimension_numbers = #tpu.dot_dimension_numbers<[1], [0], [0], [1], [0, 0, 1, 1], [], []>} : vector<8x128xbf16>, vector<128x384xbf16>, vector<8x384xf32> -> vector<8x384xf32>
    %259 = vector.broadcast %8 : vector<1x384xf32> to vector<8x384xf32>
    %260 = arith.addf %258, %259 : vector<8x384xf32>
    %261 = arith.truncf %233 : vector<8x128xf32> to vector<8x128xbf16>
    %cst_85 = arith.constant dense<0.000000e+00> : vector<8x384xf32>
    %262 = tpu.matmul %261, %9, %cst_85 {dimension_numbers = #tpu.dot_dimension_numbers<[1], [0], [0], [1], [0, 0, 1, 1], [], []>} : vector<8x128xbf16>, vector<128x384xbf16>, vector<8x384xf32> -> vector<8x384xf32>
    %263 = vector.broadcast %10 : vector<1x384xf32> to vector<8x384xf32>
    %264 = arith.addf %262, %263 : vector<8x384xf32>
    %265 = vector.extract_strided_slice %260 {offsets = [0, 0], sizes = [8, 128], strides = [1, 1]} : vector<8x384xf32> to vector<8x128xf32>
    %266 = vector.extract_strided_slice %264 {offsets = [0, 0], sizes = [8, 128], strides = [1, 1]} : vector<8x384xf32> to vector<8x128xf32>
    %267 = arith.addf %265, %266 : vector<8x128xf32>
    %268 = arith.negf %267 : vector<8x128xf32>
    %269 = math.exp %268 : vector<8x128xf32>
    %cst_86 = arith.constant 1.000000e+00 : f32
    %270 = vector.broadcast %cst_86 : f32 to vector<8x128xf32>
    %271 = arith.addf %270, %269 : vector<8x128xf32>
    %272 = arith.divf %270, %271 : vector<8x128xf32>
    %273 = vector.extract_strided_slice %260 {offsets = [0, 128], sizes = [8, 128], strides = [1, 1]} : vector<8x384xf32> to vector<8x128xf32>
    %274 = vector.extract_strided_slice %264 {offsets = [0, 128], sizes = [8, 128], strides = [1, 1]} : vector<8x384xf32> to vector<8x128xf32>
    %275 = arith.addf %273, %274 : vector<8x128xf32>
    %276 = arith.negf %275 : vector<8x128xf32>
    %277 = math.exp %276 : vector<8x128xf32>
    %cst_87 = arith.constant 1.000000e+00 : f32
    %278 = vector.broadcast %cst_87 : f32 to vector<8x128xf32>
    %279 = arith.addf %278, %277 : vector<8x128xf32>
    %280 = arith.divf %278, %279 : vector<8x128xf32>
    %281 = vector.extract_strided_slice %260 {offsets = [0, 256], sizes = [8, 128], strides = [1, 1]} : vector<8x384xf32> to vector<8x128xf32>
    %282 = vector.extract_strided_slice %264 {offsets = [0, 256], sizes = [8, 128], strides = [1, 1]} : vector<8x384xf32> to vector<8x128xf32>
    %283 = arith.mulf %272, %282 : vector<8x128xf32>
    %284 = arith.addf %281, %283 : vector<8x128xf32>
    %285 = math.tanh %284 : vector<8x128xf32>
    %cst_88 = arith.constant 1.000000e+00 : f32
    %286 = vector.broadcast %cst_88 : f32 to vector<8x128xf32>
    %287 = arith.subf %286, %280 : vector<8x128xf32>
    %288 = arith.mulf %287, %285 : vector<8x128xf32>
    %289 = arith.mulf %280, %233 : vector<8x128xf32>
    %290 = arith.addf %288, %289 : vector<8x128xf32>
    %291 = arith.truncf %290 : vector<8x128xf32> to vector<8x128xbf16>
    %cst_89 = arith.constant dense<0.000000e+00> : vector<8x128xf32>
    %292 = tpu.matmul %291, %11, %cst_89 {dimension_numbers = #tpu.dot_dimension_numbers<[1], [0], [0], [1], [0, 0, 1, 1], [], []>} : vector<8x128xbf16>, vector<128x128xbf16>, vector<8x128xf32> -> vector<8x128xf32>
    %293 = vector.broadcast %12 : vector<1x128xf32> to vector<8x128xf32>
    %294 = arith.addf %292, %293 : vector<8x128xf32>
    %295 = arith.index_cast %c4_i32 : i32 to index
    %c0_90 = arith.constant 0 : index
    %c0_91 = arith.constant 0 : index
    %296 = vector.load %arg14[%295, %c0_90, %c0_91] : memref<8x8x128xf32, #tpu.memory_space<vmem>>, vector<1x8x128xf32>
    %297 = vector.shape_cast %296 : vector<1x8x128xf32> to vector<8x128xf32>
    %298 = vector.shape_cast %294 : vector<8x128xf32> to vector<1x8x128xf32>
    tpu.vector_store %arg14[%295, %c0_90, %c0_91], %298 {strides = array<i32>} : memref<8x8x128xf32, #tpu.memory_space<vmem>>, vector<1x8x128xf32>,
    %c5_i32 = arith.constant 5 : i32
    %299 = arith.index_cast %c5_i32 : i32 to index
    %c0_92 = arith.constant 0 : index
    %c0_93 = arith.constant 0 : index
    %300 = vector.load %arg2[%299, %c0_92, %c0_93] : memref<8x8x16xf32, #tpu.memory_space<vmem>>, vector<1x8x16xf32>
    %301 = vector.shape_cast %300 : vector<1x8x16xf32> to vector<8x16xf32>
    %302 = arith.truncf %301 : vector<8x16xf32> to vector<8x16xbf16>
    %cst_94 = arith.constant dense<0.000000e+00> : vector<8x128xf32>
    %303 = tpu.matmul %302, %3, %cst_94 {dimension_numbers = #tpu.dot_dimension_numbers<[1], [0], [0], [1], [0, 0, 1, 1], [], []>} : vector<8x16xbf16>, vector<16x128xbf16>, vector<8x128xf32> -> vector<8x128xf32>
    %304 = vector.broadcast %4 : vector<1x128xf32> to vector<8x128xf32>
    %305 = arith.addf %303, %304 : vector<8x128xf32>
    %cst_95 = arith.constant 0.000000e+00 : f32
    %306 = vector.broadcast %cst_95 : f32 to vector<8x128xf32>
    %307 = arith.maximumf %305, %306 : vector<8x128xf32>
    %308 = arith.truncf %307 : vector<8x128xf32> to vector<8x128xbf16>
    %cst_96 = arith.constant dense<0.000000e+00> : vector<8x128xf32>
    %309 = tpu.matmul %308, %5, %cst_96 {dimension_numbers = #tpu.dot_dimension_numbers<[1], [0], [0], [1], [0, 0, 1, 1], [], []>} : vector<8x128xbf16>, vector<128x128xbf16>, vector<8x128xf32> -> vector<8x128xf32>
    %310 = vector.broadcast %6 : vector<1x128xf32> to vector<8x128xf32>
    %311 = arith.addf %309, %310 : vector<8x128xf32>
    %cst_97 = arith.constant 0.000000e+00 : f32
    %312 = vector.broadcast %cst_97 : f32 to vector<8x128xf32>
    %313 = arith.maximumf %311, %312 : vector<8x128xf32>
    %314 = arith.truncf %313 : vector<8x128xf32> to vector<8x128xbf16>
    %cst_98 = arith.constant dense<0.000000e+00> : vector<8x384xf32>
    %315 = tpu.matmul %314, %7, %cst_98 {dimension_numbers = #tpu.dot_dimension_numbers<[1], [0], [0], [1], [0, 0, 1, 1], [], []>} : vector<8x128xbf16>, vector<128x384xbf16>, vector<8x384xf32> -> vector<8x384xf32>
    %316 = vector.broadcast %8 : vector<1x384xf32> to vector<8x384xf32>
    %317 = arith.addf %315, %316 : vector<8x384xf32>
    %318 = arith.truncf %290 : vector<8x128xf32> to vector<8x128xbf16>
    %cst_99 = arith.constant dense<0.000000e+00> : vector<8x384xf32>
    %319 = tpu.matmul %318, %9, %cst_99 {dimension_numbers = #tpu.dot_dimension_numbers<[1], [0], [0], [1], [0, 0, 1, 1], [], []>} : vector<8x128xbf16>, vector<128x384xbf16>, vector<8x384xf32> -> vector<8x384xf32>
    %320 = vector.broadcast %10 : vector<1x384xf32> to vector<8x384xf32>
    %321 = arith.addf %319, %320 : vector<8x384xf32>
    %322 = vector.extract_strided_slice %317 {offsets = [0, 0], sizes = [8, 128], strides = [1, 1]} : vector<8x384xf32> to vector<8x128xf32>
    %323 = vector.extract_strided_slice %321 {offsets = [0, 0], sizes = [8, 128], strides = [1, 1]} : vector<8x384xf32> to vector<8x128xf32>
    %324 = arith.addf %322, %323 : vector<8x128xf32>
    %325 = arith.negf %324 : vector<8x128xf32>
    %326 = math.exp %325 : vector<8x128xf32>
    %cst_100 = arith.constant 1.000000e+00 : f32
    %327 = vector.broadcast %cst_100 : f32 to vector<8x128xf32>
    %328 = arith.addf %327, %326 : vector<8x128xf32>
    %329 = arith.divf %327, %328 : vector<8x128xf32>
    %330 = vector.extract_strided_slice %317 {offsets = [0, 128], sizes = [8, 128], strides = [1, 1]} : vector<8x384xf32> to vector<8x128xf32>
    %331 = vector.extract_strided_slice %321 {offsets = [0, 128], sizes = [8, 128], strides = [1, 1]} : vector<8x384xf32> to vector<8x128xf32>
    %332 = arith.addf %330, %331 : vector<8x128xf32>
    %333 = arith.negf %332 : vector<8x128xf32>
    %334 = math.exp %333 : vector<8x128xf32>
    %cst_101 = arith.constant 1.000000e+00 : f32
    %335 = vector.broadcast %cst_101 : f32 to vector<8x128xf32>
    %336 = arith.addf %335, %334 : vector<8x128xf32>
    %337 = arith.divf %335, %336 : vector<8x128xf32>
    %338 = vector.extract_strided_slice %317 {offsets = [0, 256], sizes = [8, 128], strides = [1, 1]} : vector<8x384xf32> to vector<8x128xf32>
    %339 = vector.extract_strided_slice %321 {offsets = [0, 256], sizes = [8, 128], strides = [1, 1]} : vector<8x384xf32> to vector<8x128xf32>
    %340 = arith.mulf %329, %339 : vector<8x128xf32>
    %341 = arith.addf %338, %340 : vector<8x128xf32>
    %342 = math.tanh %341 : vector<8x128xf32>
    %cst_102 = arith.constant 1.000000e+00 : f32
    %343 = vector.broadcast %cst_102 : f32 to vector<8x128xf32>
    %344 = arith.subf %343, %337 : vector<8x128xf32>
    %345 = arith.mulf %344, %342 : vector<8x128xf32>
    %346 = arith.mulf %337, %290 : vector<8x128xf32>
    %347 = arith.addf %345, %346 : vector<8x128xf32>
    %348 = arith.truncf %347 : vector<8x128xf32> to vector<8x128xbf16>
    %cst_103 = arith.constant dense<0.000000e+00> : vector<8x128xf32>
    %349 = tpu.matmul %348, %11, %cst_103 {dimension_numbers = #tpu.dot_dimension_numbers<[1], [0], [0], [1], [0, 0, 1, 1], [], []>} : vector<8x128xbf16>, vector<128x128xbf16>, vector<8x128xf32> -> vector<8x128xf32>
    %350 = vector.broadcast %12 : vector<1x128xf32> to vector<8x128xf32>
    %351 = arith.addf %349, %350 : vector<8x128xf32>
    %352 = arith.index_cast %c5_i32 : i32 to index
    %c0_104 = arith.constant 0 : index
    %c0_105 = arith.constant 0 : index
    %353 = vector.load %arg14[%352, %c0_104, %c0_105] : memref<8x8x128xf32, #tpu.memory_space<vmem>>, vector<1x8x128xf32>
    %354 = vector.shape_cast %353 : vector<1x8x128xf32> to vector<8x128xf32>
    %355 = vector.shape_cast %351 : vector<8x128xf32> to vector<1x8x128xf32>
    tpu.vector_store %arg14[%352, %c0_104, %c0_105], %355 {strides = array<i32>} : memref<8x8x128xf32, #tpu.memory_space<vmem>>, vector<1x8x128xf32>,
    %c6_i32 = arith.constant 6 : i32
    %356 = arith.index_cast %c6_i32 : i32 to index
    %c0_106 = arith.constant 0 : index
    %c0_107 = arith.constant 0 : index
    %357 = vector.load %arg2[%356, %c0_106, %c0_107] : memref<8x8x16xf32, #tpu.memory_space<vmem>>, vector<1x8x16xf32>
    %358 = vector.shape_cast %357 : vector<1x8x16xf32> to vector<8x16xf32>
    %359 = arith.truncf %358 : vector<8x16xf32> to vector<8x16xbf16>
    %cst_108 = arith.constant dense<0.000000e+00> : vector<8x128xf32>
    %360 = tpu.matmul %359, %3, %cst_108 {dimension_numbers = #tpu.dot_dimension_numbers<[1], [0], [0], [1], [0, 0, 1, 1], [], []>} : vector<8x16xbf16>, vector<16x128xbf16>, vector<8x128xf32> -> vector<8x128xf32>
    %361 = vector.broadcast %4 : vector<1x128xf32> to vector<8x128xf32>
    %362 = arith.addf %360, %361 : vector<8x128xf32>
    %cst_109 = arith.constant 0.000000e+00 : f32
    %363 = vector.broadcast %cst_109 : f32 to vector<8x128xf32>
    %364 = arith.maximumf %362, %363 : vector<8x128xf32>
    %365 = arith.truncf %364 : vector<8x128xf32> to vector<8x128xbf16>
    %cst_110 = arith.constant dense<0.000000e+00> : vector<8x128xf32>
    %366 = tpu.matmul %365, %5, %cst_110 {dimension_numbers = #tpu.dot_dimension_numbers<[1], [0], [0], [1], [0, 0, 1, 1], [], []>} : vector<8x128xbf16>, vector<128x128xbf16>, vector<8x128xf32> -> vector<8x128xf32>
    %367 = vector.broadcast %6 : vector<1x128xf32> to vector<8x128xf32>
    %368 = arith.addf %366, %367 : vector<8x128xf32>
    %cst_111 = arith.constant 0.000000e+00 : f32
    %369 = vector.broadcast %cst_111 : f32 to vector<8x128xf32>
    %370 = arith.maximumf %368, %369 : vector<8x128xf32>
    %371 = arith.truncf %370 : vector<8x128xf32> to vector<8x128xbf16>
    %cst_112 = arith.constant dense<0.000000e+00> : vector<8x384xf32>
    %372 = tpu.matmul %371, %7, %cst_112 {dimension_numbers = #tpu.dot_dimension_numbers<[1], [0], [0], [1], [0, 0, 1, 1], [], []>} : vector<8x128xbf16>, vector<128x384xbf16>, vector<8x384xf32> -> vector<8x384xf32>
    %373 = vector.broadcast %8 : vector<1x384xf32> to vector<8x384xf32>
    %374 = arith.addf %372, %373 : vector<8x384xf32>
    %375 = arith.truncf %347 : vector<8x128xf32> to vector<8x128xbf16>
    %cst_113 = arith.constant dense<0.000000e+00> : vector<8x384xf32>
    %376 = tpu.matmul %375, %9, %cst_113 {dimension_numbers = #tpu.dot_dimension_numbers<[1], [0], [0], [1], [0, 0, 1, 1], [], []>} : vector<8x128xbf16>, vector<128x384xbf16>, vector<8x384xf32> -> vector<8x384xf32>
    %377 = vector.broadcast %10 : vector<1x384xf32> to vector<8x384xf32>
    %378 = arith.addf %376, %377 : vector<8x384xf32>
    %379 = vector.extract_strided_slice %374 {offsets = [0, 0], sizes = [8, 128], strides = [1, 1]} : vector<8x384xf32> to vector<8x128xf32>
    %380 = vector.extract_strided_slice %378 {offsets = [0, 0], sizes = [8, 128], strides = [1, 1]} : vector<8x384xf32> to vector<8x128xf32>
    %381 = arith.addf %379, %380 : vector<8x128xf32>
    %382 = arith.negf %381 : vector<8x128xf32>
    %383 = math.exp %382 : vector<8x128xf32>
    %cst_114 = arith.constant 1.000000e+00 : f32
    %384 = vector.broadcast %cst_114 : f32 to vector<8x128xf32>
    %385 = arith.addf %384, %383 : vector<8x128xf32>
    %386 = arith.divf %384, %385 : vector<8x128xf32>
    %387 = vector.extract_strided_slice %374 {offsets = [0, 128], sizes = [8, 128], strides = [1, 1]} : vector<8x384xf32> to vector<8x128xf32>
    %388 = vector.extract_strided_slice %378 {offsets = [0, 128], sizes = [8, 128], strides = [1, 1]} : vector<8x384xf32> to vector<8x128xf32>
    %389 = arith.addf %387, %388 : vector<8x128xf32>
    %390 = arith.negf %389 : vector<8x128xf32>
    %391 = math.exp %390 : vector<8x128xf32>
    %cst_115 = arith.constant 1.000000e+00 : f32
    %392 = vector.broadcast %cst_115 : f32 to vector<8x128xf32>
    %393 = arith.addf %392, %391 : vector<8x128xf32>
    %394 = arith.divf %392, %393 : vector<8x128xf32>
    %395 = vector.extract_strided_slice %374 {offsets = [0, 256], sizes = [8, 128], strides = [1, 1]} : vector<8x384xf32> to vector<8x128xf32>
    %396 = vector.extract_strided_slice %378 {offsets = [0, 256], sizes = [8, 128], strides = [1, 1]} : vector<8x384xf32> to vector<8x128xf32>
    %397 = arith.mulf %386, %396 : vector<8x128xf32>
    %398 = arith.addf %395, %397 : vector<8x128xf32>
    %399 = math.tanh %398 : vector<8x128xf32>
    %cst_116 = arith.constant 1.000000e+00 : f32
    %400 = vector.broadcast %cst_116 : f32 to vector<8x128xf32>
    %401 = arith.subf %400, %394 : vector<8x128xf32>
    %402 = arith.mulf %401, %399 : vector<8x128xf32>
    %403 = arith.mulf %394, %347 : vector<8x128xf32>
    %404 = arith.addf %402, %403 : vector<8x128xf32>
    %405 = arith.truncf %404 : vector<8x128xf32> to vector<8x128xbf16>
    %cst_117 = arith.constant dense<0.000000e+00> : vector<8x128xf32>
    %406 = tpu.matmul %405, %11, %cst_117 {dimension_numbers = #tpu.dot_dimension_numbers<[1], [0], [0], [1], [0, 0, 1, 1], [], []>} : vector<8x128xbf16>, vector<128x128xbf16>, vector<8x128xf32> -> vector<8x128xf32>
    %407 = vector.broadcast %12 : vector<1x128xf32> to vector<8x128xf32>
    %408 = arith.addf %406, %407 : vector<8x128xf32>
    %409 = arith.index_cast %c6_i32 : i32 to index
    %c0_118 = arith.constant 0 : index
    %c0_119 = arith.constant 0 : index
    %410 = vector.load %arg14[%409, %c0_118, %c0_119] : memref<8x8x128xf32, #tpu.memory_space<vmem>>, vector<1x8x128xf32>
    %411 = vector.shape_cast %410 : vector<1x8x128xf32> to vector<8x128xf32>
    %412 = vector.shape_cast %408 : vector<8x128xf32> to vector<1x8x128xf32>
    tpu.vector_store %arg14[%409, %c0_118, %c0_119], %412 {strides = array<i32>} : memref<8x8x128xf32, #tpu.memory_space<vmem>>, vector<1x8x128xf32>,
    %c7_i32 = arith.constant 7 : i32
    %413 = arith.index_cast %c7_i32 : i32 to index
    %c0_120 = arith.constant 0 : index
    %c0_121 = arith.constant 0 : index
    %414 = vector.load %arg2[%413, %c0_120, %c0_121] : memref<8x8x16xf32, #tpu.memory_space<vmem>>, vector<1x8x16xf32>
    %415 = vector.shape_cast %414 : vector<1x8x16xf32> to vector<8x16xf32>
    %416 = arith.truncf %415 : vector<8x16xf32> to vector<8x16xbf16>
    %cst_122 = arith.constant dense<0.000000e+00> : vector<8x128xf32>
    %417 = tpu.matmul %416, %3, %cst_122 {dimension_numbers = #tpu.dot_dimension_numbers<[1], [0], [0], [1], [0, 0, 1, 1], [], []>} : vector<8x16xbf16>, vector<16x128xbf16>, vector<8x128xf32> -> vector<8x128xf32>
    %418 = vector.broadcast %4 : vector<1x128xf32> to vector<8x128xf32>
    %419 = arith.addf %417, %418 : vector<8x128xf32>
    %cst_123 = arith.constant 0.000000e+00 : f32
    %420 = vector.broadcast %cst_123 : f32 to vector<8x128xf32>
    %421 = arith.maximumf %419, %420 : vector<8x128xf32>
    %422 = arith.truncf %421 : vector<8x128xf32> to vector<8x128xbf16>
    %cst_124 = arith.constant dense<0.000000e+00> : vector<8x128xf32>
    %423 = tpu.matmul %422, %5, %cst_124 {dimension_numbers = #tpu.dot_dimension_numbers<[1], [0], [0], [1], [0, 0, 1, 1], [], []>} : vector<8x128xbf16>, vector<128x128xbf16>, vector<8x128xf32> -> vector<8x128xf32>
    %424 = vector.broadcast %6 : vector<1x128xf32> to vector<8x128xf32>
    %425 = arith.addf %423, %424 : vector<8x128xf32>
    %cst_125 = arith.constant 0.000000e+00 : f32
    %426 = vector.broadcast %cst_125 : f32 to vector<8x128xf32>
    %427 = arith.maximumf %425, %426 : vector<8x128xf32>
    %428 = arith.truncf %427 : vector<8x128xf32> to vector<8x128xbf16>
    %cst_126 = arith.constant dense<0.000000e+00> : vector<8x384xf32>
    %429 = tpu.matmul %428, %7, %cst_126 {dimension_numbers = #tpu.dot_dimension_numbers<[1], [0], [0], [1], [0, 0, 1, 1], [], []>} : vector<8x128xbf16>, vector<128x384xbf16>, vector<8x384xf32> -> vector<8x384xf32>
    %430 = vector.broadcast %8 : vector<1x384xf32> to vector<8x384xf32>
    %431 = arith.addf %429, %430 : vector<8x384xf32>
    %432 = arith.truncf %404 : vector<8x128xf32> to vector<8x128xbf16>
    %cst_127 = arith.constant dense<0.000000e+00> : vector<8x384xf32>
    %433 = tpu.matmul %432, %9, %cst_127 {dimension_numbers = #tpu.dot_dimension_numbers<[1], [0], [0], [1], [0, 0, 1, 1], [], []>} : vector<8x128xbf16>, vector<128x384xbf16>, vector<8x384xf32> -> vector<8x384xf32>
    %434 = vector.broadcast %10 : vector<1x384xf32> to vector<8x384xf32>
    %435 = arith.addf %433, %434 : vector<8x384xf32>
    %436 = vector.extract_strided_slice %431 {offsets = [0, 0], sizes = [8, 128], strides = [1, 1]} : vector<8x384xf32> to vector<8x128xf32>
    %437 = vector.extract_strided_slice %435 {offsets = [0, 0], sizes = [8, 128], strides = [1, 1]} : vector<8x384xf32> to vector<8x128xf32>
    %438 = arith.addf %436, %437 : vector<8x128xf32>
    %439 = arith.negf %438 : vector<8x128xf32>
    %440 = math.exp %439 : vector<8x128xf32>
    %cst_128 = arith.constant 1.000000e+00 : f32
    %441 = vector.broadcast %cst_128 : f32 to vector<8x128xf32>
    %442 = arith.addf %441, %440 : vector<8x128xf32>
    %443 = arith.divf %441, %442 : vector<8x128xf32>
    %444 = vector.extract_strided_slice %431 {offsets = [0, 128], sizes = [8, 128], strides = [1, 1]} : vector<8x384xf32> to vector<8x128xf32>
    %445 = vector.extract_strided_slice %435 {offsets = [0, 128], sizes = [8, 128], strides = [1, 1]} : vector<8x384xf32> to vector<8x128xf32>
    %446 = arith.addf %444, %445 : vector<8x128xf32>
    %447 = arith.negf %446 : vector<8x128xf32>
    %448 = math.exp %447 : vector<8x128xf32>
    %cst_129 = arith.constant 1.000000e+00 : f32
    %449 = vector.broadcast %cst_129 : f32 to vector<8x128xf32>
    %450 = arith.addf %449, %448 : vector<8x128xf32>
    %451 = arith.divf %449, %450 : vector<8x128xf32>
    %452 = vector.extract_strided_slice %431 {offsets = [0, 256], sizes = [8, 128], strides = [1, 1]} : vector<8x384xf32> to vector<8x128xf32>
    %453 = vector.extract_strided_slice %435 {offsets = [0, 256], sizes = [8, 128], strides = [1, 1]} : vector<8x384xf32> to vector<8x128xf32>
    %454 = arith.mulf %443, %453 : vector<8x128xf32>
    %455 = arith.addf %452, %454 : vector<8x128xf32>
    %456 = math.tanh %455 : vector<8x128xf32>
    %cst_130 = arith.constant 1.000000e+00 : f32
    %457 = vector.broadcast %cst_130 : f32 to vector<8x128xf32>
    %458 = arith.subf %457, %451 : vector<8x128xf32>
    %459 = arith.mulf %458, %456 : vector<8x128xf32>
    %460 = arith.mulf %451, %404 : vector<8x128xf32>
    %461 = arith.addf %459, %460 : vector<8x128xf32>
    %462 = arith.truncf %461 : vector<8x128xf32> to vector<8x128xbf16>
    %cst_131 = arith.constant dense<0.000000e+00> : vector<8x128xf32>
    %463 = tpu.matmul %462, %11, %cst_131 {dimension_numbers = #tpu.dot_dimension_numbers<[1], [0], [0], [1], [0, 0, 1, 1], [], []>} : vector<8x128xbf16>, vector<128x128xbf16>, vector<8x128xf32> -> vector<8x128xf32>
    %464 = vector.broadcast %12 : vector<1x128xf32> to vector<8x128xf32>
    %465 = arith.addf %463, %464 : vector<8x128xf32>
    %466 = arith.index_cast %c7_i32 : i32 to index
    %c0_132 = arith.constant 0 : index
    %c0_133 = arith.constant 0 : index
    %467 = vector.load %arg14[%466, %c0_132, %c0_133] : memref<8x8x128xf32, #tpu.memory_space<vmem>>, vector<1x8x128xf32>
    %468 = vector.shape_cast %467 : vector<1x8x128xf32> to vector<8x128xf32>
    %469 = vector.shape_cast %465 : vector<8x128xf32> to vector<1x8x128xf32>
    tpu.vector_store %arg14[%466, %c0_132, %c0_133], %469 {strides = array<i32>} : memref<8x8x128xf32, #tpu.memory_space<vmem>>, vector<1x8x128xf32>,
    %c8_i32 = arith.constant 8 : i32
    %c0_134 = arith.constant 0 : index
    %c0_135 = arith.constant 0 : index
    %470 = vector.load %arg16[%c0_134, %c0_135] : memref<8x128xf32, #tpu.memory_space<vmem>>, vector<8x128xf32>
    tpu.vector_store %arg16[%c0_134, %c0_135], %461 {strides = array<i32>} : memref<8x128xf32, #tpu.memory_space<vmem>>, vector<8x128xf32>,
    %c0_i32_136 = arith.constant 0 : i32
    %471 = arith.cmpi eq, %arg1, %c0_i32_136 : i32
    %472 = arith.extui %471 : i1 to i32
    %c0_i32_137 = arith.constant 0 : i32
    %473 = arith.cmpi ne, %472, %c0_i32_137 : i32
    scf.if %473 {
      %c0_138 = arith.constant 0 : index
      %c0_139 = arith.constant 0 : index
      %474 = vector.load %arg15[%c0_138, %c0_139] : memref<8x128xf32, #tpu.memory_space<vmem>>, vector<8x128xf32>
      tpu.vector_store %arg15[%c0_138, %c0_139], %461 {strides = array<i32>} : memref<8x128xf32, #tpu.memory_space<vmem>>, vector<8x128xf32>,
    } else {
    }
    return
  }
  func.func @transform_0(%arg0: i32, %arg1: i32) -> (i32, i32, i32) {
    %c0_i32 = arith.constant 0 : i32
    %c0_i32_0 = arith.constant 0 : i32
    return %arg1, %arg0, %c0_i32 : i32, i32, i32
  }
  func.func @transform_1(%arg0: i32, %arg1: i32) -> (i32, i32) {
    %c0_i32 = arith.constant 0 : i32
    %c0_i32_0 = arith.constant 0 : i32
    return %arg0, %c0_i32 : i32, i32
  }
  func.func @transform_2(%arg0: i32, %arg1: i32) -> (i32, i32) {
    %c0_i32 = arith.constant 0 : i32
    %c0_i32_0 = arith.constant 0 : i32
    %c0_i32_1 = arith.constant 0 : i32
    return %c0_i32, %c0_i32_0 : i32, i32
  }
  func.func @transform_3(%arg0: i32, %arg1: i32) -> (i32, i32) {
    %c0_i32 = arith.constant 0 : i32
    %c0_i32_0 = arith.constant 0 : i32
    %c0_i32_1 = arith.constant 0 : i32
    return %c0_i32, %c0_i32_0 : i32, i32
  }
  func.func @transform_4(%arg0: i32, %arg1: i32) -> (i32, i32) {
    %c0_i32 = arith.constant 0 : i32
    %c0_i32_0 = arith.constant 0 : i32
    %c0_i32_1 = arith.constant 0 : i32
    return %c0_i32, %c0_i32_0 : i32, i32
  }
  func.func @transform_5(%arg0: i32, %arg1: i32) -> (i32, i32) {
    %c0_i32 = arith.constant 0 : i32
    %c0_i32_0 = arith.constant 0 : i32
    %c0_i32_1 = arith.constant 0 : i32
    return %c0_i32, %c0_i32_0 : i32, i32
  }
  func.func @transform_6(%arg0: i32, %arg1: i32) -> (i32, i32) {
    %c0_i32 = arith.constant 0 : i32
    %c0_i32_0 = arith.constant 0 : i32
    %c0_i32_1 = arith.constant 0 : i32
    return %c0_i32, %c0_i32_0 : i32, i32
  }
  func.func @transform_7(%arg0: i32, %arg1: i32) -> (i32, i32) {
    %c0_i32 = arith.constant 0 : i32
    %c0_i32_0 = arith.constant 0 : i32
    %c0_i32_1 = arith.constant 0 : i32
    return %c0_i32, %c0_i32_0 : i32, i32
  }
  func.func @transform_8(%arg0: i32, %arg1: i32) -> (i32, i32) {
    %c0_i32 = arith.constant 0 : i32
    %c0_i32_0 = arith.constant 0 : i32
    %c0_i32_1 = arith.constant 0 : i32
    return %c0_i32, %c0_i32_0 : i32, i32
  }
  func.func @transform_9(%arg0: i32, %arg1: i32) -> (i32, i32) {
    %c0_i32 = arith.constant 0 : i32
    %c0_i32_0 = arith.constant 0 : i32
    %c0_i32_1 = arith.constant 0 : i32
    return %c0_i32, %c0_i32_0 : i32, i32
  }
  func.func @transform_10(%arg0: i32, %arg1: i32) -> (i32, i32) {
    %c0_i32 = arith.constant 0 : i32
    %c0_i32_0 = arith.constant 0 : i32
    %c0_i32_1 = arith.constant 0 : i32
    return %c0_i32, %c0_i32_0 : i32, i32
  }
  func.func @transform_11(%arg0: i32, %arg1: i32) -> (i32, i32) {
    %c0_i32 = arith.constant 0 : i32
    %c0_i32_0 = arith.constant 0 : i32
    %c0_i32_1 = arith.constant 0 : i32
    return %c0_i32, %c0_i32_0 : i32, i32
  }
  func.func @transform_12(%arg0: i32, %arg1: i32) -> (i32, i32, i32) {
    %c0_i32 = arith.constant 0 : i32
    %c0_i32_0 = arith.constant 0 : i32
    return %arg1, %arg0, %c0_i32 : i32, i32, i32
  }
  func.func @transform_13(%arg0: i32, %arg1: i32) -> (i32, i32) {
    %c0_i32 = arith.constant 0 : i32
    %c0_i32_0 = arith.constant 0 : i32
    return %arg0, %c0_i32 : i32, i32
  }
}

</mosaic_0001>

<bundles_post_ra>
// kernel: rnn_agent_rollout.1
= control target key start
LH: loop header
LB: loop body
LE: loop exit
PB: predicated region body
PF: predicated region fallthrough
CT: control target
= control target key end

     0   :  { %19 = vsyncpa [#allocation4], 0  ;;  %s6355_s0 = inlined_call_operand.hbm [shape: f32[8,8,16], index: 0, kind: input, shape index: {}]   ;;  %s6356_s1 = inlined_call_operand.vmem [shape: f32[8,128], index: 1, kind: input, shape index: {}]   ;;  %s6357_s2 = inlined_call_operand.vmem [shape: bf16[16,128], index: 2, kind: input, shape index: {}]   ;;  %s6358_s3 = inlined_call_operand.vmem [shape: f32[1,128], index: 3, kind: input, shape index: {}]   ;;  %s6359_s4 = inlined_call_operand.hbm [shape: bf16[128,128], index: 4, kind: input, shape index: {}]   ;;  %s6360_s5 = inlined_call_operand.vmem [shape: f32[1,128], index: 5, kind: input, shape index: {}]   ;;  %s6361_s6 = inlined_call_operand.hbm [shape: bf16[128,384], index: 6, kind: input, shape index: {}]   ;;  %s6362_s7 = inlined_call_operand.vmem [shape: f32[1,384], index: 7, kind: input, shape index: {}]   ;;  %s6363_s8 = inlined_call_operand.hbm [shape: bf16[128,384], index: 8, kind: input, shape index: {}]   ;;  %s6364_s9 = inlined_call_operand.vmem [shape: f32[1,384], index: 9, kind: input, shape index: {}]   ;;  %s6365_s10 = inlined_call_operand.hbm [shape: bf16[128,128], index: 10, kind: input, shape index: {}]   ;;  %s6366_s11 = inlined_call_operand.vmem [shape: f32[1,128], index: 11, kind: input, shape index: {}]   ;;  %s6367_s12 = inlined_call_operand.hbm [shape: f32[8,8,128], index: 12, kind: output, shape index: {0}]   ;;  %s6368_s13 = inlined_call_operand.hbm [shape: f32[8,128], index: 13, kind: output, shape index: {1}]  }
   0x1   :  { %20 = vsyncpa [#allocation7], 0 }
   0x2   :  { %21 = vsyncpa [#allocation10], 0 }
   0x3   :  { %22 = vsyncpa [#allocation5], 0 }
   0x4   :  { %23 = vsyncpa [#allocation14], 0  ;;  %s4745_s25 = smov [#allocation6]  }
   0x5   :  { %s47_s26 = sshll.u32 %s4745_s25, 4  ;;  %s48_s26 = int_to_ptr.vmem [resolvable:$true] %s47_s26 }
   0x6   :  { %s4603_s27 = scalar_lea.vmem %s48_s26, 1024  ;;  %p4608_p1 = scmp.lt.s32.totalorder %s48_s26, %s48_s26 }
   0x7   :  { %p4604_p0 = scmp.ne.s32.totalorder %s48_s26, %s4603_s27  ;;  %p4609_p2 = scmp.lt.s32.totalorder %s4603_s27, %s4603_s27 }
   0x9   :  { %p4610_p3 = por %p4609_p2, %p4608_p1 }
   0xb   :  { %p4611_p4 = pnand %p4610_p3, %p4604_p0 }
   0xd   :  { %4614 = shalt.err (!%p4611_p4)
}
   0xe   :  { %s4746_s28 = smov 64   ;;  %s4747_s29 = smov 4  }
   0xf   :  { %53 = dma.hbm_to_vmem [thread:$0]  %s6359_s4, 1024, %s48_s26, [#allocation7], %s4746_s28, %s4746_s28, %s4747_s29  }
  0x10   :  { %s4748_s15 = smov [#allocation9]   ;;  %s4749_s17 = smov [#allocation3]  }
  0x11   :  { %s75_s16 = sshll.u32 %s4748_s15, 4  ;;  %s29_s18 = sshll.u32 %s4749_s17, 4  ;;  %s76_s16 = int_to_ptr.vmem [resolvable:$true] %s75_s16  ;;  %s30_s18 = int_to_ptr.vmem [resolvable:$true] %s29_s18 }
  0x12   :  { %s4623_s19 = scalar_lea.vmem %s76_s16, 3072  ;;  %p4628_p6 = scmp.lt.s32.totalorder %s76_s16, %s76_s16 }
  0x13   :  { %p4624_p5 = scmp.ne.s32.totalorder %s76_s16, %s4623_s19  ;;  %p4629_p7 = scmp.lt.s32.totalorder %s4623_s19, %s4623_s19 }
  0x15   :  { %p4630_p8 = por %p4629_p7, %p4628_p6 }
  0x17   :  { %p4631_p9 = pnand %p4630_p8, %p4624_p5 }
  0x19   :  { %4634 = shalt.err (!%p4631_p9)
}
  0x1a   :  { %s4750_s20 = smov 192   ;;  %s4751_s21 = smov 12  }
  0x1b   :  { %81 = dma.hbm_to_vmem [thread:$0]  %s6363_s8, 3072, %s76_s16, [#allocation10], %s4750_s20, %s4750_s20, %s4751_s21  }
  0x1c   :  { %s4643_s4 = scalar_lea.vmem %s30_s18, 1024  ;;  %p4648_p11 = scmp.lt.s32.totalorder %s30_s18, %s30_s18 }
  0x1d   :  { %p4644_p10 = scmp.ne.s32.totalorder %s30_s18, %s4643_s4  ;;  %p4649_p12 = scmp.lt.s32.totalorder %s4643_s4, %s4643_s4 }
  0x1f   :  { %p4650_p13 = por %p4649_p12, %p4648_p11 }
  0x21   :  { %p4651_p0 = pnand %p4650_p13, %p4644_p10 }
  0x23   :  { %4654 = shalt.err (!%p4651_p0)
}
  0x24   :  { %s4752_s24 = smov 128   ;;  %s4753_s25 = smov 8  }
  0x25   :  { %35 = dma.hbm_to_vmem [thread:$0]  %s6355_s0, 1024, %s30_s18, [#allocation4], %s4752_s24, %s4752_s24, %s4753_s25  }
  0x26   :  { %s4754_s30 = smov [#allocation8]   ;;  %s4755_s8 = smov [#allocation11]  }
  0x27   :  { %s61_s14 = sshll.u32 %s4754_s30, 4  ;;  %s89_s15 = sshll.u32 %s4755_s8, 4  ;;  %s62_s14 = int_to_ptr.vmem [resolvable:$true] %s61_s14  ;;  %s90_s15 = int_to_ptr.vmem [resolvable:$true] %s89_s15 }
  0x28   :  { %s4663_s16 = scalar_lea.vmem %s62_s14, 3072  ;;  %p4668_p2 = scmp.lt.s32.totalorder %s62_s14, %s62_s14 }
  0x29   :  { %p4664_p1 = scmp.ne.s32.totalorder %s62_s14, %s4663_s16  ;;  %p4669_p3 = scmp.lt.s32.totalorder %s4663_s16, %s4663_s16 }
  0x2b   :  { %p4670_p4 = por %p4669_p3, %p4668_p2 }
  0x2d   :  { %p4671_p5 = pnand %p4670_p4, %p4664_p1 }
  0x2f   :  { %4674 = shalt.err (!%p4671_p5)
}
  0x30   :  { %67 = dma.hbm_to_vmem [thread:$0]  %s6361_s6, 3072, %s62_s14, [#allocation7], %s4750_s20, %s4750_s20, %s4751_s21  }
  0x31   :  { %s4683_s22 = scalar_lea.vmem %s90_s15, 1024  ;;  %p4688_p7 = scmp.lt.s32.totalorder %s90_s15, %s90_s15 }
  0x32   :  { %p4684_p6 = scmp.ne.s32.totalorder %s90_s15, %s4683_s22  ;;  %p4689_p8 = scmp.lt.s32.totalorder %s4683_s22, %s4683_s22 }
  0x34   :  { %p4690_p9 = por %p4689_p8, %p4688_p7 }
  0x36   :  { %p4691_p10 = pnand %p4690_p9, %p4684_p6 }
  0x38   :  { %4694 = shalt.err (!%p4691_p10)
}
  0x39   :  { %95 = dma.hbm_to_vmem [thread:$0]  %s6365_s10, 1024, %s90_s15, [#allocation10], %s4746_s28, %s4746_s28, %s4747_s29  }
  0x3a   :  { %4735 = dma.done.wait [#allocation4], 1024  }
  0x3b   :  { %4736 = vsyncadd [#allocation4], 4294966272 }
  0x3c   :  { %4737 = dma.done.wait [#allocation7], 4096  }
  0x3d   :  { %4738 = vsyncadd [#allocation7], 4294963200 }
  0x3e   :  { %4739 = dma.done.wait [#allocation10], 4096  }
  0x3f   :  { %4740 = vsyncadd [#allocation10], 4294963200  ;;  %v6399_v0 = vmov 0.0   ;;  %vm4757_vm0 = vmmov 0   ;;  %v4864_v1 = vld [vmem:[%s6357_s2] sm:$0xff]   ;;  %vm238_vm1 = vcmask 130048  }
  0x40   :  { %3594 = vmatprep.subr.bf16.mxu0 %v6399_v0  ;;  %3596 = vmatprep.mubr.msk.bf16.mxu0 %vm4757_vm0, %v6399_v0  ;;  %6494 = vst [vmem:[#allocation20_spill] sm:$0xff] %v4864_v1  ;;  %v224_v2 = vld [vmem:[#allocation3] sm:$0xff]  ;;  %v4867_v4 = vld [vmem:[#allocation6 + $0x38] sm:$0xff]   ;;  %v4870_v5 = vld [vmem:[#allocation6 + $0x30] sm:$0xff]   ;;  %v6369_v45 = vmov 0  }
  0x41   :  { %3600 = vmatprep.subr.bf16.mxu1 %v6399_v0  ;;  %3616 = vmatprep.mubr.msk.bf16.mxu1 %vm4757_vm0, %v6399_v0  ;;  %v225_v3 = vpack.c.bf16 %v224_v2, %v224_v2  ;;  %v4874_v6 = vld [vmem:[#allocation6 + $0x28] sm:$0xff]   ;;  %v4878_v7 = vld [vmem:[#allocation6 + $0x20] sm:$0xff]   ;;  %v4882_v8 = vld [vmem:[#allocation6 + $0x18] sm:$0xff]  }
  0x42   :  { %3595 = vmatpush3.bf16.msra.mxu0 %v4864_v1  ;;  %3601 = vmatpush3.bf16.msra.mxu1 %v4867_v4  ;;  %v4886_v9 = vld [vmem:[#allocation6 + $0x10] sm:$0xff]   ;;  %v4892_v10 = vld [vmem:[#allocation6 + $0x8] sm:$0xff]   ;;  %v4896_v11 = vld [vmem:[#allocation6] sm:$0xff]  }
  0x43   :  { %3602 = vmatprep.subr.bf16.mxu1 %v6399_v0  ;;  %v4900_v12 = vld [vmem:[#allocation8 + $0xac] ss:$12 sps:$4 sm:$0xff]   ;;  %v4902_v13 = vld [vmem:[#allocation8 + $0xa8] ss:$12 sps:$4 sm:$0xff]   ;;  %v4908_v15 = vld [vmem:[#allocation8 + $0x90] ss:$12 sps:$4 sm:$0xff]  }
  0x44   :  { %6495 = vst [vmem:[#allocation21_spill] sm:$0xff] %v4900_v12  ;;  %6496 = vst [vmem:[#allocation22_spill] sm:$0xff] %v4902_v13  ;;  %v4904_v14 = vld [vmem:[#allocation8 + $0x94] ss:$12 sps:$4 sm:$0xff]   ;;  %524 = vmatprep.subr.bf16.mxu0 %v4900_v12  ;;  %v4911_v16 = vld [vmem:[#allocation8 + $0x7c] ss:$12 sps:$4 sm:$0xff]  }
  0x45   :  { %3597 = vmatmul.mubr.msk.bf16.vlgmr.msra.gmra.mxu0 %vm238_vm1, %v225_v3  ;;  %6497 = vst [vmem:[#allocation23_spill] sm:$0xff] %v4904_v14  ;;  %6498 = vst [vmem:[#allocation24_spill] sm:$0xff] %v4908_v15  ;;  %v4914_v17 = vld [vmem:[#allocation8 + $0x78] ss:$12 sps:$4 sm:$0xff]   ;;  %v4920_v19 = vld [vmem:[#allocation8 + $0x60] ss:$12 sps:$4 sm:$0xff]  }
  0x46   :  { %3603 = vmatpush3.bf16.msra.mxu1 %v4870_v5  ;;  %525 = vmatpush1.bf16.msra.mxu0 %v4902_v13  ;;  %6499 = vst [vmem:[#allocation25_spill] sm:$0xff] %v4911_v16  ;;  %6500 = vst [vmem:[#allocation26_spill] sm:$0xff] %v4914_v17  ;;  %v4917_v18 = vld [vmem:[#allocation8 + $0x64] ss:$12 sps:$4 sm:$0xff]   ;;  %v4923_v20 = vld [vmem:[#allocation8 + $0x4c] ss:$12 sps:$4 sm:$0xff]  }
  0x47   :  { %3604 = vmatprep.subr.bf16.mxu1 %v6399_v0  ;;  %526 = vmatprep.subr.bf16.mxu0 %v4904_v14  ;;  %6501 = vst [vmem:[#allocation27_spill] sm:$0xff] %v4917_v18  ;;  %6502 = vst [vmem:[#allocation28_spill] sm:$0xff] %v4920_v19  ;;  %v4926_v21 = vld [vmem:[#allocation8 + $0x48] ss:$12 sps:$4 sm:$0xff]   ;;  %v4932_v23 = vld [vmem:[#allocation8 + $0x30] ss:$12 sps:$4 sm:$0xff]  }
  0x48   :  { %6503 = vst [vmem:[#allocation29_spill] sm:$0xff] %v4923_v20  ;;  %6504 = vst [vmem:[#allocation30_spill] sm:$0xff] %v4926_v21  ;;  %v4929_v22 = vld [vmem:[#allocation8 + $0x34] ss:$12 sps:$4 sm:$0xff]   ;;  %v4935_v24 = vld [vmem:[#allocation8 + $0x1c] ss:$12 sps:$4 sm:$0xff]   ;;  %556 = vmatprep.mubr.bf16.mxu0 %v6369_v45 }
  0x49   :  { %6505 = vst [vmem:[#allocation31_spill] sm:$0xff] %v4929_v22  ;;  %6506 = vst [vmem:[#allocation32_spill] sm:$0xff] %v4932_v23  ;;  %v4938_v25 = vld [vmem:[#allocation8 + $0x18] ss:$12 sps:$4 sm:$0xff]   ;;  %v4945_v26 = vld [vmem:[%s6358_s3] ss:$0 sm:$0xff] }
  0x4a   :  { %3605 = vmatpush3.bf16.msra.mxu1 %v4874_v6  ;;  %527 = vmatpush1.bf16.msra.mxu0 %v4908_v15  ;;  %6507 = vst [vmem:[#allocation33_spill] sm:$0xff] %v4935_v24  ;;  %6508 = vst [vmem:[#allocation34_spill] sm:$0xff] %v4938_v25  ;;  %v4948_v32 = vld [vmem:[#allocation8 + $0xb0] ss:$12 sps:$4 sm:$0xff]   ;;  %v4951_v35 = vld [vmem:[#allocation8 + $0x98] ss:$12 sps:$4 sm:$0xff]  }
  0x4b   :  { %3606 = vmatprep.subr.bf16.mxu1 %v6399_v0  ;;  %528 = vmatprep.subr.bf16.mxu0 %v4911_v16  ;;  %v4957_v36 = vld [vmem:[#allocation8 + $0x80] ss:$12 sps:$4 sm:$0xff]   ;;  %v4961_v37 = vld [vmem:[#allocation8 + $0x68] ss:$12 sps:$4 sm:$0xff]   ;;  %v4965_v38 = vld [vmem:[#allocation8 + $0x50] ss:$12 sps:$4 sm:$0xff]  }
  0x4c   :  { %v4969_v39 = vld [vmem:[#allocation8 + $0x38] ss:$12 sps:$4 sm:$0xff]   ;;  %v4974_v40 = vld [vmem:[#allocation8 + $0x20] ss:$12 sps:$4 sm:$0xff]   ;;  %v4983_v43 = vld [vmem:[#allocation8 + $0x8] ss:$12 sps:$4 sm:$0xff]  }
  0x4d   :  { %v4977_v41 = vld [vmem:[#allocation8 + $0x4] ss:$12 sps:$4 sm:$0xff]   ;;  %v4979_v42 = vld [vmem:[#allocation8] ss:$12 sps:$4 sm:$0xff]   ;;  %v4998_v52 = vld [vmem:[#allocation9 + $0xa8] ss:$12 sps:$4 sm:$0xff]  }
  0x4e   :  { %3607 = vmatpush3.bf16.msra.mxu1 %v4878_v7  ;;  %529 = vmatpush1.bf16.msra.mxu0 %v4914_v17  ;;  %6509 = vst [vmem:[#allocation35_spill] sm:$0xff] %v4977_v41  ;;  %6510 = vst [vmem:[#allocation36_spill] sm:$0xff] %v4979_v42  ;;  %v4987_v44 = vld [vmem:[#allocation9 + $0xac] ss:$12 sps:$4 sm:$0xff]   ;;  %v4995_v46 = vld [vmem:[%s6360_s5] ss:$0 sm:$0xff] }
  0x4f   :  { %3608 = vmatprep.subr.bf16.mxu1 %v6399_v0  ;;  %530 = vmatprep.subr.bf16.mxu0 %v4917_v18  ;;  %6511 = vst [vmem:[#allocation37_spill] sm:$0xff] %v4987_v44  ;;  %v5000_v53 = vld [vmem:[#allocation9 + $0xb0] ss:$12 sps:$4 sm:$0xff]   ;;  %v5002_v55 = vld [vmem:[#allocation9 + $0x94] ss:$12 sps:$4 sm:$0xff]  }
  0x50   :  { %v5005_v57 = vld [vmem:[#allocation9 + $0x90] ss:$12 sps:$4 sm:$0xff]   ;;  %v5008_v58 = vld [vmem:[#allocation9 + $0x98] ss:$12 sps:$4 sm:$0xff]   ;;  %v5021_v61 = vld [vmem:[#allocation9 + $0x80] ss:$12 sps:$4 sm:$0xff]  }
  0x51   :  { %v5011_v59 = vld [vmem:[#allocation9 + $0x7c] ss:$12 sps:$4 sm:$0xff]   ;;  %v5018_v60 = vld [vmem:[#allocation9 + $0x78] ss:$12 sps:$4 sm:$0xff]   ;;  %v5028_v63 = vld [vmem:[#allocation9 + $0x60] ss:$12 sps:$4 sm:$0xff]  }
  0x52   :  { %3609 = vmatpush3.bf16.msra.mxu1 %v4882_v8  ;;  %531 = vmatpush1.bf16.msra.mxu0 %v4920_v19  ;;  %v5024_v62 = vld [vmem:[#allocation9 + $0x64] ss:$12 sps:$4 sm:$0xff]   ;;  %v5031_v2 = vld [vmem:[#allocation9 + $0x68] ss:$12 sps:$4 sm:$0xff]   ;;  %v5034_v3 = vld [vmem:[#allocation9 + $0x4c] ss:$12 sps:$4 sm:$0xff]  }
  0x53   :  { %3610 = vmatprep.subr.bf16.mxu1 %v6399_v0  ;;  %532 = vmatprep.subr.bf16.mxu0 %v4923_v20 }
  0x56   :  { %3611 = vmatpush3.bf16.msra.mxu1 %v4886_v9  ;;  %533 = vmatpush1.bf16.msra.mxu0 %v4926_v21 }
  0x57   :  { %3612 = vmatprep.subr.bf16.mxu1 %v6399_v0  ;;  %534 = vmatprep.subr.bf16.mxu0 %v4929_v22 }
  0x5a   :  { %3613 = vmatpush3.bf16.msra.mxu1 %v4892_v10  ;;  %535 = vmatpush1.bf16.msra.mxu0 %v4932_v23 }
  0x5b   :  { %3614 = vmatprep.subr.bf16.mxu1 %v6399_v0  ;;  %536 = vmatprep.subr.bf16.mxu0 %v4935_v24 }
  0x5e   :  { %3615 = vmatpush3.bf16.msra.mxu1 %v4896_v11  ;;  %537 = vmatpush1.bf16.msra.mxu0 %v4938_v25 }
  0x5f   :  { %3620 = vmatprep.subr.bf16.mxu1 %v6399_v0  ;;  %538 = vmatprep.subr.bf16.mxu0 %v4977_v41 }
  0x62   :  { %539 = vmatpush1.bf16.msra.mxu0 %v4979_v42 }
  0x63   :  { %750 = vmatprep.subr.bf16.mxu0 %v4987_v44 }
 0x105   :  { %v276_v27 = vpop.f32.mrf.mxu0 }
 0x106   :  { %v277_v28 = vadd.f32 %v4945_v26, %v276_v27  ;;  %v5038_v27 = vld [vmem:[#allocation9 + $0x48] ss:$12 sps:$4 sm:$0xff]  }
 0x107   :  { %v3598_v29 = vpop.f32.mrf.mxu0 }
 0x108   :  { %v282_v30 = vmax.f32 %v277_v28, 0.0  ;;  %v5041_v28 = vld [vmem:[#allocation9 + $0x50] ss:$12 sps:$4 sm:$0xff]   ;;  %v5044_v29 = vld [vmem:[#allocation9 + $0x34] ss:$12 sps:$4 sm:$0xff]  }
 0x109   :  { %v279_v31 = vpop.f32.mrf.mxu0 }
 0x10a   :  { %v283_v33 = vpack.c.bf16 %v282_v30, %v282_v30  ;;  %v5048_v30 = vld [vmem:[#allocation9 + $0x30] ss:$12 sps:$4 sm:$0xff]   ;;  %v5051_v31 = vld [vmem:[#allocation9 + $0x38] ss:$12 sps:$4 sm:$0xff]  }
 0x10b   :  { %v3599_v34 = vpop.f32.mrf.mxu0 }
 0x10c   :  { %3617 = vmatmul.mubr.bf16.vlgmr.msra.gmra.mxu1 %v283_v33  ;;  %v5054_v33 = vld [vmem:[#allocation9 + $0x1c] ss:$12 sps:$4 sm:$0xff]   ;;  %v5058_v34 = vld [vmem:[#allocation9 + $0x18] ss:$12 sps:$4 sm:$0xff]  }
 0x10d   :  { %3621 = vmatpush3.bf16.msra.mxu1 %v4948_v32  ;;  %3636 = vmatprep.mubr.msk.bf16.mxu1 %vm4757_vm0, %v6399_v0  ;;  %6512 = vst [vmem:[#allocation38_spill] sm:$0xff] %v5054_v33  ;;  %6513 = vst [vmem:[#allocation39_spill] sm:$0xff] %v5058_v34 }
 0x10e   :  { %3622 = vmatprep.subr.bf16.mxu1 %v6399_v0 }
 0x111   :  { %3623 = vmatpush3.bf16.msra.mxu1 %v4951_v35 }
 0x112   :  { %3624 = vmatprep.subr.bf16.mxu1 %v6399_v0 }
 0x115   :  { %3625 = vmatpush3.bf16.msra.mxu1 %v4957_v36 }
 0x116   :  { %3626 = vmatprep.subr.bf16.mxu1 %v6399_v0 }
 0x119   :  { %3627 = vmatpush3.bf16.msra.mxu1 %v4961_v37 }
 0x11a   :  { %3628 = vmatprep.subr.bf16.mxu1 %v6399_v0 }
 0x11d   :  { %3629 = vmatpush3.bf16.msra.mxu1 %v4965_v38 }
 0x11e   :  { %3630 = vmatprep.subr.bf16.mxu1 %v6399_v0 }
 0x121   :  { %3631 = vmatpush3.bf16.msra.mxu1 %v4969_v39 }
 0x122   :  { %3632 = vmatprep.subr.bf16.mxu1 %v6399_v0 }
 0x125   :  { %3633 = vmatpush3.bf16.msra.mxu1 %v4974_v40 }
 0x126   :  { %3634 = vmatprep.subr.bf16.mxu1 %v6399_v0 }
 0x129   :  { %3635 = vmatpush3.bf16.msra.mxu1 %v4983_v43 }
 0x12a   :  { %3640 = vmatprep.subr.bf16.mxu1 %v6399_v0 }
 0x1cc   :  { %v372_v47 = vpop.f32.mrf.mxu1 }
 0x1cd   :  { %v373_v48 = vadd.f32 %v4995_v46, %v372_v47  ;;  %v5061_v47 = vld [vmem:[#allocation9 + $0x20] ss:$12 sps:$4 sm:$0xff]  }
 0x1ce   :  { %v3618_v49 = vpop.f32.mrf.mxu1  ;;  %6514 = vst [vmem:[#allocation40_spill] sm:$0xff] %v5061_v47 }
 0x1cf   :  { %v378_v50 = vmax.f32 %v373_v48, 0.0  ;;  %v5064_v48 = vld [vmem:[#allocation9 + $0x4] ss:$12 sps:$4 sm:$0xff]   ;;  %v5068_v49 = vld [vmem:[#allocation9] ss:$12 sps:$4 sm:$0xff]  }
 0x1d0   :  { %v375_v51 = vpop.f32.mrf.mxu1  ;;  %6515 = vst [vmem:[#allocation41_spill] sm:$0xff] %v5064_v48  ;;  %6516 = vst [vmem:[#allocation42_spill] sm:$0xff] %v5068_v49 }
 0x1d1   :  { %v379_v54 = vpack.c.bf16 %v378_v50, %v378_v50  ;;  %v5073_v50 = vld [vmem:[%s6356_s1] sm:$0xff]  ;;  %v5076_v51 = vld [vmem:[#allocation9 + $0x8] ss:$12 sps:$4 sm:$0xff]  }
 0x1d2   :  { %v3619_v56 = vpop.f32.mrf.mxu1  ;;  %6517 = vst [vmem:[#allocation43_spill] sm:$0xff] %v5076_v51 }
 0x1d3   :  { %557 = vmatmul.mubr.bf16.vlgmr.msra.gmra.mxu0 %v379_v54  ;;  %3637 = vmatmul.mubr.bf16.vlgmr.msra.gmra.mxu1 %v379_v54  ;;  %v605_v54 = vpack.c.bf16 %v5073_v50, %v5073_v50  ;;  %v949_v56 = vld [vmem:[#allocation3 + $0x8] sm:$0xff] }
 0x1d4   :  { %751 = vmatpush1.bf16.msra.mxu0 %v4998_v52  ;;  %3641 = vmatpush3.bf16.msra.mxu1 %v5000_v53 }
 0x1d5   :  { %752 = vmatprep.subr.bf16.mxu0 %v5002_v55  ;;  %782 = vmatprep.mubr.bf16.mxu0 %v6369_v45  ;;  %v950_v45 = vpack.c.bf16 %v949_v56, %v949_v56  ;;  %v5118_v56 = vld [vmem:[#allocation11 + $0x28] sm:$0xff]  }
 0x1d6   :  { %3642 = vmatprep.subr.bf16.mxu1 %v6399_v0  ;;  %3656 = vmatprep.mubr.msk.bf16.mxu1 %vm4757_vm0, %v6399_v0  ;;  %6521 = vst [vmem:[#allocation46_spill] sm:$0xff] %v5118_v56 }
 0x1d8   :  { %753 = vmatpush1.bf16.msra.mxu0 %v5005_v57  ;;  %3643 = vmatpush3.bf16.msra.mxu1 %v5008_v58 }
 0x1d9   :  { %754 = vmatprep.subr.bf16.mxu0 %v5011_v59  ;;  %3644 = vmatprep.subr.bf16.mxu1 %v6399_v0 }
 0x1dc   :  { %755 = vmatpush1.bf16.msra.mxu0 %v5018_v60  ;;  %3645 = vmatpush3.bf16.msra.mxu1 %v5021_v61 }
 0x1dd   :  { %756 = vmatprep.subr.bf16.mxu0 %v5024_v62  ;;  %3646 = vmatprep.subr.bf16.mxu1 %v6399_v0 }
 0x1e0   :  { %757 = vmatpush1.bf16.msra.mxu0 %v5028_v63  ;;  %3647 = vmatpush3.bf16.msra.mxu1 %v5031_v2 }
 0x1e1   :  { %758 = vmatprep.subr.bf16.mxu0 %v5034_v3  ;;  %3648 = vmatprep.subr.bf16.mxu1 %v6399_v0 }
 0x1e4   :  { %759 = vmatpush1.bf16.msra.mxu0 %v5038_v27  ;;  %3649 = vmatpush3.bf16.msra.mxu1 %v5041_v28 }
 0x1e5   :  { %760 = vmatprep.subr.bf16.mxu0 %v5044_v29  ;;  %3650 = vmatprep.subr.bf16.mxu1 %v6399_v0 }
 0x1e8   :  { %761 = vmatpush1.bf16.msra.mxu0 %v5048_v30  ;;  %3651 = vmatpush3.bf16.msra.mxu1 %v5051_v31 }
 0x1e9   :  { %762 = vmatprep.subr.bf16.mxu0 %v5054_v33  ;;  %3652 = vmatprep.subr.bf16.mxu1 %v6399_v0 }
 0x1ec   :  { %763 = vmatpush1.bf16.msra.mxu0 %v5058_v34  ;;  %3653 = vmatpush3.bf16.msra.mxu1 %v5061_v47 }
 0x1ed   :  { %764 = vmatprep.subr.bf16.mxu0 %v5064_v48  ;;  %3654 = vmatprep.subr.bf16.mxu1 %v6399_v0 }
 0x1f0   :  { %765 = vmatpush1.bf16.msra.mxu0 %v5068_v49  ;;  %3655 = vmatpush3.bf16.msra.mxu1 %v5076_v51  ;;  %v6518_v51 = vmov 0  }
 0x1f1   :  { %3680 = vmatprep.subr.bf16.mxu1 %v6399_v0  ;;  %3660 = vmatprep.subr.bf16.mxu0 %v6399_v0 }
 0x1f3   :  { %783 = vmatmul.mubr.bf16.vlgmr.msra.gmra.mxu0 %v605_v54  ;;  %3657 = vmatmul.mubr.bf16.vlgmr.msra.gmra.mxu1 %v605_v54  ;;  %v5114_v54 = vld [vmem:[#allocation11 + $0x30] sm:$0xff]  }
 0x1f4   :  { %3681 = vmatpush3.bf16.msra.mxu1 %v4864_v1  ;;  %3682 = vmatprep.mubr.msk.bf16.mxu1 %vm4757_vm0, %v6399_v0  ;;  %6520 = vst [vmem:[#allocation45_spill] sm:$0xff] %v5114_v54 }
 0x1f5   :  { %3676 = vmatprep.mubr.msk.bf16.mxu0 %vm4757_vm0, %v6399_v0  ;;  %1038 = vmatprep.subr.bf16.mxu1 %v4900_v12 }
 0x1fb   :  { %3683 = vmatmul.mubr.msk.bf16.vlgmr.msra.gmra.mxu1 %vm238_vm1, %v950_v45  ;;  %v5110_v45 = vld [vmem:[#allocation11 + $0x38] sm:$0xff]  }
 0x1fc   :  { %1039 = vmatpush1.bf16.msra.mxu1 %v4902_v13  ;;  %1070 = vmatprep.mubr.bf16.mxu1 %v6518_v51  ;;  %6519 = vst [vmem:[#allocation44_spill] sm:$0xff] %v5110_v45 }
 0x1fd   :  { %1040 = vmatprep.subr.bf16.mxu1 %v4904_v14  ;;  %3661 = vmatpush3.bf16.msra.mxu0 %v5110_v45 }
 0x1fe   :  { %3662 = vmatprep.subr.bf16.mxu0 %v6399_v0 }
 0x200   :  { %1041 = vmatpush1.bf16.msra.mxu1 %v4908_v15 }
 0x201   :  { %1042 = vmatprep.subr.bf16.mxu1 %v4911_v16  ;;  %3663 = vmatpush3.bf16.msra.mxu0 %v5114_v54 }
 0x202   :  { %3664 = vmatprep.subr.bf16.mxu0 %v6399_v0 }
 0x204   :  { %1043 = vmatpush1.bf16.msra.mxu1 %v4914_v17  ;;  %v381_v17 = vlaneseq }
 0x205   :  { %1044 = vmatprep.subr.bf16.mxu1 %v4917_v18  ;;  %3665 = vmatpush3.bf16.msra.mxu0 %v5118_v56 }
 0x206   :  { %3666 = vmatprep.subr.bf16.mxu0 %v6399_v0  ;;  %v382_v16 = vshrl.u32 %v381_v17, 7 }
 0x208   :  { %1045 = vmatpush1.bf16.msra.mxu1 %v4920_v19 }
 0x209   :  { %1046 = vmatprep.subr.bf16.mxu1 %v4923_v20 }
 0x20c   :  { %1047 = vmatpush1.bf16.msra.mxu1 %v4926_v21 }
 0x20d   :  { %1048 = vmatprep.subr.bf16.mxu1 %v4929_v22 }
 0x210   :  { %1049 = vmatpush1.bf16.msra.mxu1 %v4932_v23 }
 0x211   :  { %1050 = vmatprep.subr.bf16.mxu1 %v4935_v24  ;;  %v5137_v24 = vld [vmem:[#allocation11] sm:$0xff]  }
 0x212   :  { %6526 = vst [vmem:[#allocation51_spill] sm:$0xff] %v5137_v24 }
 0x214   :  { %1051 = vmatpush1.bf16.msra.mxu1 %v4938_v25  ;;  %v5133_v25 = vld [vmem:[#allocation11 + $0x8] sm:$0xff]  }
 0x215   :  { %1052 = vmatprep.subr.bf16.mxu1 %v4977_v41  ;;  %v5129_v41 = vld [vmem:[#allocation11 + $0x10] sm:$0xff]   ;;  %6525 = vst [vmem:[#allocation50_spill] sm:$0xff] %v5133_v25 }
 0x216   :  { %6524 = vst [vmem:[#allocation49_spill] sm:$0xff] %v5129_v41 }
 0x218   :  { %1053 = vmatpush1.bf16.msra.mxu1 %v4979_v42  ;;  %v5122_v42 = vld [vmem:[#allocation11 + $0x20] sm:$0xff]  }
 0x219   :  { %1119 = vmatprep.subr.bf16.mxu1 %v4987_v44  ;;  %6522 = vst [vmem:[#allocation47_spill] sm:$0xff] %v5122_v42  ;;  %3667 = vmatpush3.bf16.msra.mxu0 %v5122_v42  ;;  %v5125_v44 = vld [vmem:[#allocation11 + $0x18] sm:$0xff]   ;;  %v383_v42 = vsub.s32 0, %v382_v16 }
 0x21a   :  { %6523 = vst [vmem:[#allocation48_spill] sm:$0xff] %v5125_v44  ;;  %3668 = vmatprep.subr.bf16.mxu0 %v6399_v0 }
 0x21d   :  { %3669 = vmatpush3.bf16.msra.mxu0 %v5125_v44 }
 0x21e   :  { %3670 = vmatprep.subr.bf16.mxu0 %v6399_v0 }
 0x221   :  { %3671 = vmatpush3.bf16.msra.mxu0 %v5129_v41 }
 0x222   :  { %3672 = vmatprep.subr.bf16.mxu0 %v6399_v0 }
 0x225   :  { %3673 = vmatpush3.bf16.msra.mxu0 %v5133_v25  ;;  %v172_v25 = vld [vmem:[%s6362_s7] sm:$0x7] }
 0x226   :  { %3674 = vmatprep.subr.bf16.mxu0 %v6399_v0 }
 0x229   :  { %3675 = vmatpush3.bf16.msra.mxu0 %v5137_v24  ;;  %v205_v24 = vld [vmem:[%s6364_s9] sm:$0x7] }
 0x22a   :  { %3686 = vmatprep.subr.bf16.mxu0 %v6399_v0  ;;  %v5148_v0 = vrot.slane %v172_v25, %v383_v42  ;;  %v5150_v15 = vrot.slane %v205_v24, %v383_v42 }
 0x22c   :  { %6527 = vst [vmem:[#allocation52_spill] sm:$0xff] %v5148_v0  ;;  %6528 = vst [vmem:[#allocation53_spill] sm:$0xff] %v5150_v15 }
 0x293   :  { %v558_v23 = vpop.f32.mrf.mxu0  ;;  %v599_v22 = vpop.f32.mrf.mxu1 }
 0x295   :  { %v560_v21 = vpop.f32.mrf.mxu0  ;;  %v3638_v20 = vpop.f32.mrf.mxu1 }
 0x296   :  { %v387_v20 = vsub.s32 1, %v382_v16 }
 0x297   :  { %v562_v19 = vpop.f32.mrf.mxu0  ;;  %v602_v41 = vpop.f32.mrf.mxu1 }
 0x298   :  { %v5156_v13 = vrot.slane %v172_v25, %v387_v20 }
 0x299   :  { %v563_v18 = vpop.f32.mrf.mxu0  ;;  %v3639_v44 = vpop.f32.mrf.mxu1 }
 0x29a   :  { %v559_v18 = vadd.f32 %v558_v23, %v5148_v0  ;;  %v5154_v44 = vrot.slane %v205_v24, %v387_v20  ;;  %v561_v47 = vadd.f32 %v560_v21, %v5156_v13 }
 0x2b3   :  { %v784_v19 = vpop.f32.mrf.mxu0  ;;  %v825_v41 = vpop.f32.mrf.mxu1 }
 0x2b4   :  { %v785_v17 = vadd.f32 %v784_v19, %v5150_v15 }
 0x2b5   :  { %v786_v14 = vpop.f32.mrf.mxu0  ;;  %v3658_v56 = vpop.f32.mrf.mxu1 }
 0x2b6   :  { %v831_v54 = vadd.f32 %v785_v17, %v559_v18  ;;  %v787_v42 = vadd.f32 %v786_v14, %v5154_v44 }
 0x2b7   :  { %v788_v12 = vpop.f32.mrf.mxu0  ;;  %v828_v45 = vpop.f32.mrf.mxu1 }
 0x2b8   :  { %v3258_v1 = vmul.f32 -1.442695, %v831_v54  ;;  %v838_v0 = vadd.f32 %v787_v42, %v561_v47  ;;  %v391_v12 = vsub.s32 2, %v382_v16 }
 0x2b9   :  { %v789_v49 = vpop.f32.mrf.mxu0  ;;  %v3659_v48 = vpop.f32.mrf.mxu1 }
 0x2ba   :  { %4379 = vpow2.f32 %v3258_v1  ;;  %v3259_v34 = vmul.f32 -1.442695, %v838_v0  ;;  %v5160_v45 = vrot.slane %v205_v24, %v391_v12  ;;  %v5162_v14 = vrot.slane %v172_v25, %v391_v12 }
 0x2bb   :  { %v988_v23 = vpop.f32.mrf.mxu1 }
 0x2bc   :  { %4381 = vpow2.f32 %v3259_v34  ;;  %v826_v21 = vadd.f32 %v825_v41, %v5160_v45  ;;  %v600_v47 = vadd.f32 %v599_v22, %v5162_v14  ;;  %v6529_v22 = vmov 0.0  }
 0x2bd   :  { %v3684_v19 = vpop.f32.mrf.mxu1 }
 0x2bf   :  { %v991_v15 = vpop.f32.mrf.mxu1 }
 0x2c1   :  { %v3685_v33 = vpop.f32.mrf.mxu1 }
 0x2c7   :  { %v4380_v56 = vpop.eup %4379 }
 0x2c8   :  { %v835_v20 = vadd.f32 1.0, %v4380_v56 }
 0x2c9   :  { %v4382_v54 = vpop.eup %4381 }
 0x2ca   :  { %4383 = vrcp.f32 %v835_v20  ;;  %v842_v48 = vadd.f32 1.0, %v4382_v54 }
 0x2cc   :  { %4385 = vrcp.f32 %v842_v48 }
 0x2d7   :  { %v4384_v1 = vpop.eup %4383 }
 0x2d8   :  { %v845_v15 = vmul.f32 %v4384_v1, %v826_v21  ;;  %v6530_v21 = vld [vmem:[#allocation38_spill] sm:$0xff]  ;;  %v6531_v1 = vld [vmem:[#allocation39_spill] sm:$0xff] }
 0x2d9   :  { %v4386_v33 = vpop.eup %4385 }
 0x2da   :  { %v846_v0 = vadd.f32 %v845_v15, %v600_v47  ;;  %v848_v34 = vsub.f32 1.0, %v4386_v33  ;;  %v850_v16 = vmul.f32 %v4386_v33, %v5073_v50  ;;  %v6532_v47 = vld [vmem:[#allocation40_spill] sm:$0xff]  ;;  %v6533_v15 = vld [vmem:[#allocation41_spill] sm:$0xff]  ;;  %v6535_v33 = vld [vmem:[#allocation43_spill] sm:$0xff] }
 0x2dc   :  { %4387 = vtanh.f32 %v846_v0  ;;  %v6534_v0 = vld [vmem:[#allocation42_spill] sm:$0xff] }
 0x2e9   :  { %v4388_v49 = vpop.eup %4387 }
 0x2ea   :  { %v849_v18 = vmul.f32 %v4388_v49, %v848_v34  ;;  %v6536_v34 = vld [vmem:[#allocation20_spill] sm:$0xff]  ;;  %v1265_v49 = vld [vmem:[#allocation3 + $0x10] sm:$0xff] }
 0x2ec   :  { %v5167_v24 = vadd.f32 %v850_v16, %v849_v18  ;;  %v6537_v18 = vld [vmem:[#allocation44_spill] sm:$0xff]  ;;  %v6538_v16 = vld [vmem:[#allocation21_spill] sm:$0xff] }
 0x2ee   :  { %v5171_v25 = vpack.c.bf16 %v5167_v24, %v5167_v24 }
 0x2f0   :  { %3677 = vmatmul.mubr.bf16.vlgmr.msra.gmra.mxu0 %v5171_v25 }
 0x2f1   :  { %3687 = vmatpush3.bf16.msra.mxu0 %v4867_v4  ;;  %3702 = vmatprep.mubr.msk.bf16.mxu0 %vm4757_vm0, %v6529_v22  ;;  %v989_v4 = vadd.f32 %v4945_v26, %v988_v23 }
 0x2f2   :  { %3688 = vmatprep.subr.bf16.mxu0 %v6529_v22 }
 0x2f5   :  { %3689 = vmatpush3.bf16.msra.mxu0 %v4870_v5  ;;  %v994_v5 = vmax.f32 %v989_v4, 0.0  ;;  %v1266_v4 = vpack.c.bf16 %v1265_v49, %v1265_v49  ;;  %v6555_v49 = vld [vmem:[#allocation32_spill] sm:$0xff] }
 0x2f6   :  { %3690 = vmatprep.subr.bf16.mxu0 %v6529_v22 }
 0x2f9   :  { %3691 = vmatpush3.bf16.msra.mxu0 %v4874_v6  ;;  %v995_v6 = vpack.c.bf16 %v994_v5, %v994_v5  ;;  %v6539_v5 = vld [vmem:[#allocation45_spill] sm:$0xff] }
 0x2fa   :  { %3692 = vmatprep.subr.bf16.mxu0 %v6529_v22 }
 0x2fd   :  { %3693 = vmatpush3.bf16.msra.mxu0 %v4878_v7  ;;  %v5214_v7 = vld [vmem:[%s6366_s11] ss:$0 sm:$0xff] }
 0x2fe   :  { %3694 = vmatprep.subr.bf16.mxu0 %v6529_v22 }
 0x301   :  { %3695 = vmatpush3.bf16.msra.mxu0 %v4882_v8 }
 0x302   :  { %3696 = vmatprep.subr.bf16.mxu0 %v6529_v22 }
 0x305   :  { %3697 = vmatpush3.bf16.msra.mxu0 %v4886_v9 }
 0x306   :  { %3698 = vmatprep.subr.bf16.mxu0 %v6529_v22 }
 0x309   :  { %3699 = vmatpush3.bf16.msra.mxu0 %v4892_v10 }
 0x30a   :  { %3700 = vmatprep.subr.bf16.mxu0 %v6529_v22 }
 0x30d   :  { %3701 = vmatpush3.bf16.msra.mxu0 %v4896_v11 }
 0x30e   :  { %3706 = vmatprep.subr.bf16.mxu0 %v6529_v22 }
 0x310   :  { %3703 = vmatmul.mubr.bf16.vlgmr.msra.gmra.mxu0 %v995_v6  ;;  %v6541_v6 = vld [vmem:[#allocation46_spill] sm:$0xff] }
 0x311   :  { %3707 = vmatpush3.bf16.msra.mxu0 %v4948_v32  ;;  %3722 = vmatprep.mubr.msk.bf16.mxu0 %vm4757_vm0, %v6529_v22 }
 0x312   :  { %3708 = vmatprep.subr.bf16.mxu0 %v6529_v22 }
 0x315   :  { %3709 = vmatpush3.bf16.msra.mxu0 %v4951_v35 }
 0x316   :  { %3710 = vmatprep.subr.bf16.mxu0 %v6529_v22 }
 0x319   :  { %3711 = vmatpush3.bf16.msra.mxu0 %v4957_v36 }
 0x31a   :  { %3712 = vmatprep.subr.bf16.mxu0 %v6529_v22 }
 0x31d   :  { %3713 = vmatpush3.bf16.msra.mxu0 %v4961_v37 }
 0x31e   :  { %3714 = vmatprep.subr.bf16.mxu0 %v6529_v22 }
 0x321   :  { %3715 = vmatpush3.bf16.msra.mxu0 %v4965_v38 }
 0x322   :  { %3716 = vmatprep.subr.bf16.mxu0 %v6529_v22 }
 0x325   :  { %3717 = vmatpush3.bf16.msra.mxu0 %v4969_v39 }
 0x326   :  { %3718 = vmatprep.subr.bf16.mxu0 %v6529_v22 }
 0x329   :  { %3719 = vmatpush3.bf16.msra.mxu0 %v4974_v40 }
 0x32a   :  { %3720 = vmatprep.subr.bf16.mxu0 %v6529_v22 }
 0x32d   :  { %3721 = vmatpush3.bf16.msra.mxu0 %v4983_v43 }
 0x32e   :  { %3726 = vmatprep.subr.bf16.mxu0 %v6529_v22 }
 0x3b0   :  { %v941_v8 = vpop.f32.mrf.mxu0 }
 0x3b1   :  { %v942_v50 = vadd.f32 %v5214_v7, %v941_v8  ;;  %v6542_v8 = vld [vmem:[#allocation23_spill] sm:$0xff] }
 0x3b2   :  { %v3678_v41 = vpop.f32.mrf.mxu0 }
 0x3b3   :  { %947 = vst [vmem:[#allocation12] sm:$0xff] %v942_v50  ;;  %v6543_v50 = vld [vmem:[#allocation24_spill] sm:$0xff]  ;;  %v6544_v41 = vld [vmem:[#allocation47_spill] sm:$0xff] }
 0x3b4   :  { %v944_v17 = vpop.f32.mrf.mxu0 }
 0x3b5   :  { %v6545_v17 = vld [vmem:[#allocation25_spill] sm:$0xff] }
 0x3b6   :  { %v3679_v42 = vpop.f32.mrf.mxu0 }
 0x3b7   :  { %v6546_v42 = vld [vmem:[#allocation26_spill] sm:$0xff] }
 0x3d0   :  { %v1030_v23 = vpop.f32.mrf.mxu0 }
 0x3d1   :  { %v1031_v19 = vadd.f32 %v4995_v46, %v1030_v23  ;;  %v6547_v23 = vld [vmem:[#allocation48_spill] sm:$0xff] }
 0x3d2   :  { %v3704_v56 = vpop.f32.mrf.mxu0 }
 0x3d3   :  { %v1036_v20 = vmax.f32 %v1031_v19, 0.0  ;;  %v6548_v19 = vld [vmem:[#allocation27_spill] sm:$0xff]  ;;  %v6549_v56 = vld [vmem:[#allocation28_spill] sm:$0xff] }
 0x3d4   :  { %v1033_v12 = vpop.f32.mrf.mxu0 }
 0x3d5   :  { %v1037_v54 = vpack.c.bf16 %v1036_v20, %v1036_v20  ;;  %v6550_v20 = vld [vmem:[#allocation49_spill] sm:$0xff] }
 0x3d6   :  { %v3705_v48 = vpop.f32.mrf.mxu0  ;;  %v6551_v12 = vld [vmem:[#allocation29_spill] sm:$0xff] }
 0x3d7   :  { %1071 = vmatmul.mubr.bf16.vlgmr.msra.gmra.mxu1 %v1037_v54  ;;  %3723 = vmatmul.mubr.bf16.vlgmr.msra.gmra.mxu0 %v1037_v54  ;;  %v6552_v54 = vld [vmem:[#allocation30_spill] sm:$0xff] }
 0x3d8   :  { %1120 = vmatpush1.bf16.msra.mxu1 %v4998_v52  ;;  %3727 = vmatpush3.bf16.msra.mxu0 %v5000_v53  ;;  %v6553_v48 = vld [vmem:[#allocation50_spill] sm:$0xff] }
 0x3d9   :  { %1121 = vmatprep.subr.bf16.mxu1 %v5002_v55  ;;  %3728 = vmatprep.subr.bf16.mxu0 %v6529_v22 }
 0x3da   :  { %1151 = vmatprep.mubr.bf16.mxu1 %v6518_v51  ;;  %3742 = vmatprep.mubr.msk.bf16.mxu0 %vm4757_vm0, %v6529_v22 }
 0x3dc   :  { %1122 = vmatpush1.bf16.msra.mxu1 %v5005_v57  ;;  %3729 = vmatpush3.bf16.msra.mxu0 %v5008_v58 }
 0x3dd   :  { %1123 = vmatprep.subr.bf16.mxu1 %v5011_v59  ;;  %3730 = vmatprep.subr.bf16.mxu0 %v6529_v22 }
 0x3e0   :  { %1124 = vmatpush1.bf16.msra.mxu1 %v5018_v60  ;;  %3731 = vmatpush3.bf16.msra.mxu0 %v5021_v61 }
 0x3e1   :  { %1125 = vmatprep.subr.bf16.mxu1 %v5024_v62  ;;  %3732 = vmatprep.subr.bf16.mxu0 %v6529_v22 }
 0x3e4   :  { %1126 = vmatpush1.bf16.msra.mxu1 %v5028_v63  ;;  %3733 = vmatpush3.bf16.msra.mxu0 %v5031_v2 }
 0x3e5   :  { %1127 = vmatprep.subr.bf16.mxu1 %v5034_v3  ;;  %3734 = vmatprep.subr.bf16.mxu0 %v6529_v22 }
 0x3e8   :  { %1128 = vmatpush1.bf16.msra.mxu1 %v5038_v27  ;;  %3735 = vmatpush3.bf16.msra.mxu0 %v5041_v28 }
 0x3e9   :  { %1129 = vmatprep.subr.bf16.mxu1 %v5044_v29  ;;  %3736 = vmatprep.subr.bf16.mxu0 %v6529_v22 }
 0x3ec   :  { %1130 = vmatpush1.bf16.msra.mxu1 %v5048_v30  ;;  %3737 = vmatpush3.bf16.msra.mxu0 %v5051_v31 }
 0x3ed   :  { %1131 = vmatprep.subr.bf16.mxu1 %v6530_v21  ;;  %3738 = vmatprep.subr.bf16.mxu0 %v6529_v22 }
 0x3f0   :  { %1132 = vmatpush1.bf16.msra.mxu1 %v6531_v1  ;;  %3739 = vmatpush3.bf16.msra.mxu0 %v6532_v47 }
 0x3f1   :  { %1133 = vmatprep.subr.bf16.mxu1 %v6533_v15  ;;  %3740 = vmatprep.subr.bf16.mxu0 %v6529_v22 }
 0x3f4   :  { %1134 = vmatpush1.bf16.msra.mxu1 %v6534_v0  ;;  %3741 = vmatpush3.bf16.msra.mxu0 %v6535_v33 }
 0x3f5   :  { %3766 = vmatprep.subr.bf16.mxu0 %v6529_v22  ;;  %3746 = vmatprep.subr.bf16.mxu1 %v6529_v22 }
 0x3f7   :  { %1152 = vmatmul.mubr.bf16.vlgmr.msra.gmra.mxu1 %v5171_v25  ;;  %3743 = vmatmul.mubr.bf16.vlgmr.msra.gmra.mxu0 %v5171_v25  ;;  %v6540_v25 = vld [vmem:[#allocation22_spill] sm:$0xff] }
 0x3f8   :  { %3767 = vmatpush3.bf16.msra.mxu0 %v6536_v34  ;;  %3768 = vmatprep.mubr.msk.bf16.mxu0 %vm4757_vm0, %v6529_v22  ;;  %v6554_v34 = vld [vmem:[#allocation31_spill] sm:$0xff] }
 0x3f9   :  { %3747 = vmatpush3.bf16.msra.mxu1 %v6537_v18  ;;  %3762 = vmatprep.mubr.msk.bf16.mxu1 %vm4757_vm0, %v6529_v22 }
 0x3fa   :  { %3748 = vmatprep.subr.bf16.mxu1 %v6529_v22  ;;  %1354 = vmatprep.subr.bf16.mxu0 %v6538_v16  ;;  %v6556_v16 = vld [vmem:[#allocation51_spill] sm:$0xff] }
 0x3fd   :  { %3749 = vmatpush3.bf16.msra.mxu1 %v6539_v5 }
 0x3fe   :  { %3750 = vmatprep.subr.bf16.mxu1 %v6529_v22 }
 0x3ff   :  { %3769 = vmatmul.mubr.msk.bf16.vlgmr.msra.gmra.mxu0 %vm238_vm1, %v1266_v4  ;;  %v6557_v4 = vld [vmem:[#allocation33_spill] sm:$0xff] }
 0x400   :  { %1355 = vmatpush1.bf16.msra.mxu0 %v6540_v25  ;;  %1386 = vmatprep.mubr.bf16.mxu0 %v6518_v51  ;;  %v6558_v25 = vld [vmem:[#allocation34_spill] sm:$0xff] }
 0x401   :  { %3751 = vmatpush3.bf16.msra.mxu1 %v6541_v6  ;;  %1356 = vmatprep.subr.bf16.mxu0 %v6542_v8  ;;  %v6559_v8 = vld [vmem:[#allocation35_spill] sm:$0xff] }
 0x402   :  { %3752 = vmatprep.subr.bf16.mxu1 %v6529_v22 }
 0x404   :  { %1357 = vmatpush1.bf16.msra.mxu0 %v6543_v50  ;;  %v6560_v50 = vld [vmem:[#allocation36_spill] sm:$0xff] }
 0x405   :  { %3753 = vmatpush3.bf16.msra.mxu1 %v6544_v41  ;;  %1358 = vmatprep.subr.bf16.mxu0 %v6545_v17  ;;  %v6561_v17 = vld [vmem:[#allocation37_spill] sm:$0xff] }
 0x406   :  { %3754 = vmatprep.subr.bf16.mxu1 %v6529_v22  ;;  %v6563_v41 = vld [vmem:[#allocation53_spill] sm:$0xff] }
 0x408   :  { %1359 = vmatpush1.bf16.msra.mxu0 %v6546_v42 }
 0x409   :  { %3755 = vmatpush3.bf16.msra.mxu1 %v6547_v23  ;;  %1360 = vmatprep.subr.bf16.mxu0 %v6548_v19 }
 0x40a   :  { %3756 = vmatprep.subr.bf16.mxu1 %v6529_v22 }
 0x40c   :  { %1361 = vmatpush1.bf16.msra.mxu0 %v6549_v56 }
 0x40d   :  { %3757 = vmatpush3.bf16.msra.mxu1 %v6550_v20  ;;  %1362 = vmatprep.subr.bf16.mxu0 %v6551_v12  ;;  %v6562_v20 = vld [vmem:[#allocation52_spill] sm:$0xff] }
 0x40e   :  { %3758 = vmatprep.subr.bf16.mxu1 %v6529_v22 }
 0x410   :  { %1363 = vmatpush1.bf16.msra.mxu0 %v6552_v54 }
 0x411   :  { %3759 = vmatpush3.bf16.msra.mxu1 %v6553_v48  ;;  %1364 = vmatprep.subr.bf16.mxu0 %v6554_v34 }
 0x412   :  { %3760 = vmatprep.subr.bf16.mxu1 %v6529_v22 }
 0x414   :  { %1365 = vmatpush1.bf16.msra.mxu0 %v6555_v49 }
 0x415   :  { %3761 = vmatpush3.bf16.msra.mxu1 %v6556_v16  ;;  %1366 = vmatprep.subr.bf16.mxu0 %v6557_v4 }
 0x416   :  { %3772 = vmatprep.subr.bf16.mxu1 %v6529_v22 }
 0x418   :  { %1367 = vmatpush1.bf16.msra.mxu0 %v6558_v25 }
 0x419   :  { %1368 = vmatprep.subr.bf16.mxu0 %v6559_v8 }
 0x41c   :  { %1369 = vmatpush1.bf16.msra.mxu0 %v6560_v50 }
 0x41d   :  { %1435 = vmatprep.subr.bf16.mxu0 %v6561_v17 }
 0x497   :  { %v1072_v42 = vpop.f32.mrf.mxu1  ;;  %v1113_v19 = vpop.f32.mrf.mxu0 }
 0x498   :  { %v1073_v23 = vadd.f32 %v1072_v42, %v6562_v20 }
 0x499   :  { %v1074_v56 = vpop.f32.mrf.mxu1  ;;  %v3724_v12 = vpop.f32.mrf.mxu0 }
 0x49b   :  { %v1076_v54 = vpop.f32.mrf.mxu1  ;;  %v1116_v34 = vpop.f32.mrf.mxu0 }
 0x49c   :  { %v1075_v54 = vadd.f32 %v1074_v56, %v5156_v13 }
 0x49d   :  { %v1077_v49 = vpop.f32.mrf.mxu1  ;;  %v3725_v16 = vpop.f32.mrf.mxu0 }
 0x4b7   :  { %v1153_v48 = vpop.f32.mrf.mxu1  ;;  %v1194_v4 = vpop.f32.mrf.mxu0 }
 0x4b8   :  { %v1154_v25 = vadd.f32 %v1153_v48, %v6563_v41 }
 0x4b9   :  { %v1155_v6 = vpop.f32.mrf.mxu1  ;;  %v3744_v8 = vpop.f32.mrf.mxu0 }
 0x4ba   :  { %v1200_v5 = vadd.f32 %v1154_v25, %v1073_v23  ;;  %v1156_v33 = vadd.f32 %v1155_v6, %v5154_v44 }
 0x4bb   :  { %v1157_v50 = vpop.f32.mrf.mxu1  ;;  %v1197_v18 = vpop.f32.mrf.mxu0 }
 0x4bc   :  { %v3270_v17 = vmul.f32 -1.442695, %v1200_v5  ;;  %v1207_v34 = vadd.f32 %v1156_v33, %v1075_v54  ;;  %v1195_v5 = vadd.f32 %v1194_v4, %v5160_v45  ;;  %v5309_v4 = vld [vmem:[#allocation6 + $0x38] sm:$0xff]  }
 0x4bd   :  { %v1158_v0 = vpop.f32.mrf.mxu1  ;;  %v3745_v12 = vpop.f32.mrf.mxu0 }
 0x4be   :  { %4389 = vpow2.f32 %v3270_v17  ;;  %v3271_v42 = vmul.f32 -1.442695, %v1207_v34  ;;  %v1114_v0 = vadd.f32 %v1113_v19, %v5162_v14  ;;  %v5315_v19 = vld [vmem:[#allocation6 + $0x30] sm:$0xff]   ;;  %v5323_v34 = vld [vmem:[#allocation6 + $0x20] sm:$0xff]  }
 0x4bf   :  { %v1304_v16 = vpop.f32.mrf.mxu0 }
 0x4c0   :  { %4391 = vpow2.f32 %v3271_v42  ;;  %v1305_v42 = vadd.f32 %v4945_v26, %v1304_v16 }
 0x4c1   :  { %v3770_v49 = vpop.f32.mrf.mxu0 }
 0x4c2   :  { %v5327_v49 = vld [vmem:[#allocation6 + $0x18] sm:$0xff]  }
 0x4c3   :  { %v1307_v15 = vpop.f32.mrf.mxu0 }
 0x4c5   :  { %v3771_v20 = vpop.f32.mrf.mxu0 }
 0x4cb   :  { %v4390_v48 = vpop.eup %4389 }
 0x4cc   :  { %v1204_v8 = vadd.f32 1.0, %v4390_v48  ;;  %v1310_v48 = vmax.f32 %v1305_v42, 0.0 }
 0x4cd   :  { %v4392_v23 = vpop.eup %4391 }
 0x4ce   :  { %4393 = vrcp.f32 %v1204_v8  ;;  %v1211_v18 = vadd.f32 1.0, %v4392_v23  ;;  %v1311_v8 = vpack.c.bf16 %v1310_v48, %v1310_v48  ;;  %v6584_v23 = vld [vmem:[#allocation50_spill] sm:$0xff] }
 0x4d0   :  { %4395 = vrcp.f32 %v1211_v18  ;;  %v5450_v18 = vld [vmem:[#allocation8 + $0x34] ss:$12 sps:$4 sm:$0xff]  }
 0x4d1   :  { %6585 = vst [vmem:[#allocation28_spill] sm:$0xff] %v5450_v18 }
 0x4db   :  { %v4394_v6 = vpop.eup %4393 }
 0x4dc   :  { %v1214_v50 = vmul.f32 %v4394_v6, %v1195_v5  ;;  %v5454_v5 = vld [vmem:[#allocation8 + $0x30] ss:$12 sps:$4 sm:$0xff]   ;;  %v6587_v6 = vld [vmem:[#allocation51_spill] sm:$0xff] }
 0x4dd   :  { %v4396_v33 = vpop.eup %4395  ;;  %6586 = vst [vmem:[#allocation29_spill] sm:$0xff] %v5454_v5 }
 0x4de   :  { %v1215_v17 = vadd.f32 %v1214_v50, %v1114_v0  ;;  %v1217_v56 = vsub.f32 1.0, %v4396_v33  ;;  %v1219_v20 = vmul.f32 %v4396_v33, %v5167_v24  ;;  %v5319_v24 = vld [vmem:[#allocation6 + $0x28] sm:$0xff]   ;;  %v5462_v50 = vld [vmem:[#allocation8 + $0x18] ss:$12 sps:$4 sm:$0xff]  }
 0x4df   :  { %v5458_v0 = vld [vmem:[#allocation8 + $0x1c] ss:$12 sps:$4 sm:$0xff]   ;;  %6589 = vst [vmem:[#allocation31_spill] sm:$0xff] %v5462_v50 }
 0x4e0   :  { %4397 = vtanh.f32 %v1215_v17  ;;  %6588 = vst [vmem:[#allocation30_spill] sm:$0xff] %v5458_v0  ;;  %v6590_v17 = vld [vmem:[#allocation35_spill] sm:$0xff]  ;;  %v6591_v33 = vld [vmem:[#allocation36_spill] sm:$0xff] }
 0x4ed   :  { %v4398_v15 = vpop.eup %4397 }
 0x4ee   :  { %v1218_v25 = vmul.f32 %v4398_v15, %v1217_v56  ;;  %v6592_v56 = vld [vmem:[#allocation37_spill] sm:$0xff] }
 0x4f0   :  { %v5302_v12 = vadd.f32 %v1219_v20, %v1218_v25 }
 0x4f2   :  { %v5306_v54 = vpack.c.bf16 %v5302_v12, %v5302_v12 }
 0x4f4   :  { %3763 = vmatmul.mubr.bf16.vlgmr.msra.gmra.mxu1 %v5306_v54 }
 0x4f5   :  { %3773 = vmatpush3.bf16.msra.mxu1 %v5309_v4  ;;  %3788 = vmatprep.mubr.msk.bf16.mxu1 %vm4757_vm0, %v6529_v22 }
 0x4f6   :  { %3774 = vmatprep.subr.bf16.mxu1 %v6529_v22 }
 0x4f9   :  { %3775 = vmatpush3.bf16.msra.mxu1 %v5315_v19 }
 0x4fa   :  { %3776 = vmatprep.subr.bf16.mxu1 %v6529_v22 }
 0x4fd   :  { %3777 = vmatpush3.bf16.msra.mxu1 %v5319_v24 }
 0x4fe   :  { %3778 = vmatprep.subr.bf16.mxu1 %v6529_v22 }
 0x501   :  { %3779 = vmatpush3.bf16.msra.mxu1 %v5323_v34 }
 0x502   :  { %3780 = vmatprep.subr.bf16.mxu1 %v6529_v22 }
 0x505   :  { %3781 = vmatpush3.bf16.msra.mxu1 %v5327_v49 }
 0x506   :  { %3782 = vmatprep.subr.bf16.mxu1 %v6529_v22 }
 0x509   :  { %3783 = vmatpush3.bf16.msra.mxu1 %v4886_v9 }
 0x50a   :  { %3784 = vmatprep.subr.bf16.mxu1 %v6529_v22 }
 0x50d   :  { %3785 = vmatpush3.bf16.msra.mxu1 %v4892_v10 }
 0x50e   :  { %3786 = vmatprep.subr.bf16.mxu1 %v6529_v22 }
 0x511   :  { %3787 = vmatpush3.bf16.msra.mxu1 %v4896_v11 }
 0x512   :  { %3792 = vmatprep.subr.bf16.mxu1 %v6529_v22 }
 0x514   :  { %3789 = vmatmul.mubr.bf16.vlgmr.msra.gmra.mxu1 %v1311_v8 }
 0x515   :  { %3793 = vmatpush3.bf16.msra.mxu1 %v4948_v32  ;;  %3808 = vmatprep.mubr.msk.bf16.mxu1 %vm4757_vm0, %v6529_v22 }
 0x516   :  { %3794 = vmatprep.subr.bf16.mxu1 %v6529_v22 }
 0x519   :  { %3795 = vmatpush3.bf16.msra.mxu1 %v4951_v35 }
 0x51a   :  { %3796 = vmatprep.subr.bf16.mxu1 %v6529_v22 }
 0x51d   :  { %3797 = vmatpush3.bf16.msra.mxu1 %v4957_v36 }
 0x51e   :  { %3798 = vmatprep.subr.bf16.mxu1 %v6529_v22 }
 0x521   :  { %3799 = vmatpush3.bf16.msra.mxu1 %v4961_v37 }
 0x522   :  { %3800 = vmatprep.subr.bf16.mxu1 %v6529_v22 }
 0x525   :  { %3801 = vmatpush3.bf16.msra.mxu1 %v4965_v38 }
 0x526   :  { %3802 = vmatprep.subr.bf16.mxu1 %v6529_v22 }
 0x529   :  { %3803 = vmatpush3.bf16.msra.mxu1 %v4969_v39 }
 0x52a   :  { %3804 = vmatprep.subr.bf16.mxu1 %v6529_v22 }
 0x52d   :  { %3805 = vmatpush3.bf16.msra.mxu1 %v4974_v40 }
 0x52e   :  { %3806 = vmatprep.subr.bf16.mxu1 %v6529_v22 }
 0x531   :  { %3807 = vmatpush3.bf16.msra.mxu1 %v4983_v43  ;;  %v6564_v43 = vld [vmem:[#allocation41_spill] sm:$0xff] }
 0x532   :  { %3812 = vmatprep.subr.bf16.mxu1 %v6529_v22 }
 0x5b4   :  { %v1256_v9 = vpop.f32.mrf.mxu1 }
 0x5b5   :  { %v1257_v10 = vadd.f32 %v5214_v7, %v1256_v9 }
 0x5b6   :  { %v3764_v11 = vpop.f32.mrf.mxu1 }
 0x5b7   :  { %1263 = vst [vmem:[#allocation12 + $0x8] sm:$0xff] %v1257_v10 }
 0x5b8   :  { %v1259_v26 = vpop.f32.mrf.mxu1 }
 0x5b9   :  { %v6593_v26 = vld [vmem:[#allocation52_spill] sm:$0xff] }
 0x5ba   :  { %v3765_v32 = vpop.f32.mrf.mxu1 }
 0x5d4   :  { %v1346_v35 = vpop.f32.mrf.mxu1 }
 0x5d5   :  { %v1347_v36 = vadd.f32 %v4995_v46, %v1346_v35  ;;  %v6565_v46 = vld [vmem:[#allocation42_spill] sm:$0xff] }
 0x5d6   :  { %v3790_v37 = vpop.f32.mrf.mxu1 }
 0x5d7   :  { %v1352_v38 = vmax.f32 %v1347_v36, 0.0 }
 0x5d8   :  { %v1349_v39 = vpop.f32.mrf.mxu1 }
 0x5d9   :  { %v1353_v40 = vpack.c.bf16 %v1352_v38, %v1352_v38 }
 0x5da   :  { %v3791_v16 = vpop.f32.mrf.mxu1 }
 0x5db   :  { %1387 = vmatmul.mubr.bf16.vlgmr.msra.gmra.mxu0 %v1353_v40  ;;  %3809 = vmatmul.mubr.bf16.vlgmr.msra.gmra.mxu1 %v1353_v40 }
 0x5dc   :  { %1436 = vmatpush1.bf16.msra.mxu0 %v4998_v52  ;;  %3813 = vmatpush3.bf16.msra.mxu1 %v5000_v53  ;;  %v6566_v52 = vld [vmem:[#allocation43_spill] sm:$0xff] }
 0x5dd   :  { %1437 = vmatprep.subr.bf16.mxu0 %v5002_v55  ;;  %3814 = vmatprep.subr.bf16.mxu1 %v6529_v22  ;;  %v5398_v53 = vld [vmem:[%s6357_s2] sm:$0xff]   ;;  %v1581_v55 = vld [vmem:[#allocation3 + $0x18] sm:$0xff] }
 0x5de   :  { %1467 = vmatprep.mubr.bf16.mxu0 %v6518_v51  ;;  %3828 = vmatprep.mubr.msk.bf16.mxu1 %vm4757_vm0, %v6529_v22  ;;  %6567 = vst [vmem:[#allocation38_spill] sm:$0xff] %v5398_v53 }
 0x5e0   :  { %1438 = vmatpush1.bf16.msra.mxu0 %v5005_v57  ;;  %3815 = vmatpush3.bf16.msra.mxu1 %v5008_v58  ;;  %v6568_v57 = vld [vmem:[#allocation44_spill] sm:$0xff] }
 0x5e1   :  { %1439 = vmatprep.subr.bf16.mxu0 %v5011_v59  ;;  %3816 = vmatprep.subr.bf16.mxu1 %v6529_v22  ;;  %v5407_v58 = vld [vmem:[#allocation8 + $0xac] ss:$12 sps:$4 sm:$0xff]   ;;  %v1582_v59 = vpack.c.bf16 %v1581_v55, %v1581_v55 }
 0x5e2   :  { %6569 = vst [vmem:[#allocation39_spill] sm:$0xff] %v5407_v58 }
 0x5e4   :  { %1440 = vmatpush1.bf16.msra.mxu0 %v5018_v60  ;;  %3817 = vmatpush3.bf16.msra.mxu1 %v5021_v61  ;;  %v6570_v60 = vld [vmem:[#allocation45_spill] sm:$0xff] }
 0x5e5   :  { %1441 = vmatprep.subr.bf16.mxu0 %v5024_v62  ;;  %3818 = vmatprep.subr.bf16.mxu1 %v6529_v22  ;;  %v5413_v61 = vld [vmem:[#allocation8 + $0xa8] ss:$12 sps:$4 sm:$0xff]   ;;  %v6572_v62 = vld [vmem:[#allocation46_spill] sm:$0xff] }
 0x5e6   :  { %6571 = vst [vmem:[#allocation40_spill] sm:$0xff] %v5413_v61 }
 0x5e8   :  { %1442 = vmatpush1.bf16.msra.mxu0 %v5028_v63  ;;  %3819 = vmatpush3.bf16.msra.mxu1 %v5031_v2  ;;  %v5418_v63 = vld [vmem:[#allocation8 + $0x94] ss:$12 sps:$4 sm:$0xff]   ;;  %v5422_v2 = vld [vmem:[#allocation8 + $0x90] ss:$12 sps:$4 sm:$0xff]  }
 0x5e9   :  { %1443 = vmatprep.subr.bf16.mxu0 %v5034_v3  ;;  %3820 = vmatprep.subr.bf16.mxu1 %v6529_v22  ;;  %6573 = vst [vmem:[#allocation20_spill] sm:$0xff] %v5418_v63  ;;  %6574 = vst [vmem:[#allocation21_spill] sm:$0xff] %v5422_v2  ;;  %v6575_v3 = vld [vmem:[#allocation47_spill] sm:$0xff] }
 0x5ec   :  { %1444 = vmatpush1.bf16.msra.mxu0 %v5038_v27  ;;  %3821 = vmatpush3.bf16.msra.mxu1 %v5041_v28  ;;  %v5426_v27 = vld [vmem:[#allocation8 + $0x7c] ss:$12 sps:$4 sm:$0xff]   ;;  %v5430_v28 = vld [vmem:[#allocation8 + $0x78] ss:$12 sps:$4 sm:$0xff]  }
 0x5ed   :  { %1445 = vmatprep.subr.bf16.mxu0 %v5044_v29  ;;  %3822 = vmatprep.subr.bf16.mxu1 %v6529_v22  ;;  %6576 = vst [vmem:[#allocation22_spill] sm:$0xff] %v5426_v27  ;;  %6577 = vst [vmem:[#allocation23_spill] sm:$0xff] %v5430_v28  ;;  %v6578_v29 = vld [vmem:[#allocation48_spill] sm:$0xff] }
 0x5f0   :  { %1446 = vmatpush1.bf16.msra.mxu0 %v5048_v30  ;;  %3823 = vmatpush3.bf16.msra.mxu1 %v5051_v31  ;;  %v5434_v30 = vld [vmem:[#allocation8 + $0x64] ss:$12 sps:$4 sm:$0xff]   ;;  %v5438_v31 = vld [vmem:[#allocation8 + $0x60] ss:$12 sps:$4 sm:$0xff]  }
 0x5f1   :  { %1447 = vmatprep.subr.bf16.mxu0 %v6530_v21  ;;  %3824 = vmatprep.subr.bf16.mxu1 %v6529_v22  ;;  %6579 = vst [vmem:[#allocation24_spill] sm:$0xff] %v5434_v30  ;;  %6580 = vst [vmem:[#allocation25_spill] sm:$0xff] %v5438_v31  ;;  %v6581_v21 = vld [vmem:[#allocation49_spill] sm:$0xff] }
 0x5f4   :  { %1448 = vmatpush1.bf16.msra.mxu0 %v6531_v1  ;;  %3825 = vmatpush3.bf16.msra.mxu1 %v6532_v47  ;;  %v5442_v1 = vld [vmem:[#allocation8 + $0x4c] ss:$12 sps:$4 sm:$0xff]   ;;  %v5446_v47 = vld [vmem:[#allocation8 + $0x48] ss:$12 sps:$4 sm:$0xff]  }
 0x5f5   :  { %1449 = vmatprep.subr.bf16.mxu0 %v6564_v43  ;;  %3826 = vmatprep.subr.bf16.mxu1 %v6529_v22  ;;  %6582 = vst [vmem:[#allocation26_spill] sm:$0xff] %v5442_v1  ;;  %6583 = vst [vmem:[#allocation27_spill] sm:$0xff] %v5446_v47 }
 0x5f8   :  { %1450 = vmatpush1.bf16.msra.mxu0 %v6565_v46  ;;  %3827 = vmatpush3.bf16.msra.mxu1 %v6566_v52 }
 0x5f9   :  { %3852 = vmatprep.subr.bf16.mxu1 %v6529_v22  ;;  %3832 = vmatprep.subr.bf16.mxu0 %v6529_v22 }
 0x5fb   :  { %1468 = vmatmul.mubr.bf16.vlgmr.msra.gmra.mxu0 %v5306_v54  ;;  %3829 = vmatmul.mubr.bf16.vlgmr.msra.gmra.mxu1 %v5306_v54 }
 0x5fc   :  { %3853 = vmatpush3.bf16.msra.mxu1 %v5398_v53  ;;  %3854 = vmatprep.mubr.msk.bf16.mxu1 %vm4757_vm0, %v6529_v22 }
 0x5fd   :  { %3833 = vmatpush3.bf16.msra.mxu0 %v6568_v57  ;;  %3848 = vmatprep.mubr.msk.bf16.mxu0 %vm4757_vm0, %v6529_v22 }
 0x5fe   :  { %3834 = vmatprep.subr.bf16.mxu0 %v6529_v22  ;;  %1670 = vmatprep.subr.bf16.mxu1 %v5407_v58 }
 0x601   :  { %3835 = vmatpush3.bf16.msra.mxu0 %v6570_v60 }
 0x602   :  { %3836 = vmatprep.subr.bf16.mxu0 %v6529_v22 }
 0x603   :  { %3855 = vmatmul.mubr.msk.bf16.vlgmr.msra.gmra.mxu1 %vm238_vm1, %v1582_v59 }
 0x604   :  { %1671 = vmatpush1.bf16.msra.mxu1 %v5413_v61  ;;  %1702 = vmatprep.mubr.bf16.mxu1 %v6518_v51 }
 0x605   :  { %3837 = vmatpush3.bf16.msra.mxu0 %v6572_v62  ;;  %1672 = vmatprep.subr.bf16.mxu1 %v5418_v63 }
 0x606   :  { %3838 = vmatprep.subr.bf16.mxu0 %v6529_v22 }
 0x608   :  { %1673 = vmatpush1.bf16.msra.mxu1 %v5422_v2 }
 0x609   :  { %3839 = vmatpush3.bf16.msra.mxu0 %v6575_v3  ;;  %1674 = vmatprep.subr.bf16.mxu1 %v5426_v27 }
 0x60a   :  { %3840 = vmatprep.subr.bf16.mxu0 %v6529_v22 }
 0x60c   :  { %1675 = vmatpush1.bf16.msra.mxu1 %v5430_v28 }
 0x60d   :  { %3841 = vmatpush3.bf16.msra.mxu0 %v6578_v29  ;;  %1676 = vmatprep.subr.bf16.mxu1 %v5434_v30 }
 0x60e   :  { %3842 = vmatprep.subr.bf16.mxu0 %v6529_v22 }
 0x610   :  { %1677 = vmatpush1.bf16.msra.mxu1 %v5438_v31 }
 0x611   :  { %3843 = vmatpush3.bf16.msra.mxu0 %v6581_v21  ;;  %1678 = vmatprep.subr.bf16.mxu1 %v5442_v1 }
 0x612   :  { %3844 = vmatprep.subr.bf16.mxu0 %v6529_v22 }
 0x614   :  { %1679 = vmatpush1.bf16.msra.mxu1 %v5446_v47 }
 0x615   :  { %3845 = vmatpush3.bf16.msra.mxu0 %v6584_v23  ;;  %1680 = vmatprep.subr.bf16.mxu1 %v5450_v18 }
 0x616   :  { %3846 = vmatprep.subr.bf16.mxu0 %v6529_v22 }
 0x618   :  { %1681 = vmatpush1.bf16.msra.mxu1 %v5454_v5 }
 0x619   :  { %3847 = vmatpush3.bf16.msra.mxu0 %v6587_v6  ;;  %1682 = vmatprep.subr.bf16.mxu1 %v5458_v0 }
 0x61a   :  { %3858 = vmatprep.subr.bf16.mxu0 %v6529_v22 }
 0x61c   :  { %1683 = vmatpush1.bf16.msra.mxu1 %v5462_v50 }
 0x61d   :  { %1684 = vmatprep.subr.bf16.mxu1 %v6590_v17 }
 0x620   :  { %1685 = vmatpush1.bf16.msra.mxu1 %v6591_v33 }
 0x621   :  { %1751 = vmatprep.subr.bf16.mxu1 %v6592_v56 }
 0x69b   :  { %v1388_v15 = vpop.f32.mrf.mxu0  ;;  %v1429_v25 = vpop.f32.mrf.mxu1 }
 0x69c   :  { %v1389_v32 = vadd.f32 %v1388_v15, %v6593_v26  ;;  %v1430_v15 = vadd.f32 %v1429_v25, %v5162_v14 }
 0x69d   :  { %v1390_v20 = vpop.f32.mrf.mxu0  ;;  %v3810_v54 = vpop.f32.mrf.mxu1 }
 0x69e   :  { %v1391_v55 = vadd.f32 %v1390_v20, %v5156_v13 }
 0x69f   :  { %v1392_v42 = vpop.f32.mrf.mxu0  ;;  %v1432_v48 = vpop.f32.mrf.mxu1 }
 0x6a1   :  { %v1393_v8 = vpop.f32.mrf.mxu0  ;;  %v3811_v9 = vpop.f32.mrf.mxu1 }
 0x6bb   :  { %v1469_v10 = vpop.f32.mrf.mxu0  ;;  %v1510_v11 = vpop.f32.mrf.mxu1 }
 0x6bc   :  { %v1470_v35 = vadd.f32 %v1469_v10, %v6563_v41  ;;  %v1511_v33 = vadd.f32 %v1510_v11, %v5160_v45  ;;  %v5500_v11 = vld [vmem:[#allocation6 + $0x10] sm:$0xff]  }
 0x6bd   :  { %v1471_v36 = vpop.f32.mrf.mxu0  ;;  %v3830_v37 = vpop.f32.mrf.mxu1 }
 0x6be   :  { %v1516_v38 = vadd.f32 %v1470_v35, %v1389_v32  ;;  %v1472_v43 = vadd.f32 %v1471_v36, %v5154_v44  ;;  %v5504_v37 = vld [vmem:[#allocation6 + $0x8] sm:$0xff]  }
 0x6bf   :  { %v1473_v39 = vpop.f32.mrf.mxu0  ;;  %v1513_v40 = vpop.f32.mrf.mxu1 }
 0x6c0   :  { %v3273_v16 = vmul.f32 -1.442695, %v1516_v38  ;;  %v1523_v59 = vadd.f32 %v1472_v43, %v1391_v55  ;;  %v5508_v39 = vld [vmem:[#allocation6] sm:$0xff]   ;;  %v5512_v40 = vld [vmem:[#allocation8 + $0xb0] ss:$12 sps:$4 sm:$0xff]  }
 0x6c1   :  { %v1474_v46 = vpop.f32.mrf.mxu0  ;;  %v3831_v52 = vpop.f32.mrf.mxu1  ;;  %v5522_v43 = vld [vmem:[#allocation8 + $0x80] ss:$12 sps:$4 sm:$0xff]   ;;  %v5534_v55 = vld [vmem:[#allocation8 + $0x38] ss:$12 sps:$4 sm:$0xff]  }
 0x6c2   :  { %4399 = vpow2.f32 %v3273_v16  ;;  %v3274_v3 = vmul.f32 -1.442695, %v1523_v59  ;;  %v5518_v16 = vld [vmem:[#allocation8 + $0x98] ss:$12 sps:$4 sm:$0xff]   ;;  %v5526_v46 = vld [vmem:[#allocation8 + $0x68] ss:$12 sps:$4 sm:$0xff]  }
 0x6c3   :  { %v1620_v57 = vpop.f32.mrf.mxu1  ;;  %v5530_v52 = vld [vmem:[#allocation8 + $0x50] ss:$12 sps:$4 sm:$0xff]   ;;  %v5542_v59 = vld [vmem:[#allocation8 + $0x8] ss:$12 sps:$4 sm:$0xff]  }
 0x6c4   :  { %4401 = vpow2.f32 %v3274_v3 }
 0x6c5   :  { %v3856_v60 = vpop.f32.mrf.mxu1 }
 0x6c7   :  { %v1623_v62 = vpop.f32.mrf.mxu1 }
 0x6c9   :  { %v3857_v29 = vpop.f32.mrf.mxu1 }
 0x6cf   :  { %v4400_v21 = vpop.eup %4399 }
 0x6d0   :  { %v1520_v23 = vadd.f32 1.0, %v4400_v21 }
 0x6d1   :  { %v4402_v6 = vpop.eup %4401 }
 0x6d2   :  { %4403 = vrcp.f32 %v1520_v23  ;;  %v1527_v17 = vadd.f32 1.0, %v4402_v6  ;;  %v5550_v6 = vld [vmem:[%s6360_s5] ss:$0 sm:$0xff] }
 0x6d4   :  { %4405 = vrcp.f32 %v1527_v17 }
 0x6df   :  { %v4404_v56 = vpop.eup %4403 }
 0x6e0   :  { %v1530_v54 = vmul.f32 %v4404_v56, %v1511_v33 }
 0x6e1   :  { %v4406_v42 = vpop.eup %4405 }
 0x6e2   :  { %v1531_v20 = vadd.f32 %v1530_v54, %v1430_v15  ;;  %v1533_v48 = vsub.f32 1.0, %v4406_v42  ;;  %v1535_v10 = vmul.f32 %v4406_v42, %v5302_v12  ;;  %v5497_v12 = vld [vmem:[%s6358_s3] ss:$0 sm:$0xff]  ;;  %v5556_v42 = vld [vmem:[#allocation9 + $0xb0] ss:$12 sps:$4 sm:$0xff]  }
 0x6e3   :  { %v1621_v25 = vadd.f32 %v5497_v12, %v1620_v57  ;;  %v5538_v57 = vld [vmem:[#allocation8 + $0x20] ss:$12 sps:$4 sm:$0xff]  }
 0x6e4   :  { %4407 = vtanh.f32 %v1531_v20 }
 0x6e5   :  { %v1626_v36 = vmax.f32 %v1621_v25, 0.0  ;;  %v5576_v25 = vld [vmem:[#allocation9 + $0x78] ss:$12 sps:$4 sm:$0xff]  }
 0x6e7   :  { %v1627_v38 = vpack.c.bf16 %v1626_v36, %v1626_v36  ;;  %v5579_v36 = vld [vmem:[#allocation9 + $0x80] ss:$12 sps:$4 sm:$0xff]  }
 0x6f1   :  { %v4408_v8 = vpop.eup %4407 }
 0x6f2   :  { %v1534_v9 = vmul.f32 %v4408_v8, %v1533_v48  ;;  %v5559_v48 = vld [vmem:[#allocation9 + $0x94] ss:$12 sps:$4 sm:$0xff]   ;;  %v5566_v8 = vld [vmem:[#allocation9 + $0x90] ss:$12 sps:$4 sm:$0xff]  }
 0x6f4   :  { %v5475_v32 = vadd.f32 %v1535_v10, %v1534_v9  ;;  %v5569_v9 = vld [vmem:[#allocation9 + $0x98] ss:$12 sps:$4 sm:$0xff]   ;;  %v5572_v10 = vld [vmem:[#allocation9 + $0x7c] ss:$12 sps:$4 sm:$0xff]  }
 0x6f6   :  { %v5479_v35 = vpack.c.bf16 %v5475_v32, %v5475_v32 }
 0x6f8   :  { %3849 = vmatmul.mubr.bf16.vlgmr.msra.gmra.mxu0 %v5479_v35 }
 0x6f9   :  { %3859 = vmatpush3.bf16.msra.mxu0 %v5309_v4  ;;  %3874 = vmatprep.mubr.msk.bf16.mxu0 %vm4757_vm0, %v6529_v22 }
 0x6fa   :  { %3860 = vmatprep.subr.bf16.mxu0 %v6529_v22 }
 0x6fd   :  { %3861 = vmatpush3.bf16.msra.mxu0 %v5315_v19 }
 0x6fe   :  { %3862 = vmatprep.subr.bf16.mxu0 %v6529_v22 }
 0x701   :  { %3863 = vmatpush3.bf16.msra.mxu0 %v5319_v24 }
 0x702   :  { %3864 = vmatprep.subr.bf16.mxu0 %v6529_v22 }
 0x705   :  { %3865 = vmatpush3.bf16.msra.mxu0 %v5323_v34 }
 0x706   :  { %3866 = vmatprep.subr.bf16.mxu0 %v6529_v22 }
 0x709   :  { %3867 = vmatpush3.bf16.msra.mxu0 %v5327_v49 }
 0x70a   :  { %3868 = vmatprep.subr.bf16.mxu0 %v6529_v22 }
 0x70d   :  { %3869 = vmatpush3.bf16.msra.mxu0 %v5500_v11 }
 0x70e   :  { %3870 = vmatprep.subr.bf16.mxu0 %v6529_v22 }
 0x711   :  { %3871 = vmatpush3.bf16.msra.mxu0 %v5504_v37 }
 0x712   :  { %3872 = vmatprep.subr.bf16.mxu0 %v6529_v22 }
 0x715   :  { %3873 = vmatpush3.bf16.msra.mxu0 %v5508_v39 }
 0x716   :  { %3878 = vmatprep.subr.bf16.mxu0 %v6529_v22 }
 0x718   :  { %3875 = vmatmul.mubr.bf16.vlgmr.msra.gmra.mxu0 %v1627_v38  ;;  %v5582_v38 = vld [vmem:[#allocation9 + $0x64] ss:$12 sps:$4 sm:$0xff]  }
 0x719   :  { %3879 = vmatpush3.bf16.msra.mxu0 %v5512_v40  ;;  %3894 = vmatprep.mubr.msk.bf16.mxu0 %vm4757_vm0, %v6529_v22 }
 0x71a   :  { %3880 = vmatprep.subr.bf16.mxu0 %v6529_v22 }
 0x71d   :  { %3881 = vmatpush3.bf16.msra.mxu0 %v5518_v16 }
 0x71e   :  { %3882 = vmatprep.subr.bf16.mxu0 %v6529_v22 }
 0x721   :  { %3883 = vmatpush3.bf16.msra.mxu0 %v5522_v43 }
 0x722   :  { %3884 = vmatprep.subr.bf16.mxu0 %v6529_v22 }
 0x725   :  { %3885 = vmatpush3.bf16.msra.mxu0 %v5526_v46 }
 0x726   :  { %3886 = vmatprep.subr.bf16.mxu0 %v6529_v22 }
 0x729   :  { %3887 = vmatpush3.bf16.msra.mxu0 %v5530_v52 }
 0x72a   :  { %3888 = vmatprep.subr.bf16.mxu0 %v6529_v22 }
 0x72d   :  { %3889 = vmatpush3.bf16.msra.mxu0 %v5534_v55 }
 0x72e   :  { %3890 = vmatprep.subr.bf16.mxu0 %v6529_v22 }
 0x731   :  { %3891 = vmatpush3.bf16.msra.mxu0 %v5538_v57 }
 0x732   :  { %3892 = vmatprep.subr.bf16.mxu0 %v6529_v22 }
 0x735   :  { %3893 = vmatpush3.bf16.msra.mxu0 %v5542_v59 }
 0x736   :  { %3898 = vmatprep.subr.bf16.mxu0 %v6529_v22 }
 0x7b8   :  { %v1572_v60 = vpop.f32.mrf.mxu0 }
 0x7b9   :  { %v1573_v62 = vadd.f32 %v5214_v7, %v1572_v60  ;;  %v5553_v7 = vld [vmem:[#allocation9 + $0xa8] ss:$12 sps:$4 sm:$0xff]   ;;  %v5586_v60 = vld [vmem:[#allocation9 + $0x60] ss:$12 sps:$4 sm:$0xff]  }
 0x7ba   :  { %v3850_v3 = vpop.f32.mrf.mxu0 }
 0x7bb   :  { %1579 = vst [vmem:[#allocation12 + $0x10] sm:$0xff] %v1573_v62  ;;  %v5589_v62 = vld [vmem:[#allocation9 + $0x68] ss:$12 sps:$4 sm:$0xff]   ;;  %v5592_v3 = vld [vmem:[#allocation9 + $0x4c] ss:$12 sps:$4 sm:$0xff]  }
 0x7bc   :  { %v1575_v29 = vpop.f32.mrf.mxu0 }
 0x7bd   :  { %v5596_v29 = vld [vmem:[#allocation9 + $0x48] ss:$12 sps:$4 sm:$0xff]  }
 0x7be   :  { %v3851_v21 = vpop.f32.mrf.mxu0 }
 0x7bf   :  { %v5599_v21 = vld [vmem:[#allocation9 + $0x50] ss:$12 sps:$4 sm:$0xff]  }
 0x7d8   :  { %v1662_v23 = vpop.f32.mrf.mxu0 }
 0x7d9   :  { %v1663_v17 = vadd.f32 %v5550_v6, %v1662_v23  ;;  %v5602_v23 = vld [vmem:[#allocation9 + $0x34] ss:$12 sps:$4 sm:$0xff]  }
 0x7da   :  { %v3876_v33 = vpop.f32.mrf.mxu0 }
 0x7db   :  { %v1668_v56 = vmax.f32 %v1663_v17, 0.0  ;;  %v5606_v17 = vld [vmem:[#allocation9 + $0x30] ss:$12 sps:$4 sm:$0xff]   ;;  %v5609_v33 = vld [vmem:[#allocation9 + $0x38] ss:$12 sps:$4 sm:$0xff]  }
 0x7dc   :  { %v1665_v15 = vpop.f32.mrf.mxu0  ;;  %6594 = vst [vmem:[#allocation32_spill] sm:$0xff] %v5609_v33 }
 0x7dd   :  { %v1669_v54 = vpack.c.bf16 %v1668_v56, %v1668_v56  ;;  %v5612_v56 = vld [vmem:[#allocation9 + $0x1c] ss:$12 sps:$4 sm:$0xff]   ;;  %v5616_v15 = vld [vmem:[#allocation9 + $0x18] ss:$12 sps:$4 sm:$0xff]  }
 0x7de   :  { %v3877_v20 = vpop.f32.mrf.mxu0  ;;  %6595 = vst [vmem:[#allocation33_spill] sm:$0xff] %v5612_v56  ;;  %6596 = vst [vmem:[#allocation34_spill] sm:$0xff] %v5616_v15 }
 0x7df   :  { %1703 = vmatmul.mubr.bf16.vlgmr.msra.gmra.mxu1 %v1669_v54  ;;  %3895 = vmatmul.mubr.bf16.vlgmr.msra.gmra.mxu0 %v1669_v54  ;;  %v5619_v54 = vld [vmem:[#allocation9 + $0x20] ss:$12 sps:$4 sm:$0xff]   ;;  %v5622_v20 = vld [vmem:[#allocation9 + $0x4] ss:$12 sps:$4 sm:$0xff]  }
 0x7e0   :  { %1752 = vmatpush1.bf16.msra.mxu1 %v5553_v7  ;;  %3899 = vmatpush3.bf16.msra.mxu0 %v5556_v42  ;;  %6597 = vst [vmem:[#allocation53_spill] sm:$0xff] %v5619_v54  ;;  %6598 = vst [vmem:[#allocation41_spill] sm:$0xff] %v5622_v20 }
 0x7e1   :  { %1753 = vmatprep.subr.bf16.mxu1 %v5559_v48  ;;  %3900 = vmatprep.subr.bf16.mxu0 %v6529_v22 }
 0x7e2   :  { %1783 = vmatprep.mubr.bf16.mxu1 %v6518_v51  ;;  %3914 = vmatprep.mubr.msk.bf16.mxu0 %vm4757_vm0, %v6529_v22 }
 0x7e4   :  { %1754 = vmatpush1.bf16.msra.mxu1 %v5566_v8  ;;  %3901 = vmatpush3.bf16.msra.mxu0 %v5569_v9 }
 0x7e5   :  { %1755 = vmatprep.subr.bf16.mxu1 %v5572_v10  ;;  %3902 = vmatprep.subr.bf16.mxu0 %v6529_v22 }
 0x7e8   :  { %1756 = vmatpush1.bf16.msra.mxu1 %v5576_v25  ;;  %3903 = vmatpush3.bf16.msra.mxu0 %v5579_v36 }
 0x7e9   :  { %1757 = vmatprep.subr.bf16.mxu1 %v5582_v38  ;;  %3904 = vmatprep.subr.bf16.mxu0 %v6529_v22 }
 0x7ec   :  { %1758 = vmatpush1.bf16.msra.mxu1 %v5586_v60  ;;  %3905 = vmatpush3.bf16.msra.mxu0 %v5589_v62 }
 0x7ed   :  { %1759 = vmatprep.subr.bf16.mxu1 %v5592_v3  ;;  %3906 = vmatprep.subr.bf16.mxu0 %v6529_v22 }
 0x7f0   :  { %1760 = vmatpush1.bf16.msra.mxu1 %v5596_v29  ;;  %3907 = vmatpush3.bf16.msra.mxu0 %v5599_v21 }
 0x7f1   :  { %1761 = vmatprep.subr.bf16.mxu1 %v5602_v23  ;;  %3908 = vmatprep.subr.bf16.mxu0 %v6529_v22 }
 0x7f4   :  { %1762 = vmatpush1.bf16.msra.mxu1 %v5606_v17  ;;  %3909 = vmatpush3.bf16.msra.mxu0 %v5609_v33  ;;  %v5626_v33 = vld [vmem:[#allocation9] ss:$12 sps:$4 sm:$0xff]  }
 0x7f5   :  { %1763 = vmatprep.subr.bf16.mxu1 %v5612_v56  ;;  %3910 = vmatprep.subr.bf16.mxu0 %v6529_v22  ;;  %6599 = vst [vmem:[#allocation42_spill] sm:$0xff] %v5626_v33  ;;  %v5629_v56 = vld [vmem:[#allocation9 + $0x8] ss:$12 sps:$4 sm:$0xff]  }
 0x7f6   :  { %6600 = vst [vmem:[#allocation43_spill] sm:$0xff] %v5629_v56 }
 0x7f8   :  { %1764 = vmatpush1.bf16.msra.mxu1 %v5616_v15  ;;  %3911 = vmatpush3.bf16.msra.mxu0 %v5619_v54  ;;  %v5639_v54 = vld [vmem:[#allocation11 + $0x38] sm:$0xff]  }
 0x7f9   :  { %1765 = vmatprep.subr.bf16.mxu1 %v5622_v20  ;;  %3912 = vmatprep.subr.bf16.mxu0 %v6529_v22  ;;  %v1897_v20 = vld [vmem:[#allocation3 + $0x20] sm:$0xff]  ;;  %6601 = vst [vmem:[#allocation44_spill] sm:$0xff] %v5639_v54 }
 0x7fc   :  { %1766 = vmatpush1.bf16.msra.mxu1 %v5626_v33  ;;  %3913 = vmatpush3.bf16.msra.mxu0 %v5629_v56  ;;  %v1898_v56 = vpack.c.bf16 %v1897_v20, %v1897_v20  ;;  %v5646_v33 = vld [vmem:[#allocation11 + $0x30] sm:$0xff]   ;;  %v5659_v20 = vld [vmem:[#allocation11 + $0x20] sm:$0xff]  }
 0x7fd   :  { %3938 = vmatprep.subr.bf16.mxu0 %v6529_v22  ;;  %3918 = vmatprep.subr.bf16.mxu1 %v6529_v22  ;;  %6602 = vst [vmem:[#allocation45_spill] sm:$0xff] %v5646_v33  ;;  %6604 = vst [vmem:[#allocation47_spill] sm:$0xff] %v5659_v20 }
 0x7ff   :  { %1784 = vmatmul.mubr.bf16.vlgmr.msra.gmra.mxu1 %v5479_v35  ;;  %3915 = vmatmul.mubr.bf16.vlgmr.msra.gmra.mxu0 %v5479_v35  ;;  %v5653_v35 = vld [vmem:[#allocation11 + $0x28] sm:$0xff]  }
 0x800   :  { %3939 = vmatpush3.bf16.msra.mxu0 %v5398_v53  ;;  %3940 = vmatprep.mubr.msk.bf16.mxu0 %vm4757_vm0, %v6529_v22  ;;  %6603 = vst [vmem:[#allocation46_spill] sm:$0xff] %v5653_v35 }
 0x801   :  { %3919 = vmatpush3.bf16.msra.mxu1 %v5639_v54  ;;  %3934 = vmatprep.mubr.msk.bf16.mxu1 %vm4757_vm0, %v6529_v22 }
 0x802   :  { %3920 = vmatprep.subr.bf16.mxu1 %v6529_v22  ;;  %1986 = vmatprep.subr.bf16.mxu0 %v5407_v58 }
 0x805   :  { %3921 = vmatpush3.bf16.msra.mxu1 %v5646_v33 }
 0x806   :  { %3922 = vmatprep.subr.bf16.mxu1 %v6529_v22 }
 0x807   :  { %3941 = vmatmul.mubr.msk.bf16.vlgmr.msra.gmra.mxu0 %vm238_vm1, %v1898_v56  ;;  %v5665_v56 = vld [vmem:[#allocation11 + $0x18] sm:$0xff]  }
 0x808   :  { %1987 = vmatpush1.bf16.msra.mxu0 %v5413_v61  ;;  %2018 = vmatprep.mubr.bf16.mxu0 %v6518_v51  ;;  %6605 = vst [vmem:[#allocation48_spill] sm:$0xff] %v5665_v56 }
 0x809   :  { %3923 = vmatpush3.bf16.msra.mxu1 %v5653_v35  ;;  %1988 = vmatprep.subr.bf16.mxu0 %v5418_v63 }
 0x80a   :  { %3924 = vmatprep.subr.bf16.mxu1 %v6529_v22 }
 0x80c   :  { %1989 = vmatpush1.bf16.msra.mxu0 %v5422_v2  ;;  %v5671_v2 = vld [vmem:[#allocation11 + $0x10] sm:$0xff]  }
 0x80d   :  { %3925 = vmatpush3.bf16.msra.mxu1 %v5659_v20  ;;  %1990 = vmatprep.subr.bf16.mxu0 %v5426_v27  ;;  %6606 = vst [vmem:[#allocation49_spill] sm:$0xff] %v5671_v2 }
 0x80e   :  { %3926 = vmatprep.subr.bf16.mxu1 %v6529_v22 }
 0x810   :  { %1991 = vmatpush1.bf16.msra.mxu0 %v5430_v28  ;;  %v5677_v28 = vld [vmem:[#allocation11 + $0x8] sm:$0xff]  }
 0x811   :  { %3927 = vmatpush3.bf16.msra.mxu1 %v5665_v56  ;;  %1992 = vmatprep.subr.bf16.mxu0 %v5434_v30  ;;  %6607 = vst [vmem:[#allocation50_spill] sm:$0xff] %v5677_v28 }
 0x812   :  { %3928 = vmatprep.subr.bf16.mxu1 %v6529_v22 }
 0x814   :  { %1993 = vmatpush1.bf16.msra.mxu0 %v5438_v31  ;;  %v5683_v31 = vld [vmem:[#allocation11] sm:$0xff]  }
 0x815   :  { %3929 = vmatpush3.bf16.msra.mxu1 %v5671_v2  ;;  %1994 = vmatprep.subr.bf16.mxu0 %v5442_v1  ;;  %6608 = vst [vmem:[#allocation51_spill] sm:$0xff] %v5683_v31 }
 0x816   :  { %3930 = vmatprep.subr.bf16.mxu1 %v6529_v22 }
 0x818   :  { %1995 = vmatpush1.bf16.msra.mxu0 %v5446_v47  ;;  %v5689_v47 = vld [vmem:[#allocation8 + $0x4] ss:$12 sps:$4 sm:$0xff]  }
 0x819   :  { %3931 = vmatpush3.bf16.msra.mxu1 %v5677_v28  ;;  %1996 = vmatprep.subr.bf16.mxu0 %v5450_v18  ;;  %6609 = vst [vmem:[#allocation35_spill] sm:$0xff] %v5689_v47  ;;  %v5692_v28 = vld [vmem:[#allocation8] ss:$12 sps:$4 sm:$0xff]  }
 0x81a   :  { %3932 = vmatprep.subr.bf16.mxu1 %v6529_v22  ;;  %6610 = vst [vmem:[#allocation36_spill] sm:$0xff] %v5692_v28  ;;  %v5695_v18 = vld [vmem:[#allocation9 + $0xac] ss:$12 sps:$4 sm:$0xff]  }
 0x81b   :  { %6611 = vst [vmem:[#allocation37_spill] sm:$0xff] %v5695_v18 }
 0x81c   :  { %1997 = vmatpush1.bf16.msra.mxu0 %v5454_v5 }
 0x81d   :  { %3933 = vmatpush3.bf16.msra.mxu1 %v5683_v31  ;;  %1998 = vmatprep.subr.bf16.mxu0 %v5458_v0 }
 0x81e   :  { %3944 = vmatprep.subr.bf16.mxu1 %v6529_v22 }
 0x820   :  { %1999 = vmatpush1.bf16.msra.mxu0 %v5462_v50 }
 0x821   :  { %2000 = vmatprep.subr.bf16.mxu0 %v5689_v47 }
 0x824   :  { %2001 = vmatpush1.bf16.msra.mxu0 %v5692_v28 }
 0x825   :  { %2067 = vmatprep.subr.bf16.mxu0 %v5695_v18 }
 0x89f   :  { %v1704_v5 = vpop.f32.mrf.mxu1  ;;  %v1745_v31 = vpop.f32.mrf.mxu0 }
 0x8a0   :  { %v1705_v47 = vadd.f32 %v1704_v5, %v6593_v26 }
 0x8a1   :  { %v1706_v1 = vpop.f32.mrf.mxu1  ;;  %v3896_v0 = vpop.f32.mrf.mxu0 }
 0x8a3   :  { %v1708_v2 = vpop.f32.mrf.mxu1  ;;  %v1748_v30 = vpop.f32.mrf.mxu0 }
 0x8a4   :  { %v1707_v2 = vadd.f32 %v1706_v1, %v5156_v13 }
 0x8a5   :  { %v1709_v56 = vpop.f32.mrf.mxu1  ;;  %v3897_v50 = vpop.f32.mrf.mxu0 }
 0x8bf   :  { %v1785_v27 = vpop.f32.mrf.mxu1  ;;  %v1826_v20 = vpop.f32.mrf.mxu0 }
 0x8c0   :  { %v1786_v63 = vadd.f32 %v1785_v27, %v6563_v41 }
 0x8c1   :  { %v1787_v35 = vpop.f32.mrf.mxu1  ;;  %v3916_v28 = vpop.f32.mrf.mxu0 }
 0x8c2   :  { %v1832_v61 = vadd.f32 %v1786_v63, %v1705_v47  ;;  %v1788_v54 = vadd.f32 %v1787_v35, %v5154_v44 }
 0x8c3   :  { %v1789_v33 = vpop.f32.mrf.mxu1  ;;  %v1829_v58 = vpop.f32.mrf.mxu0 }
 0x8c4   :  { %v3276_v18 = vmul.f32 -1.442695, %v1832_v61  ;;  %v1839_v50 = vadd.f32 %v1788_v54, %v1707_v2  ;;  %v1827_v61 = vadd.f32 %v1826_v20, %v5160_v45 }
 0x8c5   :  { %v1790_v53 = vpop.f32.mrf.mxu1  ;;  %v3917_v0 = vpop.f32.mrf.mxu0 }
 0x8c6   :  { %4409 = vpow2.f32 %v3276_v18  ;;  %v3277_v5 = vmul.f32 -1.442695, %v1839_v50  ;;  %v1746_v53 = vadd.f32 %v1745_v31, %v5162_v14 }
 0x8c7   :  { %v1936_v30 = vpop.f32.mrf.mxu0 }
 0x8c8   :  { %4411 = vpow2.f32 %v3277_v5 }
 0x8c9   :  { %v3942_v56 = vpop.f32.mrf.mxu0 }
 0x8cb   :  { %v1939_v15 = vpop.f32.mrf.mxu0 }
 0x8cd   :  { %v3943_v26 = vpop.f32.mrf.mxu0 }
 0x8d3   :  { %v4410_v27 = vpop.eup %4409 }
 0x8d4   :  { %v1836_v28 = vadd.f32 1.0, %v4410_v27 }
 0x8d5   :  { %v4412_v63 = vpop.eup %4411 }
 0x8d6   :  { %4413 = vrcp.f32 %v1836_v28  ;;  %v1843_v58 = vadd.f32 1.0, %v4412_v63 }
 0x8d8   :  { %4415 = vrcp.f32 %v1843_v58 }
 0x8e3   :  { %v4414_v47 = vpop.eup %4413 }
 0x8e4   :  { %v1846_v33 = vmul.f32 %v4414_v47, %v1827_v61  ;;  %v6612_v61 = vld [vmem:[#allocation32_spill] sm:$0xff]  ;;  %v6613_v47 = vld [vmem:[#allocation33_spill] sm:$0xff] }
 0x8e5   :  { %v4416_v18 = vpop.eup %4415 }
 0x8e6   :  { %v1847_v1 = vadd.f32 %v1846_v33, %v1746_v53  ;;  %v1849_v54 = vsub.f32 1.0, %v4416_v18  ;;  %v1851_v26 = vmul.f32 %v4416_v18, %v5475_v32  ;;  %v6614_v53 = vld [vmem:[#allocation34_spill] sm:$0xff]  ;;  %v6615_v33 = vld [vmem:[#allocation53_spill] sm:$0xff] }
 0x8e7   :  { %v6617_v18 = vld [vmem:[#allocation42_spill] sm:$0xff] }
 0x8e8   :  { %4417 = vtanh.f32 %v1847_v1  ;;  %v6616_v1 = vld [vmem:[#allocation41_spill] sm:$0xff] }
 0x8f5   :  { %v4418_v15 = vpop.eup %4417 }
 0x8f6   :  { %v1850_v35 = vmul.f32 %v4418_v15, %v1849_v54  ;;  %v6618_v54 = vld [vmem:[#allocation43_spill] sm:$0xff]  ;;  %v6619_v15 = vld [vmem:[#allocation38_spill] sm:$0xff] }
 0x8f8   :  { %v5705_v0 = vadd.f32 %v1851_v26, %v1850_v35  ;;  %v2213_v35 = vld [vmem:[#allocation3 + $0x28] sm:$0xff] }
 0x8f9   :  { %v6620_v26 = vld [vmem:[#allocation44_spill] sm:$0xff] }
 0x8fa   :  { %v5709_v2 = vpack.c.bf16 %v5705_v0, %v5705_v0 }
 0x8fc   :  { %3935 = vmatmul.mubr.bf16.vlgmr.msra.gmra.mxu1 %v5709_v2 }
 0x8fd   :  { %3945 = vmatpush3.bf16.msra.mxu1 %v5309_v4  ;;  %3960 = vmatprep.mubr.msk.bf16.mxu1 %vm4757_vm0, %v6529_v22  ;;  %v1937_v4 = vadd.f32 %v5497_v12, %v1936_v30 }
 0x8fe   :  { %3946 = vmatprep.subr.bf16.mxu1 %v6529_v22 }
 0x901   :  { %3947 = vmatpush3.bf16.msra.mxu1 %v5315_v19  ;;  %v1942_v19 = vmax.f32 %v1937_v4, 0.0  ;;  %v6621_v4 = vld [vmem:[#allocation39_spill] sm:$0xff] }
 0x902   :  { %3948 = vmatprep.subr.bf16.mxu1 %v6529_v22 }
 0x905   :  { %3949 = vmatpush3.bf16.msra.mxu1 %v5319_v24  ;;  %v1943_v24 = vpack.c.bf16 %v1942_v19, %v1942_v19  ;;  %v2214_v19 = vpack.c.bf16 %v2213_v35, %v2213_v35  ;;  %v6637_v35 = vld [vmem:[#allocation28_spill] sm:$0xff] }
 0x906   :  { %3950 = vmatprep.subr.bf16.mxu1 %v6529_v22 }
 0x909   :  { %3951 = vmatpush3.bf16.msra.mxu1 %v5323_v34 }
 0x90a   :  { %3952 = vmatprep.subr.bf16.mxu1 %v6529_v22 }
 0x90d   :  { %3953 = vmatpush3.bf16.msra.mxu1 %v5327_v49  ;;  %v5752_v49 = vld [vmem:[%s6366_s11] ss:$0 sm:$0xff] }
 0x90e   :  { %3954 = vmatprep.subr.bf16.mxu1 %v6529_v22 }
 0x911   :  { %3955 = vmatpush3.bf16.msra.mxu1 %v5500_v11 }
 0x912   :  { %3956 = vmatprep.subr.bf16.mxu1 %v6529_v22 }
 0x915   :  { %3957 = vmatpush3.bf16.msra.mxu1 %v5504_v37 }
 0x916   :  { %3958 = vmatprep.subr.bf16.mxu1 %v6529_v22 }
 0x919   :  { %3959 = vmatpush3.bf16.msra.mxu1 %v5508_v39 }
 0x91a   :  { %3964 = vmatprep.subr.bf16.mxu1 %v6529_v22 }
 0x91c   :  { %3961 = vmatmul.mubr.bf16.vlgmr.msra.gmra.mxu1 %v1943_v24  ;;  %v6622_v24 = vld [vmem:[#allocation45_spill] sm:$0xff] }
 0x91d   :  { %3965 = vmatpush3.bf16.msra.mxu1 %v5512_v40  ;;  %3980 = vmatprep.mubr.msk.bf16.mxu1 %vm4757_vm0, %v6529_v22 }
 0x91e   :  { %3966 = vmatprep.subr.bf16.mxu1 %v6529_v22 }
 0x921   :  { %3967 = vmatpush3.bf16.msra.mxu1 %v5518_v16 }
 0x922   :  { %3968 = vmatprep.subr.bf16.mxu1 %v6529_v22 }
 0x925   :  { %3969 = vmatpush3.bf16.msra.mxu1 %v5522_v43 }
 0x926   :  { %3970 = vmatprep.subr.bf16.mxu1 %v6529_v22 }
 0x929   :  { %3971 = vmatpush3.bf16.msra.mxu1 %v5526_v46 }
 0x92a   :  { %3972 = vmatprep.subr.bf16.mxu1 %v6529_v22 }
 0x92d   :  { %3973 = vmatpush3.bf16.msra.mxu1 %v5530_v52 }
 0x92e   :  { %3974 = vmatprep.subr.bf16.mxu1 %v6529_v22 }
 0x931   :  { %3975 = vmatpush3.bf16.msra.mxu1 %v5534_v55 }
 0x932   :  { %3976 = vmatprep.subr.bf16.mxu1 %v6529_v22 }
 0x935   :  { %3977 = vmatpush3.bf16.msra.mxu1 %v5538_v57 }
 0x936   :  { %3978 = vmatprep.subr.bf16.mxu1 %v6529_v22 }
 0x939   :  { %3979 = vmatpush3.bf16.msra.mxu1 %v5542_v59 }
 0x93a   :  { %3984 = vmatprep.subr.bf16.mxu1 %v6529_v22 }
 0x9bc   :  { %v1888_v34 = vpop.f32.mrf.mxu1 }
 0x9bd   :  { %v1889_v31 = vadd.f32 %v5752_v49, %v1888_v34  ;;  %v6624_v34 = vld [vmem:[#allocation46_spill] sm:$0xff] }
 0x9be   :  { %v3936_v32 = vpop.f32.mrf.mxu1 }
 0x9bf   :  { %1895 = vst [vmem:[#allocation12 + $0x18] sm:$0xff] %v1889_v31  ;;  %v6625_v31 = vld [vmem:[#allocation20_spill] sm:$0xff]  ;;  %v6626_v32 = vld [vmem:[#allocation21_spill] sm:$0xff] }
 0x9c0   :  { %v1891_v20 = vpop.f32.mrf.mxu1 }
 0x9c1   :  { %v6627_v20 = vld [vmem:[#allocation47_spill] sm:$0xff] }
 0x9c2   :  { %v3937_v30 = vpop.f32.mrf.mxu1 }
 0x9c3   :  { %v6628_v30 = vld [vmem:[#allocation22_spill] sm:$0xff] }
 0x9dc   :  { %v1978_v50 = vpop.f32.mrf.mxu1 }
 0x9dd   :  { %v1979_v56 = vadd.f32 %v5550_v6, %v1978_v50  ;;  %v6629_v50 = vld [vmem:[#allocation23_spill] sm:$0xff] }
 0x9de   :  { %v3962_v5 = vpop.f32.mrf.mxu1 }
 0x9df   :  { %v1984_v27 = vmax.f32 %v1979_v56, 0.0  ;;  %v6630_v56 = vld [vmem:[#allocation48_spill] sm:$0xff] }
 0x9e0   :  { %v1981_v28 = vpop.f32.mrf.mxu1  ;;  %v6631_v5 = vld [vmem:[#allocation24_spill] sm:$0xff] }
 0x9e1   :  { %v1985_v63 = vpack.c.bf16 %v1984_v27, %v1984_v27  ;;  %v6632_v27 = vld [vmem:[#allocation25_spill] sm:$0xff] }
 0x9e2   :  { %v3963_v58 = vpop.f32.mrf.mxu1  ;;  %v6633_v28 = vld [vmem:[#allocation49_spill] sm:$0xff] }
 0x9e3   :  { %2019 = vmatmul.mubr.bf16.vlgmr.msra.gmra.mxu0 %v1985_v63  ;;  %3981 = vmatmul.mubr.bf16.vlgmr.msra.gmra.mxu1 %v1985_v63  ;;  %v6634_v63 = vld [vmem:[#allocation26_spill] sm:$0xff]  ;;  %v6635_v58 = vld [vmem:[#allocation27_spill] sm:$0xff] }
 0x9e4   :  { %2068 = vmatpush1.bf16.msra.mxu0 %v5553_v7  ;;  %3985 = vmatpush3.bf16.msra.mxu1 %v5556_v42 }
 0x9e5   :  { %2069 = vmatprep.subr.bf16.mxu0 %v5559_v48  ;;  %3986 = vmatprep.subr.bf16.mxu1 %v6529_v22 }
 0x9e6   :  { %2099 = vmatprep.mubr.bf16.mxu0 %v6518_v51  ;;  %4000 = vmatprep.mubr.msk.bf16.mxu1 %vm4757_vm0, %v6529_v22 }
 0x9e8   :  { %2070 = vmatpush1.bf16.msra.mxu0 %v5566_v8  ;;  %3987 = vmatpush3.bf16.msra.mxu1 %v5569_v9 }
 0x9e9   :  { %2071 = vmatprep.subr.bf16.mxu0 %v5572_v10  ;;  %3988 = vmatprep.subr.bf16.mxu1 %v6529_v22 }
 0x9ec   :  { %2072 = vmatpush1.bf16.msra.mxu0 %v5576_v25  ;;  %3989 = vmatpush3.bf16.msra.mxu1 %v5579_v36 }
 0x9ed   :  { %2073 = vmatprep.subr.bf16.mxu0 %v5582_v38  ;;  %3990 = vmatprep.subr.bf16.mxu1 %v6529_v22 }
 0x9f0   :  { %2074 = vmatpush1.bf16.msra.mxu0 %v5586_v60  ;;  %3991 = vmatpush3.bf16.msra.mxu1 %v5589_v62 }
 0x9f1   :  { %2075 = vmatprep.subr.bf16.mxu0 %v5592_v3  ;;  %3992 = vmatprep.subr.bf16.mxu1 %v6529_v22 }
 0x9f4   :  { %2076 = vmatpush1.bf16.msra.mxu0 %v5596_v29  ;;  %3993 = vmatpush3.bf16.msra.mxu1 %v5599_v21 }
 0x9f5   :  { %2077 = vmatprep.subr.bf16.mxu0 %v5602_v23  ;;  %3994 = vmatprep.subr.bf16.mxu1 %v6529_v22 }
 0x9f8   :  { %2078 = vmatpush1.bf16.msra.mxu0 %v5606_v17  ;;  %3995 = vmatpush3.bf16.msra.mxu1 %v6612_v61 }
 0x9f9   :  { %2079 = vmatprep.subr.bf16.mxu0 %v6613_v47  ;;  %3996 = vmatprep.subr.bf16.mxu1 %v6529_v22 }
 0x9fc   :  { %2080 = vmatpush1.bf16.msra.mxu0 %v6614_v53  ;;  %3997 = vmatpush3.bf16.msra.mxu1 %v6615_v33 }
 0x9fd   :  { %2081 = vmatprep.subr.bf16.mxu0 %v6616_v1  ;;  %3998 = vmatprep.subr.bf16.mxu1 %v6529_v22 }
 0xa00   :  { %2082 = vmatpush1.bf16.msra.mxu0 %v6617_v18  ;;  %3999 = vmatpush3.bf16.msra.mxu1 %v6618_v54 }
 0xa01   :  { %4024 = vmatprep.subr.bf16.mxu1 %v6529_v22  ;;  %4004 = vmatprep.subr.bf16.mxu0 %v6529_v22 }
 0xa03   :  { %2100 = vmatmul.mubr.bf16.vlgmr.msra.gmra.mxu0 %v5709_v2  ;;  %4001 = vmatmul.mubr.bf16.vlgmr.msra.gmra.mxu1 %v5709_v2  ;;  %v6623_v2 = vld [vmem:[#allocation40_spill] sm:$0xff] }
 0xa04   :  { %4025 = vmatpush3.bf16.msra.mxu1 %v6619_v15  ;;  %4026 = vmatprep.mubr.msk.bf16.mxu1 %vm4757_vm0, %v6529_v22  ;;  %v6636_v15 = vld [vmem:[#allocation50_spill] sm:$0xff] }
 0xa05   :  { %4005 = vmatpush3.bf16.msra.mxu0 %v6620_v26  ;;  %4020 = vmatprep.mubr.msk.bf16.mxu0 %vm4757_vm0, %v6529_v22 }
 0xa06   :  { %4006 = vmatprep.subr.bf16.mxu0 %v6529_v22  ;;  %2302 = vmatprep.subr.bf16.mxu1 %v6621_v4  ;;  %v6638_v4 = vld [vmem:[#allocation29_spill] sm:$0xff] }
 0xa09   :  { %4007 = vmatpush3.bf16.msra.mxu0 %v6622_v24 }
 0xa0a   :  { %4008 = vmatprep.subr.bf16.mxu0 %v6529_v22 }
 0xa0b   :  { %4027 = vmatmul.mubr.msk.bf16.vlgmr.msra.gmra.mxu1 %vm238_vm1, %v2214_v19  ;;  %v6639_v19 = vld [vmem:[#allocation51_spill] sm:$0xff] }
 0xa0c   :  { %2303 = vmatpush1.bf16.msra.mxu1 %v6623_v2  ;;  %2334 = vmatprep.mubr.bf16.mxu1 %v6518_v51  ;;  %v6640_v2 = vld [vmem:[#allocation30_spill] sm:$0xff] }
 0xa0d   :  { %4009 = vmatpush3.bf16.msra.mxu0 %v6624_v34  ;;  %2304 = vmatprep.subr.bf16.mxu1 %v6625_v31  ;;  %v6641_v31 = vld [vmem:[#allocation31_spill] sm:$0xff] }
 0xa0e   :  { %4010 = vmatprep.subr.bf16.mxu0 %v6529_v22 }
 0xa10   :  { %2305 = vmatpush1.bf16.msra.mxu1 %v6626_v32  ;;  %v6642_v32 = vld [vmem:[#allocation35_spill] sm:$0xff] }
 0xa11   :  { %4011 = vmatpush3.bf16.msra.mxu0 %v6627_v20  ;;  %2306 = vmatprep.subr.bf16.mxu1 %v6628_v30  ;;  %v6643_v30 = vld [vmem:[#allocation36_spill] sm:$0xff] }
 0xa12   :  { %4012 = vmatprep.subr.bf16.mxu0 %v6529_v22 }
 0xa14   :  { %2307 = vmatpush1.bf16.msra.mxu1 %v6629_v50  ;;  %v6644_v50 = vld [vmem:[#allocation37_spill] sm:$0xff] }
 0xa15   :  { %4013 = vmatpush3.bf16.msra.mxu0 %v6630_v56  ;;  %2308 = vmatprep.subr.bf16.mxu1 %v6631_v5  ;;  %v6645_v56 = vld [vmem:[#allocation52_spill] sm:$0xff] }
 0xa16   :  { %4014 = vmatprep.subr.bf16.mxu0 %v6529_v22 }
 0xa18   :  { %2309 = vmatpush1.bf16.msra.mxu1 %v6632_v27 }
 0xa19   :  { %4015 = vmatpush3.bf16.msra.mxu0 %v6633_v28  ;;  %2310 = vmatprep.subr.bf16.mxu1 %v6634_v63 }
 0xa1a   :  { %4016 = vmatprep.subr.bf16.mxu0 %v6529_v22 }
 0xa1c   :  { %2311 = vmatpush1.bf16.msra.mxu1 %v6635_v58 }
 0xa1d   :  { %4017 = vmatpush3.bf16.msra.mxu0 %v6636_v15  ;;  %2312 = vmatprep.subr.bf16.mxu1 %v6637_v35 }
 0xa1e   :  { %4018 = vmatprep.subr.bf16.mxu0 %v6529_v22 }
 0xa20   :  { %2313 = vmatpush1.bf16.msra.mxu1 %v6638_v4 }
 0xa21   :  { %4019 = vmatpush3.bf16.msra.mxu0 %v6639_v19  ;;  %2314 = vmatprep.subr.bf16.mxu1 %v6640_v2 }
 0xa22   :  { %4030 = vmatprep.subr.bf16.mxu0 %v6529_v22 }
 0xa24   :  { %2315 = vmatpush1.bf16.msra.mxu1 %v6641_v31 }
 0xa25   :  { %2316 = vmatprep.subr.bf16.mxu1 %v6642_v32 }
 0xa28   :  { %2317 = vmatpush1.bf16.msra.mxu1 %v6643_v30 }
 0xa29   :  { %2383 = vmatprep.subr.bf16.mxu1 %v6644_v50 }
 0xaa3   :  { %v2020_v5 = vpop.f32.mrf.mxu0  ;;  %v2061_v27 = vpop.f32.mrf.mxu1 }
 0xaa4   :  { %v2021_v20 = vadd.f32 %v2020_v5, %v6645_v56 }
 0xaa5   :  { %v2022_v63 = vpop.f32.mrf.mxu0  ;;  %v3982_v58 = vpop.f32.mrf.mxu1 }
 0xaa7   :  { %v2024_v35 = vpop.f32.mrf.mxu0  ;;  %v2064_v4 = vpop.f32.mrf.mxu1 }
 0xaa8   :  { %v2023_v35 = vadd.f32 %v2022_v63, %v5156_v13 }
 0xaa9   :  { %v2025_v15 = vpop.f32.mrf.mxu0  ;;  %v3983_v19 = vpop.f32.mrf.mxu1 }
 0xac3   :  { %v2101_v28 = vpop.f32.mrf.mxu0  ;;  %v2142_v2 = vpop.f32.mrf.mxu1 }
 0xac4   :  { %v2102_v31 = vadd.f32 %v2101_v28, %v6563_v41 }
 0xac5   :  { %v2103_v34 = vpop.f32.mrf.mxu0  ;;  %v4002_v32 = vpop.f32.mrf.mxu1 }
 0xac6   :  { %v2148_v24 = vadd.f32 %v2102_v31, %v2021_v20  ;;  %v2104_v54 = vadd.f32 %v2103_v34, %v5154_v44 }
 0xac7   :  { %v2105_v30 = vpop.f32.mrf.mxu0  ;;  %v2145_v26 = vpop.f32.mrf.mxu1 }
 0xac8   :  { %v3279_v50 = vmul.f32 -1.442695, %v2148_v24  ;;  %v2155_v19 = vadd.f32 %v2104_v54, %v2023_v35  ;;  %v2143_v24 = vadd.f32 %v2142_v2, %v5160_v45  ;;  %v5847_v2 = vld [vmem:[#allocation6 + $0x38] sm:$0xff]  }
 0xac9   :  { %v2106_v18 = vpop.f32.mrf.mxu0  ;;  %v4003_v58 = vpop.f32.mrf.mxu1 }
 0xaca   :  { %4419 = vpow2.f32 %v3279_v50  ;;  %v3280_v5 = vmul.f32 -1.442695, %v2155_v19  ;;  %v2062_v18 = vadd.f32 %v2061_v27, %v5162_v14  ;;  %v5853_v27 = vld [vmem:[#allocation6 + $0x30] sm:$0xff]   ;;  %v5861_v19 = vld [vmem:[#allocation6 + $0x20] sm:$0xff]  }
 0xacb   :  { %v2252_v15 = vpop.f32.mrf.mxu1 }
 0xacc   :  { %4421 = vpow2.f32 %v3280_v5  ;;  %v2253_v5 = vadd.f32 %v5497_v12, %v2252_v15 }
 0xacd   :  { %v4028_v4 = vpop.f32.mrf.mxu1 }
 0xace   :  { %v5865_v4 = vld [vmem:[#allocation6 + $0x18] sm:$0xff]  }
 0xacf   :  { %v2255_v1 = vpop.f32.mrf.mxu1 }
 0xad1   :  { %v4029_v56 = vpop.f32.mrf.mxu1 }
 0xad7   :  { %v4420_v28 = vpop.eup %4419 }
 0xad8   :  { %v2152_v32 = vadd.f32 1.0, %v4420_v28  ;;  %v2258_v28 = vmax.f32 %v2253_v5, 0.0 }
 0xad9   :  { %v4422_v20 = vpop.eup %4421 }
 0xada   :  { %4423 = vrcp.f32 %v2152_v32  ;;  %v2159_v26 = vadd.f32 1.0, %v4422_v20  ;;  %v2259_v32 = vpack.c.bf16 %v2258_v28, %v2258_v28  ;;  %v6655_v20 = vld [vmem:[#allocation50_spill] sm:$0xff] }
 0xadc   :  { %4425 = vrcp.f32 %v2159_v26  ;;  %v5988_v26 = vld [vmem:[#allocation8 + $0x34] ss:$12 sps:$4 sm:$0xff]  }
 0xae7   :  { %v4424_v34 = vpop.eup %4423 }
 0xae8   :  { %v2162_v30 = vmul.f32 %v4424_v34, %v2143_v24  ;;  %v5992_v24 = vld [vmem:[#allocation8 + $0x30] ss:$12 sps:$4 sm:$0xff]   ;;  %v6656_v34 = vld [vmem:[#allocation51_spill] sm:$0xff] }
 0xae9   :  { %v4426_v54 = vpop.eup %4425 }
 0xaea   :  { %v2163_v50 = vadd.f32 %v2162_v30, %v2062_v18  ;;  %v2165_v63 = vsub.f32 1.0, %v4426_v54  ;;  %v2167_v56 = vmul.f32 %v4426_v54, %v5705_v0  ;;  %v5857_v0 = vld [vmem:[#allocation6 + $0x28] sm:$0xff]   ;;  %v6000_v30 = vld [vmem:[#allocation8 + $0x18] ss:$12 sps:$4 sm:$0xff]  }
 0xaeb   :  { %v5996_v18 = vld [vmem:[#allocation8 + $0x1c] ss:$12 sps:$4 sm:$0xff]  }
 0xaec   :  { %4427 = vtanh.f32 %v2163_v50  ;;  %v6657_v50 = vld [vmem:[#allocation35_spill] sm:$0xff]  ;;  %v6658_v54 = vld [vmem:[#allocation36_spill] sm:$0xff] }
 0xaf9   :  { %v4428_v1 = vpop.eup %4427 }
 0xafa   :  { %v2166_v31 = vmul.f32 %v4428_v1, %v2165_v63  ;;  %v6659_v63 = vld [vmem:[#allocation37_spill] sm:$0xff] }
 0xafc   :  { %v5840_v58 = vadd.f32 %v2167_v56, %v2166_v31 }
 0xafe   :  { %v5844_v35 = vpack.c.bf16 %v5840_v58, %v5840_v58 }
 0xb00   :  { %4021 = vmatmul.mubr.bf16.vlgmr.msra.gmra.mxu0 %v5844_v35 }
 0xb01   :  { %4031 = vmatpush3.bf16.msra.mxu0 %v5847_v2  ;;  %4046 = vmatprep.mubr.msk.bf16.mxu0 %vm4757_vm0, %v6529_v22 }
 0xb02   :  { %4032 = vmatprep.subr.bf16.mxu0 %v6529_v22 }
 0xb05   :  { %4033 = vmatpush3.bf16.msra.mxu0 %v5853_v27 }
 0xb06   :  { %4034 = vmatprep.subr.bf16.mxu0 %v6529_v22 }
 0xb09   :  { %4035 = vmatpush3.bf16.msra.mxu0 %v5857_v0 }
 0xb0a   :  { %4036 = vmatprep.subr.bf16.mxu0 %v6529_v22 }
 0xb0d   :  { %4037 = vmatpush3.bf16.msra.mxu0 %v5861_v19 }
 0xb0e   :  { %4038 = vmatprep.subr.bf16.mxu0 %v6529_v22 }
 0xb11   :  { %4039 = vmatpush3.bf16.msra.mxu0 %v5865_v4 }
 0xb12   :  { %4040 = vmatprep.subr.bf16.mxu0 %v6529_v22 }
 0xb15   :  { %4041 = vmatpush3.bf16.msra.mxu0 %v5500_v11 }
 0xb16   :  { %4042 = vmatprep.subr.bf16.mxu0 %v6529_v22 }
 0xb19   :  { %4043 = vmatpush3.bf16.msra.mxu0 %v5504_v37 }
 0xb1a   :  { %4044 = vmatprep.subr.bf16.mxu0 %v6529_v22 }
 0xb1d   :  { %4045 = vmatpush3.bf16.msra.mxu0 %v5508_v39 }
 0xb1e   :  { %4050 = vmatprep.subr.bf16.mxu0 %v6529_v22 }
 0xb20   :  { %4047 = vmatmul.mubr.bf16.vlgmr.msra.gmra.mxu0 %v2259_v32 }
 0xb21   :  { %4051 = vmatpush3.bf16.msra.mxu0 %v5512_v40  ;;  %4066 = vmatprep.mubr.msk.bf16.mxu0 %vm4757_vm0, %v6529_v22 }
 0xb22   :  { %4052 = vmatprep.subr.bf16.mxu0 %v6529_v22 }
 0xb25   :  { %4053 = vmatpush3.bf16.msra.mxu0 %v5518_v16 }
 0xb26   :  { %4054 = vmatprep.subr.bf16.mxu0 %v6529_v22 }
 0xb29   :  { %4055 = vmatpush3.bf16.msra.mxu0 %v5522_v43 }
 0xb2a   :  { %4056 = vmatprep.subr.bf16.mxu0 %v6529_v22 }
 0xb2d   :  { %4057 = vmatpush3.bf16.msra.mxu0 %v5526_v46 }
 0xb2e   :  { %4058 = vmatprep.subr.bf16.mxu0 %v6529_v22 }
 0xb31   :  { %4059 = vmatpush3.bf16.msra.mxu0 %v5530_v52 }
 0xb32   :  { %4060 = vmatprep.subr.bf16.mxu0 %v6529_v22 }
 0xb35   :  { %4061 = vmatpush3.bf16.msra.mxu0 %v5534_v55 }
 0xb36   :  { %4062 = vmatprep.subr.bf16.mxu0 %v6529_v22 }
 0xb39   :  { %4063 = vmatpush3.bf16.msra.mxu0 %v5538_v57 }
 0xb3a   :  { %4064 = vmatprep.subr.bf16.mxu0 %v6529_v22 }
 0xb3d   :  { %4065 = vmatpush3.bf16.msra.mxu0 %v5542_v59  ;;  %v6646_v59 = vld [vmem:[#allocation41_spill] sm:$0xff] }
 0xb3e   :  { %4070 = vmatprep.subr.bf16.mxu0 %v6529_v22 }
 0xbc0   :  { %v2204_v12 = vpop.f32.mrf.mxu0 }
 0xbc1   :  { %v2205_v11 = vadd.f32 %v5752_v49, %v2204_v12 }
 0xbc2   :  { %v4022_v37 = vpop.f32.mrf.mxu0 }
 0xbc3   :  { %2211 = vst [vmem:[#allocation12 + $0x20] sm:$0xff] %v2205_v11 }
 0xbc4   :  { %v2207_v39 = vpop.f32.mrf.mxu0 }
 0xbc5   :  { %v6660_v39 = vld [vmem:[#allocation52_spill] sm:$0xff] }
 0xbc6   :  { %v4023_v40 = vpop.f32.mrf.mxu0 }
 0xbe0   :  { %v2294_v16 = vpop.f32.mrf.mxu0 }
 0xbe1   :  { %v2295_v43 = vadd.f32 %v5550_v6, %v2294_v16  ;;  %v6647_v6 = vld [vmem:[#allocation42_spill] sm:$0xff] }
 0xbe2   :  { %v4048_v46 = vpop.f32.mrf.mxu0 }
 0xbe3   :  { %v2300_v52 = vmax.f32 %v2295_v43, 0.0 }
 0xbe4   :  { %v2297_v55 = vpop.f32.mrf.mxu0 }
 0xbe5   :  { %v2301_v57 = vpack.c.bf16 %v2300_v52, %v2300_v52 }
 0xbe6   :  { %v4049_v15 = vpop.f32.mrf.mxu0 }
 0xbe7   :  { %2335 = vmatmul.mubr.bf16.vlgmr.msra.gmra.mxu1 %v2301_v57  ;;  %4067 = vmatmul.mubr.bf16.vlgmr.msra.gmra.mxu0 %v2301_v57 }
 0xbe8   :  { %2384 = vmatpush1.bf16.msra.mxu1 %v5553_v7  ;;  %4071 = vmatpush3.bf16.msra.mxu0 %v5556_v42  ;;  %v6648_v7 = vld [vmem:[#allocation43_spill] sm:$0xff] }
 0xbe9   :  { %2385 = vmatprep.subr.bf16.mxu1 %v5559_v48  ;;  %4072 = vmatprep.subr.bf16.mxu0 %v6529_v22  ;;  %v5936_v42 = vld [vmem:[%s6357_s2] sm:$0xff]   ;;  %v2529_v48 = vld [vmem:[#allocation3 + $0x30] sm:$0xff] }
 0xbea   :  { %2415 = vmatprep.mubr.bf16.mxu1 %v6518_v51  ;;  %4086 = vmatprep.mubr.msk.bf16.mxu0 %vm4757_vm0, %v6529_v22 }
 0xbec   :  { %2386 = vmatpush1.bf16.msra.mxu1 %v5566_v8  ;;  %4073 = vmatpush3.bf16.msra.mxu0 %v5569_v9  ;;  %v6649_v8 = vld [vmem:[#allocation44_spill] sm:$0xff] }
 0xbed   :  { %2387 = vmatprep.subr.bf16.mxu1 %v5572_v10  ;;  %4074 = vmatprep.subr.bf16.mxu0 %v6529_v22  ;;  %v5945_v9 = vld [vmem:[#allocation8 + $0xac] ss:$12 sps:$4 sm:$0xff]   ;;  %v2530_v10 = vpack.c.bf16 %v2529_v48, %v2529_v48 }
 0xbf0   :  { %2388 = vmatpush1.bf16.msra.mxu1 %v5576_v25  ;;  %4075 = vmatpush3.bf16.msra.mxu0 %v5579_v36  ;;  %v6650_v25 = vld [vmem:[#allocation45_spill] sm:$0xff] }
 0xbf1   :  { %2389 = vmatprep.subr.bf16.mxu1 %v5582_v38  ;;  %4076 = vmatprep.subr.bf16.mxu0 %v6529_v22  ;;  %v5951_v36 = vld [vmem:[#allocation8 + $0xa8] ss:$12 sps:$4 sm:$0xff]   ;;  %v6651_v38 = vld [vmem:[#allocation46_spill] sm:$0xff] }
 0xbf4   :  { %2390 = vmatpush1.bf16.msra.mxu1 %v5586_v60  ;;  %4077 = vmatpush3.bf16.msra.mxu0 %v5589_v62  ;;  %v5956_v60 = vld [vmem:[#allocation8 + $0x94] ss:$12 sps:$4 sm:$0xff]   ;;  %v5960_v62 = vld [vmem:[#allocation8 + $0x90] ss:$12 sps:$4 sm:$0xff]  }
 0xbf5   :  { %2391 = vmatprep.subr.bf16.mxu1 %v5592_v3  ;;  %4078 = vmatprep.subr.bf16.mxu0 %v6529_v22  ;;  %v6652_v3 = vld [vmem:[#allocation47_spill] sm:$0xff] }
 0xbf8   :  { %2392 = vmatpush1.bf16.msra.mxu1 %v5596_v29  ;;  %4079 = vmatpush3.bf16.msra.mxu0 %v5599_v21  ;;  %v5964_v29 = vld [vmem:[#allocation8 + $0x7c] ss:$12 sps:$4 sm:$0xff]   ;;  %v5968_v21 = vld [vmem:[#allocation8 + $0x78] ss:$12 sps:$4 sm:$0xff]  }
 0xbf9   :  { %2393 = vmatprep.subr.bf16.mxu1 %v5602_v23  ;;  %4080 = vmatprep.subr.bf16.mxu0 %v6529_v22  ;;  %v6653_v23 = vld [vmem:[#allocation48_spill] sm:$0xff] }
 0xbfc   :  { %2394 = vmatpush1.bf16.msra.mxu1 %v5606_v17  ;;  %4081 = vmatpush3.bf16.msra.mxu0 %v6612_v61  ;;  %v5972_v17 = vld [vmem:[#allocation8 + $0x64] ss:$12 sps:$4 sm:$0xff]   ;;  %v5976_v61 = vld [vmem:[#allocation8 + $0x60] ss:$12 sps:$4 sm:$0xff]  }
 0xbfd   :  { %2395 = vmatprep.subr.bf16.mxu1 %v6613_v47  ;;  %4082 = vmatprep.subr.bf16.mxu0 %v6529_v22  ;;  %v6654_v47 = vld [vmem:[#allocation49_spill] sm:$0xff] }
 0xc00   :  { %2396 = vmatpush1.bf16.msra.mxu1 %v6614_v53  ;;  %4083 = vmatpush3.bf16.msra.mxu0 %v6615_v33  ;;  %v5980_v53 = vld [vmem:[#allocation8 + $0x4c] ss:$12 sps:$4 sm:$0xff]   ;;  %v5984_v33 = vld [vmem:[#allocation8 + $0x48] ss:$12 sps:$4 sm:$0xff]  }
 0xc01   :  { %2397 = vmatprep.subr.bf16.mxu1 %v6646_v59  ;;  %4084 = vmatprep.subr.bf16.mxu0 %v6529_v22 }
 0xc04   :  { %2398 = vmatpush1.bf16.msra.mxu1 %v6647_v6  ;;  %4085 = vmatpush3.bf16.msra.mxu0 %v6648_v7 }
 0xc05   :  { %4110 = vmatprep.subr.bf16.mxu0 %v6529_v22  ;;  %4090 = vmatprep.subr.bf16.mxu1 %v6529_v22 }
 0xc07   :  { %2416 = vmatmul.mubr.bf16.vlgmr.msra.gmra.mxu1 %v5844_v35  ;;  %4087 = vmatmul.mubr.bf16.vlgmr.msra.gmra.mxu0 %v5844_v35 }
 0xc08   :  { %4111 = vmatpush3.bf16.msra.mxu0 %v5936_v42  ;;  %4112 = vmatprep.mubr.msk.bf16.mxu0 %vm4757_vm0, %v6529_v22 }
 0xc09   :  { %4091 = vmatpush3.bf16.msra.mxu1 %v6649_v8  ;;  %4106 = vmatprep.mubr.msk.bf16.mxu1 %vm4757_vm0, %v6529_v22 }
 0xc0a   :  { %4092 = vmatprep.subr.bf16.mxu1 %v6529_v22  ;;  %2618 = vmatprep.subr.bf16.mxu0 %v5945_v9 }
 0xc0d   :  { %4093 = vmatpush3.bf16.msra.mxu1 %v6650_v25 }
 0xc0e   :  { %4094 = vmatprep.subr.bf16.mxu1 %v6529_v22 }
 0xc0f   :  { %4113 = vmatmul.mubr.msk.bf16.vlgmr.msra.gmra.mxu0 %vm238_vm1, %v2530_v10 }
 0xc10   :  { %2619 = vmatpush1.bf16.msra.mxu0 %v5951_v36  ;;  %2650 = vmatprep.mubr.bf16.mxu0 %v6518_v51 }
 0xc11   :  { %4095 = vmatpush3.bf16.msra.mxu1 %v6651_v38  ;;  %2620 = vmatprep.subr.bf16.mxu0 %v5956_v60 }
 0xc12   :  { %4096 = vmatprep.subr.bf16.mxu1 %v6529_v22 }
 0xc14   :  { %2621 = vmatpush1.bf16.msra.mxu0 %v5960_v62 }
 0xc15   :  { %4097 = vmatpush3.bf16.msra.mxu1 %v6652_v3  ;;  %2622 = vmatprep.subr.bf16.mxu0 %v5964_v29 }
 0xc16   :  { %4098 = vmatprep.subr.bf16.mxu1 %v6529_v22 }
 0xc18   :  { %2623 = vmatpush1.bf16.msra.mxu0 %v5968_v21 }
 0xc19   :  { %4099 = vmatpush3.bf16.msra.mxu1 %v6653_v23  ;;  %2624 = vmatprep.subr.bf16.mxu0 %v5972_v17 }
 0xc1a   :  { %4100 = vmatprep.subr.bf16.mxu1 %v6529_v22 }
 0xc1c   :  { %2625 = vmatpush1.bf16.msra.mxu0 %v5976_v61 }
 0xc1d   :  { %4101 = vmatpush3.bf16.msra.mxu1 %v6654_v47  ;;  %2626 = vmatprep.subr.bf16.mxu0 %v5980_v53 }
 0xc1e   :  { %4102 = vmatprep.subr.bf16.mxu1 %v6529_v22 }
 0xc20   :  { %2627 = vmatpush1.bf16.msra.mxu0 %v5984_v33 }
 0xc21   :  { %4103 = vmatpush3.bf16.msra.mxu1 %v6655_v20  ;;  %2628 = vmatprep.subr.bf16.mxu0 %v5988_v26 }
 0xc22   :  { %4104 = vmatprep.subr.bf16.mxu1 %v6529_v22 }
 0xc24   :  { %2629 = vmatpush1.bf16.msra.mxu0 %v5992_v24 }
 0xc25   :  { %4105 = vmatpush3.bf16.msra.mxu1 %v6656_v34  ;;  %2630 = vmatprep.subr.bf16.mxu0 %v5996_v18 }
 0xc26   :  { %4116 = vmatprep.subr.bf16.mxu1 %v6529_v22 }
 0xc28   :  { %2631 = vmatpush1.bf16.msra.mxu0 %v6000_v30 }
 0xc29   :  { %2632 = vmatprep.subr.bf16.mxu0 %v6657_v50 }
 0xc2c   :  { %2633 = vmatpush1.bf16.msra.mxu0 %v6658_v54 }
 0xc2d   :  { %2699 = vmatprep.subr.bf16.mxu0 %v6659_v63 }
 0xca7   :  { %v2336_v1 = vpop.f32.mrf.mxu1  ;;  %v2377_v31 = vpop.f32.mrf.mxu0 }
 0xca8   :  { %v2337_v40 = vadd.f32 %v2336_v1, %v6660_v39  ;;  %v2378_v1 = vadd.f32 %v2377_v31, %v5162_v14 }
 0xca9   :  { %v2338_v56 = vpop.f32.mrf.mxu1  ;;  %v4068_v35 = vpop.f32.mrf.mxu0 }
 0xcaa   :  { %v2339_v48 = vadd.f32 %v2338_v56, %v5156_v13 }
 0xcab   :  { %v2340_v5 = vpop.f32.mrf.mxu1  ;;  %v2380_v28 = vpop.f32.mrf.mxu0 }
 0xcad   :  { %v2341_v32 = vpop.f32.mrf.mxu1  ;;  %v4069_v12 = vpop.f32.mrf.mxu0 }
 0xcc7   :  { %v2417_v11 = vpop.f32.mrf.mxu1  ;;  %v2458_v37 = vpop.f32.mrf.mxu0 }
 0xcc8   :  { %v2418_v16 = vadd.f32 %v2417_v11, %v6563_v41  ;;  %v2459_v54 = vadd.f32 %v2458_v37, %v5160_v45  ;;  %v6038_v37 = vld [vmem:[#allocation6 + $0x10] sm:$0xff]  }
 0xcc9   :  { %v2419_v43 = vpop.f32.mrf.mxu1  ;;  %v4088_v46 = vpop.f32.mrf.mxu0 }
 0xcca   :  { %v2464_v52 = vadd.f32 %v2418_v16, %v2337_v40  ;;  %v2420_v59 = vadd.f32 %v2419_v43, %v5154_v44  ;;  %v6042_v46 = vld [vmem:[#allocation6 + $0x8] sm:$0xff]  }
 0xccb   :  { %v2421_v55 = vpop.f32.mrf.mxu1  ;;  %v2461_v57 = vpop.f32.mrf.mxu0 }
 0xccc   :  { %v3282_v15 = vmul.f32 -1.442695, %v2464_v52  ;;  %v2471_v10 = vadd.f32 %v2420_v59, %v2339_v48  ;;  %v6046_v55 = vld [vmem:[#allocation6] sm:$0xff]   ;;  %v6050_v57 = vld [vmem:[#allocation8 + $0xb0] ss:$12 sps:$4 sm:$0xff]  }
 0xccd   :  { %v2422_v6 = vpop.f32.mrf.mxu1  ;;  %v4089_v7 = vpop.f32.mrf.mxu0  ;;  %v6060_v59 = vld [vmem:[#allocation8 + $0x80] ss:$12 sps:$4 sm:$0xff]   ;;  %v6072_v48 = vld [vmem:[#allocation8 + $0x38] ss:$12 sps:$4 sm:$0xff]  }
 0xcce   :  { %4429 = vpow2.f32 %v3282_v15  ;;  %v3283_v3 = vmul.f32 -1.442695, %v2471_v10  ;;  %v6056_v15 = vld [vmem:[#allocation8 + $0x98] ss:$12 sps:$4 sm:$0xff]   ;;  %v6064_v6 = vld [vmem:[#allocation8 + $0x68] ss:$12 sps:$4 sm:$0xff]  }
 0xccf   :  { %v2568_v8 = vpop.f32.mrf.mxu0  ;;  %v6068_v7 = vld [vmem:[#allocation8 + $0x50] ss:$12 sps:$4 sm:$0xff]   ;;  %v6080_v10 = vld [vmem:[#allocation8 + $0x8] ss:$12 sps:$4 sm:$0xff]  }
 0xcd0   :  { %4431 = vpow2.f32 %v3283_v3 }
 0xcd1   :  { %v4114_v25 = vpop.f32.mrf.mxu0 }
 0xcd3   :  { %v2571_v38 = vpop.f32.mrf.mxu0 }
 0xcd5   :  { %v4115_v23 = vpop.f32.mrf.mxu0 }
 0xcdb   :  { %v4430_v47 = vpop.eup %4429 }
 0xcdc   :  { %v2468_v20 = vadd.f32 1.0, %v4430_v47 }
 0xcdd   :  { %v4432_v34 = vpop.eup %4431 }
 0xcde   :  { %4433 = vrcp.f32 %v2468_v20  ;;  %v2475_v50 = vadd.f32 1.0, %v4432_v34  ;;  %v6088_v34 = vld [vmem:[%s6360_s5] ss:$0 sm:$0xff] }
 0xce0   :  { %4435 = vrcp.f32 %v2475_v50 }
 0xceb   :  { %v4434_v63 = vpop.eup %4433 }
 0xcec   :  { %v2478_v35 = vmul.f32 %v4434_v63, %v2459_v54 }
 0xced   :  { %v4436_v5 = vpop.eup %4435 }
 0xcee   :  { %v2479_v56 = vadd.f32 %v2478_v35, %v2378_v1  ;;  %v2481_v28 = vsub.f32 1.0, %v4436_v5  ;;  %v2483_v11 = vmul.f32 %v4436_v5, %v5840_v58  ;;  %v6035_v58 = vld [vmem:[%s6358_s3] ss:$0 sm:$0xff]  ;;  %v6094_v5 = vld [vmem:[#allocation9 + $0xb0] ss:$12 sps:$4 sm:$0xff]  }
 0xcef   :  { %v2569_v31 = vadd.f32 %v6035_v58, %v2568_v8  ;;  %v6076_v8 = vld [vmem:[#allocation8 + $0x20] ss:$12 sps:$4 sm:$0xff]  }
 0xcf0   :  { %4437 = vtanh.f32 %v2479_v56 }
 0xcf1   :  { %v2574_v43 = vmax.f32 %v2569_v31, 0.0  ;;  %v6114_v31 = vld [vmem:[#allocation9 + $0x78] ss:$12 sps:$4 sm:$0xff]  }
 0xcf3   :  { %v2575_v52 = vpack.c.bf16 %v2574_v43, %v2574_v43  ;;  %v6117_v43 = vld [vmem:[#allocation9 + $0x80] ss:$12 sps:$4 sm:$0xff]  }
 0xcfd   :  { %v4438_v32 = vpop.eup %4437 }
 0xcfe   :  { %v2482_v12 = vmul.f32 %v4438_v32, %v2481_v28  ;;  %v6097_v28 = vld [vmem:[#allocation9 + $0x94] ss:$12 sps:$4 sm:$0xff]   ;;  %v6104_v32 = vld [vmem:[#allocation9 + $0x90] ss:$12 sps:$4 sm:$0xff]  }
 0xd00   :  { %v6013_v40 = vadd.f32 %v2483_v11, %v2482_v12  ;;  %v6107_v12 = vld [vmem:[#allocation9 + $0x98] ss:$12 sps:$4 sm:$0xff]   ;;  %v6110_v11 = vld [vmem:[#allocation9 + $0x7c] ss:$12 sps:$4 sm:$0xff]  }
 0xd02   :  { %v6017_v16 = vpack.c.bf16 %v6013_v40, %v6013_v40 }
 0xd04   :  { %4107 = vmatmul.mubr.bf16.vlgmr.msra.gmra.mxu1 %v6017_v16 }
 0xd05   :  { %4117 = vmatpush3.bf16.msra.mxu1 %v5847_v2  ;;  %4132 = vmatprep.mubr.msk.bf16.mxu1 %vm4757_vm0, %v6529_v22 }
 0xd06   :  { %4118 = vmatprep.subr.bf16.mxu1 %v6529_v22 }
 0xd09   :  { %4119 = vmatpush3.bf16.msra.mxu1 %v5853_v27 }
 0xd0a   :  { %4120 = vmatprep.subr.bf16.mxu1 %v6529_v22 }
 0xd0d   :  { %4121 = vmatpush3.bf16.msra.mxu1 %v5857_v0 }
 0xd0e   :  { %4122 = vmatprep.subr.bf16.mxu1 %v6529_v22 }
 0xd11   :  { %4123 = vmatpush3.bf16.msra.mxu1 %v5861_v19 }
 0xd12   :  { %4124 = vmatprep.subr.bf16.mxu1 %v6529_v22 }
 0xd15   :  { %4125 = vmatpush3.bf16.msra.mxu1 %v5865_v4 }
 0xd16   :  { %4126 = vmatprep.subr.bf16.mxu1 %v6529_v22 }
 0xd19   :  { %4127 = vmatpush3.bf16.msra.mxu1 %v6038_v37 }
 0xd1a   :  { %4128 = vmatprep.subr.bf16.mxu1 %v6529_v22 }
 0xd1d   :  { %4129 = vmatpush3.bf16.msra.mxu1 %v6042_v46 }
 0xd1e   :  { %4130 = vmatprep.subr.bf16.mxu1 %v6529_v22 }
 0xd21   :  { %4131 = vmatpush3.bf16.msra.mxu1 %v6046_v55 }
 0xd22   :  { %4136 = vmatprep.subr.bf16.mxu1 %v6529_v22 }
 0xd24   :  { %4133 = vmatmul.mubr.bf16.vlgmr.msra.gmra.mxu1 %v2575_v52  ;;  %v6120_v52 = vld [vmem:[#allocation9 + $0x64] ss:$12 sps:$4 sm:$0xff]  }
 0xd25   :  { %4137 = vmatpush3.bf16.msra.mxu1 %v6050_v57  ;;  %4152 = vmatprep.mubr.msk.bf16.mxu1 %vm4757_vm0, %v6529_v22 }
 0xd26   :  { %4138 = vmatprep.subr.bf16.mxu1 %v6529_v22 }
 0xd29   :  { %4139 = vmatpush3.bf16.msra.mxu1 %v6056_v15 }
 0xd2a   :  { %4140 = vmatprep.subr.bf16.mxu1 %v6529_v22 }
 0xd2d   :  { %4141 = vmatpush3.bf16.msra.mxu1 %v6060_v59 }
 0xd2e   :  { %4142 = vmatprep.subr.bf16.mxu1 %v6529_v22 }
 0xd31   :  { %4143 = vmatpush3.bf16.msra.mxu1 %v6064_v6 }
 0xd32   :  { %4144 = vmatprep.subr.bf16.mxu1 %v6529_v22 }
 0xd35   :  { %4145 = vmatpush3.bf16.msra.mxu1 %v6068_v7 }
 0xd36   :  { %4146 = vmatprep.subr.bf16.mxu1 %v6529_v22 }
 0xd39   :  { %4147 = vmatpush3.bf16.msra.mxu1 %v6072_v48 }
 0xd3a   :  { %4148 = vmatprep.subr.bf16.mxu1 %v6529_v22 }
 0xd3d   :  { %4149 = vmatpush3.bf16.msra.mxu1 %v6076_v8 }
 0xd3e   :  { %4150 = vmatprep.subr.bf16.mxu1 %v6529_v22 }
 0xd41   :  { %4151 = vmatpush3.bf16.msra.mxu1 %v6080_v10 }
 0xd42   :  { %4156 = vmatprep.subr.bf16.mxu1 %v6529_v22 }
 0xdc4   :  { %v2520_v25 = vpop.f32.mrf.mxu1 }
 0xdc5   :  { %v2521_v38 = vadd.f32 %v5752_v49, %v2520_v25  ;;  %v6091_v49 = vld [vmem:[#allocation9 + $0xa8] ss:$12 sps:$4 sm:$0xff]   ;;  %v6124_v25 = vld [vmem:[#allocation9 + $0x60] ss:$12 sps:$4 sm:$0xff]  }
 0xdc6   :  { %v4108_v3 = vpop.f32.mrf.mxu1 }
 0xdc7   :  { %2527 = vst [vmem:[#allocation12 + $0x28] sm:$0xff] %v2521_v38  ;;  %v6127_v38 = vld [vmem:[#allocation9 + $0x68] ss:$12 sps:$4 sm:$0xff]   ;;  %v6130_v3 = vld [vmem:[#allocation9 + $0x4c] ss:$12 sps:$4 sm:$0xff]  }
 0xdc8   :  { %v2523_v23 = vpop.f32.mrf.mxu1 }
 0xdc9   :  { %v6134_v23 = vld [vmem:[#allocation9 + $0x48] ss:$12 sps:$4 sm:$0xff]  }
 0xdca   :  { %v4109_v47 = vpop.f32.mrf.mxu1 }
 0xdcb   :  { %v6137_v47 = vld [vmem:[#allocation9 + $0x50] ss:$12 sps:$4 sm:$0xff]  }
 0xde4   :  { %v2610_v20 = vpop.f32.mrf.mxu1 }
 0xde5   :  { %v2611_v50 = vadd.f32 %v6088_v34, %v2610_v20  ;;  %v6140_v20 = vld [vmem:[#allocation9 + $0x34] ss:$12 sps:$4 sm:$0xff]  }
 0xde6   :  { %v4134_v54 = vpop.f32.mrf.mxu1 }
 0xde7   :  { %v2616_v63 = vmax.f32 %v2611_v50, 0.0  ;;  %v6144_v50 = vld [vmem:[#allocation9 + $0x30] ss:$12 sps:$4 sm:$0xff]   ;;  %v6147_v54 = vld [vmem:[#allocation9 + $0x38] ss:$12 sps:$4 sm:$0xff]  }
 0xde8   :  { %v2613_v1 = vpop.f32.mrf.mxu1  ;;  %6661 = vst [vmem:[#allocation32_spill] sm:$0xff] %v6147_v54 }
 0xde9   :  { %v2617_v35 = vpack.c.bf16 %v2616_v63, %v2616_v63  ;;  %v6150_v63 = vld [vmem:[#allocation9 + $0x1c] ss:$12 sps:$4 sm:$0xff]   ;;  %v6154_v1 = vld [vmem:[#allocation9 + $0x18] ss:$12 sps:$4 sm:$0xff]  }
 0xdea   :  { %v4135_v56 = vpop.f32.mrf.mxu1  ;;  %6662 = vst [vmem:[#allocation33_spill] sm:$0xff] %v6150_v63  ;;  %6663 = vst [vmem:[#allocation34_spill] sm:$0xff] %v6154_v1 }
 0xdeb   :  { %2651 = vmatmul.mubr.bf16.vlgmr.msra.gmra.mxu0 %v2617_v35  ;;  %4153 = vmatmul.mubr.bf16.vlgmr.msra.gmra.mxu1 %v2617_v35  ;;  %v6157_v35 = vld [vmem:[#allocation9 + $0x20] ss:$12 sps:$4 sm:$0xff]   ;;  %v6160_v56 = vld [vmem:[#allocation9 + $0x4] ss:$12 sps:$4 sm:$0xff]  }
 0xdec   :  { %2700 = vmatpush1.bf16.msra.mxu0 %v6091_v49  ;;  %4157 = vmatpush3.bf16.msra.mxu1 %v6094_v5  ;;  %6664 = vst [vmem:[#allocation53_spill] sm:$0xff] %v6157_v35  ;;  %6665 = vst [vmem:[#allocation38_spill] sm:$0xff] %v6160_v56 }
 0xded   :  { %2701 = vmatprep.subr.bf16.mxu0 %v6097_v28  ;;  %4158 = vmatprep.subr.bf16.mxu1 %v6529_v22 }
 0xdee   :  { %2731 = vmatprep.mubr.bf16.mxu0 %v6518_v51  ;;  %4172 = vmatprep.mubr.msk.bf16.mxu1 %vm4757_vm0, %v6529_v22 }
 0xdf0   :  { %2702 = vmatpush1.bf16.msra.mxu0 %v6104_v32  ;;  %4159 = vmatpush3.bf16.msra.mxu1 %v6107_v12 }
 0xdf1   :  { %2703 = vmatprep.subr.bf16.mxu0 %v6110_v11  ;;  %4160 = vmatprep.subr.bf16.mxu1 %v6529_v22 }
 0xdf4   :  { %2704 = vmatpush1.bf16.msra.mxu0 %v6114_v31  ;;  %4161 = vmatpush3.bf16.msra.mxu1 %v6117_v43 }
 0xdf5   :  { %2705 = vmatprep.subr.bf16.mxu0 %v6120_v52  ;;  %4162 = vmatprep.subr.bf16.mxu1 %v6529_v22 }
 0xdf8   :  { %2706 = vmatpush1.bf16.msra.mxu0 %v6124_v25  ;;  %4163 = vmatpush3.bf16.msra.mxu1 %v6127_v38 }
 0xdf9   :  { %2707 = vmatprep.subr.bf16.mxu0 %v6130_v3  ;;  %4164 = vmatprep.subr.bf16.mxu1 %v6529_v22 }
 0xdfc   :  { %2708 = vmatpush1.bf16.msra.mxu0 %v6134_v23  ;;  %4165 = vmatpush3.bf16.msra.mxu1 %v6137_v47 }
 0xdfd   :  { %2709 = vmatprep.subr.bf16.mxu0 %v6140_v20  ;;  %4166 = vmatprep.subr.bf16.mxu1 %v6529_v22 }
 0xe00   :  { %2710 = vmatpush1.bf16.msra.mxu0 %v6144_v50  ;;  %4167 = vmatpush3.bf16.msra.mxu1 %v6147_v54  ;;  %v6164_v54 = vld [vmem:[#allocation9] ss:$12 sps:$4 sm:$0xff]  }
 0xe01   :  { %2711 = vmatprep.subr.bf16.mxu0 %v6150_v63  ;;  %4168 = vmatprep.subr.bf16.mxu1 %v6529_v22  ;;  %6666 = vst [vmem:[#allocation39_spill] sm:$0xff] %v6164_v54  ;;  %v6167_v63 = vld [vmem:[#allocation9 + $0x8] ss:$12 sps:$4 sm:$0xff]  }
 0xe02   :  { %6667 = vst [vmem:[#allocation40_spill] sm:$0xff] %v6167_v63 }
 0xe04   :  { %2712 = vmatpush1.bf16.msra.mxu0 %v6154_v1  ;;  %4169 = vmatpush3.bf16.msra.mxu1 %v6157_v35  ;;  %v6177_v35 = vld [vmem:[#allocation11 + $0x38] sm:$0xff]  }
 0xe05   :  { %2713 = vmatprep.subr.bf16.mxu0 %v6160_v56  ;;  %4170 = vmatprep.subr.bf16.mxu1 %v6529_v22  ;;  %v2845_v56 = vld [vmem:[#allocation3 + $0x38] sm:$0xff]  ;;  %6668 = vst [vmem:[#allocation20_spill] sm:$0xff] %v6177_v35 }
 0xe08   :  { %2714 = vmatpush1.bf16.msra.mxu0 %v6164_v54  ;;  %4171 = vmatpush3.bf16.msra.mxu1 %v6167_v63  ;;  %v2846_v63 = vpack.c.bf16 %v2845_v56, %v2845_v56  ;;  %v6184_v54 = vld [vmem:[#allocation11 + $0x30] sm:$0xff]  }
 0xe09   :  { %4196 = vmatprep.subr.bf16.mxu1 %v6529_v22  ;;  %4176 = vmatprep.subr.bf16.mxu0 %v6529_v22  ;;  %6669 = vst [vmem:[#allocation21_spill] sm:$0xff] %v6184_v54 }
 0xe0b   :  { %2732 = vmatmul.mubr.bf16.vlgmr.msra.gmra.mxu0 %v6017_v16  ;;  %4173 = vmatmul.mubr.bf16.vlgmr.msra.gmra.mxu1 %v6017_v16 }
 0xe0c   :  { %4197 = vmatpush3.bf16.msra.mxu1 %v5936_v42  ;;  %4198 = vmatprep.mubr.msk.bf16.mxu1 %vm4757_vm0, %v6529_v22  ;;  %v6191_v42 = vld [vmem:[#allocation11 + $0x28] sm:$0xff]  }
 0xe0d   :  { %4177 = vmatpush3.bf16.msra.mxu0 %v6177_v35  ;;  %4192 = vmatprep.mubr.msk.bf16.mxu0 %vm4757_vm0, %v6529_v22  ;;  %6670 = vst [vmem:[#allocation22_spill] sm:$0xff] %v6191_v42 }
 0xe0e   :  { %4178 = vmatprep.subr.bf16.mxu0 %v6529_v22  ;;  %2934 = vmatprep.subr.bf16.mxu1 %v5945_v9  ;;  %v6197_v9 = vld [vmem:[#allocation11 + $0x20] sm:$0xff]  }
 0xe0f   :  { %6671 = vst [vmem:[#allocation23_spill] sm:$0xff] %v6197_v9 }
 0xe11   :  { %4179 = vmatpush3.bf16.msra.mxu0 %v6184_v54 }
 0xe12   :  { %4180 = vmatprep.subr.bf16.mxu0 %v6529_v22 }
 0xe13   :  { %4199 = vmatmul.mubr.msk.bf16.vlgmr.msra.gmra.mxu1 %vm238_vm1, %v2846_v63 }
 0xe14   :  { %2935 = vmatpush1.bf16.msra.mxu1 %v5951_v36  ;;  %2966 = vmatprep.mubr.bf16.mxu1 %v6518_v51  ;;  %v6203_v36 = vld [vmem:[#allocation11 + $0x18] sm:$0xff]  }
 0xe15   :  { %4181 = vmatpush3.bf16.msra.mxu0 %v6191_v42  ;;  %2936 = vmatprep.subr.bf16.mxu1 %v5956_v60  ;;  %6672 = vst [vmem:[#allocation24_spill] sm:$0xff] %v6203_v36  ;;  %v6209_v60 = vld [vmem:[#allocation11 + $0x10] sm:$0xff]  }
 0xe16   :  { %4182 = vmatprep.subr.bf16.mxu0 %v6529_v22  ;;  %6673 = vst [vmem:[#allocation25_spill] sm:$0xff] %v6209_v60 }
 0xe18   :  { %2937 = vmatpush1.bf16.msra.mxu1 %v5960_v62  ;;  %v6215_v62 = vld [vmem:[#allocation11 + $0x8] sm:$0xff]  }
 0xe19   :  { %4183 = vmatpush3.bf16.msra.mxu0 %v6197_v9  ;;  %2938 = vmatprep.subr.bf16.mxu1 %v5964_v29  ;;  %6674 = vst [vmem:[#allocation26_spill] sm:$0xff] %v6215_v62  ;;  %v6221_v29 = vld [vmem:[#allocation11] sm:$0xff]  }
 0xe1a   :  { %4184 = vmatprep.subr.bf16.mxu0 %v6529_v22  ;;  %6675 = vst [vmem:[#allocation27_spill] sm:$0xff] %v6221_v29 }
 0xe1c   :  { %2939 = vmatpush1.bf16.msra.mxu1 %v5968_v21  ;;  %v4591_v21 = vld [vmem:[#allocation8 + $0x4] ss:$12 sps:$4 sm:$0xff]  }
 0xe1d   :  { %4185 = vmatpush3.bf16.msra.mxu0 %v6203_v36  ;;  %2940 = vmatprep.subr.bf16.mxu1 %v5972_v17  ;;  %v4592_v17 = vld [vmem:[#allocation8] ss:$12 sps:$4 sm:$0xff]  }
 0xe1e   :  { %4186 = vmatprep.subr.bf16.mxu0 %v6529_v22 }
 0xe20   :  { %2941 = vmatpush1.bf16.msra.mxu1 %v5976_v61  ;;  %v4593_v61 = vld [vmem:[#allocation9 + $0xac] ss:$12 sps:$4 sm:$0xff]  }
 0xe21   :  { %4187 = vmatpush3.bf16.msra.mxu0 %v6209_v60  ;;  %2942 = vmatprep.subr.bf16.mxu1 %v5980_v53 }
 0xe22   :  { %4188 = vmatprep.subr.bf16.mxu0 %v6529_v22 }
 0xe24   :  { %2943 = vmatpush1.bf16.msra.mxu1 %v5984_v33 }
 0xe25   :  { %4189 = vmatpush3.bf16.msra.mxu0 %v6215_v62  ;;  %2944 = vmatprep.subr.bf16.mxu1 %v5988_v26 }
 0xe26   :  { %4190 = vmatprep.subr.bf16.mxu0 %v6529_v22 }
 0xe28   :  { %2945 = vmatpush1.bf16.msra.mxu1 %v5992_v24 }
 0xe29   :  { %4191 = vmatpush3.bf16.msra.mxu0 %v6221_v29  ;;  %2946 = vmatprep.subr.bf16.mxu1 %v5996_v18 }
 0xe2a   :  { %4202 = vmatprep.subr.bf16.mxu0 %v6529_v22 }
 0xe2c   :  { %2947 = vmatpush1.bf16.msra.mxu1 %v6000_v30 }
 0xe2d   :  { %2948 = vmatprep.subr.bf16.mxu1 %v4591_v21 }
 0xe30   :  { %2949 = vmatpush1.bf16.msra.mxu1 %v4592_v17 }
 0xe31   :  { %3015 = vmatprep.subr.bf16.mxu1 %v4593_v61 }
 0xeab   :  { %v2652_v53 = vpop.f32.mrf.mxu0  ;;  %v2693_v33 = vpop.f32.mrf.mxu1 }
 0xeac   :  { %v2653_v60 = vadd.f32 %v2652_v53, %v6660_v39 }
 0xead   :  { %v2654_v26 = vpop.f32.mrf.mxu0  ;;  %v4154_v24 = vpop.f32.mrf.mxu1 }
 0xeaf   :  { %v2656_v16 = vpop.f32.mrf.mxu0  ;;  %v2696_v63 = vpop.f32.mrf.mxu1 }
 0xeb0   :  { %v2655_v16 = vadd.f32 %v2654_v26, %v5156_v13 }
 0xeb1   :  { %v2657_v56 = vpop.f32.mrf.mxu0  ;;  %v4155_v29 = vpop.f32.mrf.mxu1 }
 0xecb   :  { %v2733_v62 = vpop.f32.mrf.mxu0  ;;  %v2774_v18 = vpop.f32.mrf.mxu1 }
 0xecc   :  { %v2734_v30 = vadd.f32 %v2733_v62, %v6563_v41 }
 0xecd   :  { %v2735_v36 = vpop.f32.mrf.mxu0  ;;  %v4174_v21 = vpop.f32.mrf.mxu1 }
 0xece   :  { %v2780_v9 = vadd.f32 %v2734_v30, %v2653_v60  ;;  %v2736_v54 = vadd.f32 %v2735_v36, %v5154_v44 }
 0xecf   :  { %v2737_v17 = vpop.f32.mrf.mxu0  ;;  %v2777_v42 = vpop.f32.mrf.mxu1 }
 0xed0   :  { %v3285_v61 = vmul.f32 -1.442695, %v2780_v9  ;;  %v2787_v63 = vadd.f32 %v2736_v54, %v2655_v16  ;;  %v2775_v9 = vadd.f32 %v2774_v18, %v5160_v45 }
 0xed1   :  { %v2738_v35 = vpop.f32.mrf.mxu0  ;;  %v4175_v24 = vpop.f32.mrf.mxu1 }
 0xed2   :  { %4439 = vpow2.f32 %v3285_v61  ;;  %v3286_v53 = vmul.f32 -1.442695, %v2787_v63  ;;  %v2694_v35 = vadd.f32 %v2693_v33, %v5162_v14 }
 0xed3   :  { %v2884_v29 = vpop.f32.mrf.mxu1 }
 0xed4   :  { %4441 = vpow2.f32 %v3286_v53  ;;  %v6691_v53 = vld [vmem:[#allocation52_spill] sm:$0xff] }
 0xed5   :  { %v4200_v56 = vpop.f32.mrf.mxu1 }
 0xed7   :  { %v2887_v1 = vpop.f32.mrf.mxu1 }
 0xed9   :  { %v4201_v39 = vpop.f32.mrf.mxu1 }
 0xedf   :  { %v4440_v62 = vpop.eup %4439 }
 0xee0   :  { %v2784_v21 = vadd.f32 1.0, %v4440_v62 }
 0xee1   :  { %v4442_v60 = vpop.eup %4441 }
 0xee2   :  { %4443 = vrcp.f32 %v2784_v21  ;;  %v2791_v42 = vadd.f32 1.0, %v4442_v60 }
 0xee4   :  { %4445 = vrcp.f32 %v2791_v42 }
 0xeef   :  { %v4444_v36 = vpop.eup %4443 }
 0xef0   :  { %v2794_v30 = vmul.f32 %v4444_v36, %v2775_v9 }
 0xef1   :  { %v4446_v54 = vpop.eup %4445 }
 0xef2   :  { %v2795_v26 = vadd.f32 %v2794_v30, %v2694_v35  ;;  %v2797_v17 = vsub.f32 1.0, %v4446_v54  ;;  %v2799_v39 = vmul.f32 %v4446_v54, %v6013_v40 }
 0xef4   :  { %4447 = vtanh.f32 %v2795_v26 }
 0xf01   :  { %v4448_v1 = vpop.eup %4447 }
 0xf02   :  { %v2798_v61 = vmul.f32 %v4448_v1, %v2797_v17 }
 0xf04   :  { %v6234_v24 = vadd.f32 %v2799_v39, %v2798_v61 }
 0xf06   :  { %v6238_v16 = vpack.c.bf16 %v6234_v24, %v6234_v24 }
 0xf08   :  { %4193 = vmatmul.mubr.bf16.vlgmr.msra.gmra.mxu0 %v6238_v16 }
 0xf09   :  { %4203 = vmatpush3.bf16.msra.mxu0 %v5847_v2  ;;  %4218 = vmatprep.mubr.msk.bf16.mxu0 %vm4757_vm0, %v6529_v22  ;;  %v2885_v2 = vadd.f32 %v6035_v58, %v2884_v29 }
 0xf0a   :  { %4204 = vmatprep.subr.bf16.mxu0 %v6529_v22 }
 0xf0d   :  { %4205 = vmatpush3.bf16.msra.mxu0 %v5853_v27  ;;  %v2890_v27 = vmax.f32 %v2885_v2, 0.0 }
 0xf0e   :  { %4206 = vmatprep.subr.bf16.mxu0 %v6529_v22 }
 0xf11   :  { %4207 = vmatpush3.bf16.msra.mxu0 %v5857_v0  ;;  %v2891_v0 = vpack.c.bf16 %v2890_v27, %v2890_v27 }
 0xf12   :  { %4208 = vmatprep.subr.bf16.mxu0 %v6529_v22 }
 0xf15   :  { %4209 = vmatpush3.bf16.msra.mxu0 %v5861_v19 }
 0xf16   :  { %4210 = vmatprep.subr.bf16.mxu0 %v6529_v22 }
 0xf19   :  { %4211 = vmatpush3.bf16.msra.mxu0 %v5865_v4  ;;  %v6281_v4 = vld [vmem:[%s6366_s11] ss:$0 sm:$0xff]  ;;  %s4759_s11 = smov [#allocation13]  }
 0xf1a   :  { %4212 = vmatprep.subr.bf16.mxu0 %v6529_v22  ;;  %s3183_s20 = sshll.u32 %s4759_s11, 4  ;;  %s3184_s20 = int_to_ptr.vmem [resolvable:$true] %s3183_s20 }
 0xf1b   :  { %s4695_s21 = scalar_lea.vmem %s3184_s20, 128  ;;  %p4700_p12 = scmp.lt.s32.totalorder %s3184_s20, %s3184_s20 }
 0xf1c   :  { %p4696_p11 = scmp.ne.s32.totalorder %s3184_s20, %s4695_s21  ;;  %p4701_p13 = scmp.lt.s32.totalorder %s4695_s21, %s4695_s21 }
 0xf1d   :  { %4213 = vmatpush3.bf16.msra.mxu0 %v6038_v37 }
 0xf1e   :  { %4214 = vmatprep.subr.bf16.mxu0 %v6529_v22  ;;  %p4702_p0 = por %p4701_p13, %p4700_p12 }
 0xf20   :  { %p4703_p1 = pnand %p4702_p0, %p4696_p11 }
 0xf21   :  { %4215 = vmatpush3.bf16.msra.mxu0 %v6042_v46 }
 0xf22   :  { %4216 = vmatprep.subr.bf16.mxu0 %v6529_v22 }
 0xf25   :  { %4217 = vmatpush3.bf16.msra.mxu0 %v6046_v55 }
 0xf26   :  { %4222 = vmatprep.subr.bf16.mxu0 %v6529_v22 }
 0xf28   :  { %4219 = vmatmul.mubr.bf16.vlgmr.msra.gmra.mxu0 %v2891_v0 }
 0xf29   :  { %4223 = vmatpush3.bf16.msra.mxu0 %v6050_v57  ;;  %4238 = vmatprep.mubr.msk.bf16.mxu0 %vm4757_vm0, %v6529_v22 }
 0xf2a   :  { %4224 = vmatprep.subr.bf16.mxu0 %v6529_v22 }
 0xf2d   :  { %4225 = vmatpush3.bf16.msra.mxu0 %v6056_v15 }
 0xf2e   :  { %4226 = vmatprep.subr.bf16.mxu0 %v6529_v22 }
 0xf31   :  { %4227 = vmatpush3.bf16.msra.mxu0 %v6060_v59 }
 0xf32   :  { %4228 = vmatprep.subr.bf16.mxu0 %v6529_v22 }
 0xf35   :  { %4229 = vmatpush3.bf16.msra.mxu0 %v6064_v6 }
 0xf36   :  { %4230 = vmatprep.subr.bf16.mxu0 %v6529_v22 }
 0xf39   :  { %4231 = vmatpush3.bf16.msra.mxu0 %v6068_v7 }
 0xf3a   :  { %4232 = vmatprep.subr.bf16.mxu0 %v6529_v22 }
 0xf3d   :  { %4233 = vmatpush3.bf16.msra.mxu0 %v6072_v48 }
 0xf3e   :  { %4234 = vmatprep.subr.bf16.mxu0 %v6529_v22 }
 0xf41   :  { %4235 = vmatpush3.bf16.msra.mxu0 %v6076_v8  ;;  %v6677_v8 = vld [vmem:[#allocation33_spill] sm:$0xff] }
 0xf42   :  { %4236 = vmatprep.subr.bf16.mxu0 %v6529_v22 }
 0xf45   :  { %4237 = vmatpush3.bf16.msra.mxu0 %v6080_v10  ;;  %v6678_v10 = vld [vmem:[#allocation34_spill] sm:$0xff] }
 0xf46   :  { %4242 = vmatprep.subr.bf16.mxu0 %v6529_v22 }
 0xfc8   :  { %v2836_v19 = vpop.f32.mrf.mxu0 }
 0xfc9   :  { %v2837_v40 = vadd.f32 %v6281_v4, %v2836_v19 }
 0xfca   :  { %v4194_v58 = vpop.f32.mrf.mxu0 }
 0xfcb   :  { %2843 = vst [vmem:[#allocation12 + $0x30] sm:$0xff] %v2837_v40 }
 0xfcc   :  { %v2839_v37 = vpop.f32.mrf.mxu0 }
 0xfce   :  { %v4195_v46 = vpop.f32.mrf.mxu0 }
 0xfe8   :  { %v2926_v55 = vpop.f32.mrf.mxu0 }
 0xfe9   :  { %v2927_v57 = vadd.f32 %v6088_v34, %v2926_v55  ;;  %v6679_v34 = vld [vmem:[#allocation53_spill] sm:$0xff] }
 0xfea   :  { %v4220_v15 = vpop.f32.mrf.mxu0 }
 0xfeb   :  { %v2932_v59 = vmax.f32 %v2927_v57, 0.0 }
 0xfec   :  { %v2929_v6 = vpop.f32.mrf.mxu0 }
 0xfed   :  { %v2933_v7 = vpack.c.bf16 %v2932_v59, %v2932_v59 }
 0xfee   :  { %v4221_v48 = vpop.f32.mrf.mxu0 }
 0xfef   :  { %2967 = vmatmul.mubr.bf16.vlgmr.msra.gmra.mxu1 %v2933_v7  ;;  %4239 = vmatmul.mubr.bf16.vlgmr.msra.gmra.mxu0 %v2933_v7 }
 0xff0   :  { %3016 = vmatpush1.bf16.msra.mxu1 %v6091_v49  ;;  %4243 = vmatpush3.bf16.msra.mxu0 %v6094_v5  ;;  %v6680_v49 = vld [vmem:[#allocation38_spill] sm:$0xff]  ;;  %v6681_v5 = vld [vmem:[#allocation39_spill] sm:$0xff] }
 0xff1   :  { %3017 = vmatprep.subr.bf16.mxu1 %v6097_v28  ;;  %4244 = vmatprep.subr.bf16.mxu0 %v6529_v22  ;;  %v6682_v28 = vld [vmem:[#allocation40_spill] sm:$0xff] }
 0xff2   :  { %3047 = vmatprep.mubr.bf16.mxu1 %v6518_v51  ;;  %4258 = vmatprep.mubr.msk.bf16.mxu0 %vm4757_vm0, %v6529_v22  ;;  %v6676_v51 = vld [vmem:[#allocation32_spill] sm:$0xff] }
 0xff4   :  { %3018 = vmatpush1.bf16.msra.mxu1 %v6104_v32  ;;  %4245 = vmatpush3.bf16.msra.mxu0 %v6107_v12  ;;  %v6683_v32 = vld [vmem:[#allocation20_spill] sm:$0xff]  ;;  %v6684_v12 = vld [vmem:[#allocation21_spill] sm:$0xff] }
 0xff5   :  { %3019 = vmatprep.subr.bf16.mxu1 %v6110_v11  ;;  %4246 = vmatprep.subr.bf16.mxu0 %v6529_v22  ;;  %v6685_v11 = vld [vmem:[#allocation22_spill] sm:$0xff] }
 0xff8   :  { %3020 = vmatpush1.bf16.msra.mxu1 %v6114_v31  ;;  %4247 = vmatpush3.bf16.msra.mxu0 %v6117_v43  ;;  %v6686_v31 = vld [vmem:[#allocation23_spill] sm:$0xff]  ;;  %v6687_v43 = vld [vmem:[#allocation24_spill] sm:$0xff] }
 0xff9   :  { %3021 = vmatprep.subr.bf16.mxu1 %v6120_v52  ;;  %4248 = vmatprep.subr.bf16.mxu0 %v6529_v22  ;;  %v6688_v52 = vld [vmem:[#allocation25_spill] sm:$0xff] }
 0xffc   :  { %3022 = vmatpush1.bf16.msra.mxu1 %v6124_v25  ;;  %4249 = vmatpush3.bf16.msra.mxu0 %v6127_v38  ;;  %v6689_v25 = vld [vmem:[#allocation26_spill] sm:$0xff]  ;;  %v6690_v38 = vld [vmem:[#allocation27_spill] sm:$0xff] }
 0xffd   :  { %3023 = vmatprep.subr.bf16.mxu1 %v6130_v3  ;;  %4250 = vmatprep.subr.bf16.mxu0 %v6529_v22 }
0x1000   :  { %3024 = vmatpush1.bf16.msra.mxu1 %v6134_v23  ;;  %4251 = vmatpush3.bf16.msra.mxu0 %v6137_v47 }
0x1001   :  { %3025 = vmatprep.subr.bf16.mxu1 %v6140_v20  ;;  %4252 = vmatprep.subr.bf16.mxu0 %v6529_v22 }
0x1004   :  { %3026 = vmatpush1.bf16.msra.mxu1 %v6144_v50  ;;  %4253 = vmatpush3.bf16.msra.mxu0 %v6676_v51 }
0x1005   :  { %3027 = vmatprep.subr.bf16.mxu1 %v6677_v8  ;;  %4254 = vmatprep.subr.bf16.mxu0 %v6529_v22 }
0x1008   :  { %3028 = vmatpush1.bf16.msra.mxu1 %v6678_v10  ;;  %4255 = vmatpush3.bf16.msra.mxu0 %v6679_v34 }
0x1009   :  { %3029 = vmatprep.subr.bf16.mxu1 %v6680_v49  ;;  %4256 = vmatprep.subr.bf16.mxu0 %v6529_v22 }
0x100c   :  { %3030 = vmatpush1.bf16.msra.mxu1 %v6681_v5  ;;  %4257 = vmatpush3.bf16.msra.mxu0 %v6682_v28 }
0x100d   :  { %4262 = vmatprep.subr.bf16.mxu1 %v6529_v22 }
0x100f   :  { %3048 = vmatmul.mubr.bf16.vlgmr.msra.gmra.mxu1 %v6238_v16  ;;  %4259 = vmatmul.mubr.bf16.vlgmr.msra.gmra.mxu0 %v6238_v16 }
0x1010   :  { %4263 = vmatpush3.bf16.msra.mxu1 %v6683_v32  ;;  %4278 = vmatprep.mubr.msk.bf16.mxu1 %vm4757_vm0, %v6529_v22 }
0x1011   :  { %4264 = vmatprep.subr.bf16.mxu1 %v6529_v22 }
0x1014   :  { %4265 = vmatpush3.bf16.msra.mxu1 %v6684_v12 }
0x1015   :  { %4266 = vmatprep.subr.bf16.mxu1 %v6529_v22 }
0x1018   :  { %4267 = vmatpush3.bf16.msra.mxu1 %v6685_v11 }
0x1019   :  { %4268 = vmatprep.subr.bf16.mxu1 %v6529_v22 }
0x101c   :  { %4269 = vmatpush3.bf16.msra.mxu1 %v6686_v31 }
0x101d   :  { %4270 = vmatprep.subr.bf16.mxu1 %v6529_v22 }
0x1020   :  { %4271 = vmatpush3.bf16.msra.mxu1 %v6687_v43 }
0x1021   :  { %4272 = vmatprep.subr.bf16.mxu1 %v6529_v22 }
0x1024   :  { %4273 = vmatpush3.bf16.msra.mxu1 %v6688_v52 }
0x1025   :  { %4274 = vmatprep.subr.bf16.mxu1 %v6529_v22 }
0x1028   :  { %4275 = vmatpush3.bf16.msra.mxu1 %v6689_v25 }
0x1029   :  { %4276 = vmatprep.subr.bf16.mxu1 %v6529_v22 }
0x102c   :  { %4277 = vmatpush3.bf16.msra.mxu1 %v6690_v38 }
0x10af   :  { %v2968_v3 = vpop.f32.mrf.mxu1  ;;  %v3009_v23 = vpop.f32.mrf.mxu0 }
0x10b0   :  { %v2969_v62 = vadd.f32 %v2968_v3, %v6691_v53  ;;  %v3010_v19 = vadd.f32 %v3009_v23, %v5162_v14 }
0x10b1   :  { %v2970_v47 = vpop.f32.mrf.mxu1  ;;  %v4240_v20 = vpop.f32.mrf.mxu0 }
0x10b2   :  { %v2971_v17 = vadd.f32 %v2970_v47, %v5156_v13 }
0x10b3   :  { %v2972_v50 = vpop.f32.mrf.mxu1  ;;  %v3012_v33 = vpop.f32.mrf.mxu0 }
0x10b5   :  { %v2973_v18 = vpop.f32.mrf.mxu1  ;;  %v4241_v29 = vpop.f32.mrf.mxu0 }
0x10cf   :  { %v3049_v63 = vpop.f32.mrf.mxu1  ;;  %v3090_v56 = vpop.f32.mrf.mxu0 }
0x10d0   :  { %v3050_v21 = vadd.f32 %v3049_v63, %v6563_v41  ;;  %v3091_v27 = vadd.f32 %v3090_v56, %v5160_v45 }
0x10d1   :  { %v3051_v60 = vpop.f32.mrf.mxu1  ;;  %v4260_v42 = vpop.f32.mrf.mxu0 }
0x10d2   :  { %v3096_v9 = vadd.f32 %v3050_v21, %v2969_v62  ;;  %v3052_v30 = vadd.f32 %v3051_v60, %v5154_v44 }
0x10d3   :  { %v3053_v22 = vpop.f32.mrf.mxu1  ;;  %v3093_v36 = vpop.f32.mrf.mxu0 }
0x10d4   :  { %v3288_v35 = vmul.f32 -1.442695, %v3096_v9  ;;  %v3103_v1 = vadd.f32 %v3052_v30, %v2971_v17 }
0x10d5   :  { %v3054_v26 = vpop.f32.mrf.mxu1  ;;  %v4261_v54 = vpop.f32.mrf.mxu0 }
0x10d6   :  { %4449 = vpow2.f32 %v3288_v35  ;;  %v3289_v61 = vmul.f32 -1.442695, %v3103_v1 }
0x10d8   :  { %4451 = vpow2.f32 %v3289_v61 }
0x10e3   :  { %v4450_v39 = vpop.eup %4449 }
0x10e4   :  { %v3100_v16 = vadd.f32 1.0, %v4450_v39 }
0x10e5   :  { %v4452_v41 = vpop.eup %4451 }
0x10e6   :  { %4453 = vrcp.f32 %v3100_v16  ;;  %v3107_v2 = vadd.f32 1.0, %v4452_v41 }
0x10e8   :  { %4455 = vrcp.f32 %v3107_v2 }
0x10f3   :  { %v4454_v0 = vpop.eup %4453 }
0x10f4   :  { %v3110_v40 = vmul.f32 %v4454_v0, %v3091_v27 }
0x10f5   :  { %v4456_v58 = vpop.eup %4455 }
0x10f6   :  { %v3111_v44 = vadd.f32 %v3110_v40, %v3010_v19  ;;  %v3113_v13 = vsub.f32 1.0, %v4456_v58  ;;  %v3115_v55 = vmul.f32 %v4456_v58, %v6234_v24 }
0x10f8   :  { %4457 = vtanh.f32 %v3111_v44 }
0x1105   :  { %v4458_v37 = vpop.eup %4457 }
0x1106   :  { %v3114_v46 = vmul.f32 %v4458_v37, %v3113_v13 }
0x1108   :  { %v3116_v57 = vadd.f32 %v3115_v55, %v3114_v46 }
0x110a   :  { %v3117_v15 = vpack.c.bf16 %v3116_v57, %v3116_v57  ;;  %3164 = vst [vmem:[#allocation13] sm:$0xff] %v3116_v57 }
0x110c   :  { %4279 = vmatmul.mubr.bf16.vlgmr.msra.gmra.mxu1 %v3117_v15 }
0x110d   :  { %4706 = shalt.err (!%p4703_p1)
}
0x110e   :  { %3186 = dma.vmem_to_hbm [thread:$0]  %s3184_s20, 128, %s6368_s13, [#allocation14]  }
0x110f   :  { %s4760_s1 = smov [#allocation12]  }
0x1110   :  { %s3170_s26 = sshll.u32 %s4760_s1, 4  ;;  %s3171_s26 = int_to_ptr.vmem [resolvable:$true] %s3170_s26 }
0x1111   :  { %s4715_s27 = scalar_lea.vmem %s3171_s26, 1024  ;;  %p4720_p3 = scmp.lt.s32.totalorder %s3171_s26, %s3171_s26 }
0x1112   :  { %p4716_p2 = scmp.ne.s32.totalorder %s3171_s26, %s4715_s27  ;;  %p4721_p4 = scmp.lt.s32.totalorder %s4715_s27, %s4715_s27 }
0x1114   :  { %p4722_p5 = por %p4721_p4, %p4720_p3 }
0x1116   :  { %p4723_p6 = pnand %p4722_p5, %p4716_p2 }
0x11cc   :  { %v3152_v45 = vpop.f32.mrf.mxu1 }
0x11cd   :  { %v3153_v14 = vadd.f32 %v6281_v4, %v3152_v45 }
0x11ce   :  { %v4280_v24 = vpop.f32.mrf.mxu1 }
0x11cf   :  { %3159 = vst [vmem:[#allocation12 + $0x38] sm:$0xff] %v3153_v14 }
0x11d0   :  { %v3155_v59 = vpop.f32.mrf.mxu1 }
0x11d1   :  { %4726 = shalt.err (!%p4723_p6)
}
0x11d2   :  { %3176 = dma.vmem_to_hbm [thread:$0]  %s3171_s26, 1024, %s6367_s12, [#allocation5], %s4752_s24, %s4752_s24, %s4753_s25   ;;  %v4281_v6 = vpop.f32.mrf.mxu1 }
0x11d3   :  { %4741 = dma.done.wait [#allocation5], 1024  }
0x11d4   :  { %4742 = vsyncadd [#allocation5], 4294966272 }
0x11d5   :  { %4743 = dma.done.wait [#allocation14], 128  }
0x11d6   :  { %4744 = vsyncadd [#allocation14], 4294967168 }
0x11d7   :  { %3193 = vsyncpa [#allocation4], 1 }
0x11d8   :  { %3194 = vsyncpa [#allocation7], 1 }
0x11d9   :  { %3195 = vsyncpa [#allocation10], 1 }
0x11da   :  { %3196 = vsyncpa [#allocation5], 1 }
0x11db   :  { %3197 = vsyncpa [#allocation14], 1 }

</bundles_post_ra>
